<compile_context>
chip_gen: v7x
topology: tpu7x:2x2x1
jax: 0.10.0
libtpu: 0.0.40
codegen_flags: <defaults>
</compile_context>

<pallas_src>
import functools

import jax
import jax.numpy as jnp
from jax import lax
from jax.experimental import pallas as pl
from jax.experimental.pallas import tpu as pltpu


# ---------------------------------------------------------------------------
# Fused kernel: both EfficientAttention streams + add + Positionwise conv-FFN.
# One grid step processes Bt batch elements.
#   xr_ref/xf_ref : (Bt, L, C)
#   head_ref      : (C, C)  bf16 0/1 block-diagonal "same head" matrix
#   wq/wk/wv/wrp  : (2, C, C) bf16 (streams stacked)   biases: (2, 1, C) f32
#   w1/w2         : (C, C) bf16                        b1/b2 : (1, C)   f32
#   o_ref         : (Bt, L, C)
# ---------------------------------------------------------------------------
def _ctfb_fused_kernel(xr_ref, xf_ref, head_ref,
                       wq_ref, bq_ref, wk_ref, bk_ref, wv_ref, bv_ref,
                       wrp_ref, brp_ref,
                       w1_ref, b1_ref, w2_ref, b2_ref,
                       o_ref, *, approx_recip):
    Bt, L, C = xr_ref.shape

    head_bf = head_ref[...]                       # (C, C) bf16, exact 0/1
    head_f32 = head_bf.astype(jnp.float32)

    def recip(x):
        return pl.reciprocal(x, approx=approx_recip)

    def efficient_attention(x2, s):
        """One EfficientAttention stream. x2: (Bt*L, C) f32, s: stream id."""
        xb = x2.astype(jnp.bfloat16)

        # 1x1-conv projections: three lane-dense bf16 MXU matmuls on the folded
        # (Bt*L, C) slab (no lane slicing of a fused (.,3C) result for C < 128).
        q = jnp.dot(xb, wq_ref[s], preferred_element_type=jnp.float32) + bq_ref[s]
        k = jnp.dot(xb, wk_ref[s], preferred_element_type=jnp.float32) + bk_ref[s]
        v = jnp.dot(xb, wv_ref[s], preferred_element_type=jnp.float32) + bv_ref[s]

        # Query softmax over each head's channels (torch dim=1 per head slice),
        # position-wise -> computable on the folded slab. Shifted by the
        # per-position global max (shift-invariant, keeps the reduce lane-dense);
        # segment sums come from one bf16 block-ones matmul. denom is clamped so
        # a fully-underflowed head yields 0, never inf/NaN.
        qm = jnp.max(q, axis=1, keepdims=True)                           # (Bt*L, 1)
        qe = jnp.exp(q - qm)                                             # (Bt*L, C)
        denom = jnp.dot(qe.astype(jnp.bfloat16), head_bf,
                        preferred_element_type=jnp.float32)              # (Bt*L, C)
        denom = jnp.maximum(denom, 1e-30)
        q_sm = qe * recip(denom)

        att_parts = []
        for b in range(Bt):                       # static unroll, Bt is small
            r0, r1 = b * L, (b + 1) * L
            k_b = k[r0:r1, :]
            v_b = v[r0:r1, :]
            q_b = q_sm[r0:r1, :]

            # Key softmax over spatial positions (torch dim=2), per channel.
            km = jnp.max(k_b, axis=0, keepdims=True)                     # (1, C)
            ke = jnp.exp(k_b - km)
            k_sm = ke * recip(jnp.sum(ke, axis=0, keepdims=True))

            # Per-head context key_h^T @ value_h: single full-C contraction over
            # L in bf16, expressed over axis 0 (no materialized f32 transpose),
            # then masked to its per-head diagonal blocks.
            ctx = lax.dot_general(
                k_sm.astype(jnp.bfloat16), v_b.astype(jnp.bfloat16),
                dimension_numbers=(((0,), (0,)), ((), ())),
                preferred_element_type=jnp.float32)                      # (C, C)
            ctx = ctx * head_f32

            # attended = concat_h(query_h @ ctx_h) == one lane-dense (L,C)@(C,C).
            att_parts.append(jnp.dot(q_b.astype(jnp.bfloat16),
                                     ctx.astype(jnp.bfloat16),
                                     preferred_element_type=jnp.float32))
        att = att_parts[0] if Bt == 1 else jnp.concatenate(att_parts, axis=0)

        # Reprojection (1x1 conv) + residual.
        return (jnp.dot(att.astype(jnp.bfloat16), wrp_ref[s],
                        preferred_element_type=jnp.float32) + brp_ref[s] + x2)

    xr = xr_ref[...].reshape(Bt * L, C).astype(jnp.float32)
    xf = xf_ref[...].reshape(Bt * L, C).astype(jnp.float32)
    add_attn = efficient_attention(xr, 0) + efficient_attention(xf, 1)   # (Bt*L, C)

    # PositionwiseConv: w2(relu(w1(x))) + x  (dropout = no-op at inference).
    # TODO(synk): add LayerNorm here iff the repo's PositionwiseConv has one.
    h = jnp.dot(add_attn.astype(jnp.bfloat16), w1_ref[...],
                preferred_element_type=jnp.float32) + b1_ref[...]
    h = jnp.maximum(h, 0.0)
    ffn = jnp.dot(h.astype(jnp.bfloat16), w2_ref[...],
                  preferred_element_type=jnp.float32) + b2_ref[...]
    o_ref[...] = (ffn + add_attn).reshape(Bt, L, C).astype(o_ref.dtype)


# ---------------------------------------------------------------------------
# Wrapper-side weight preparation.
# ---------------------------------------------------------------------------
def _stack_stream_weights(attn_r, attn_f):
    """Stack both attention streams: weights (2,C,C) bf16, biases (2,1,C) f32."""
    wq_r, bq_r, wk_r, bk_r, wv_r, bv_r, wr_r, br_r = attn_r
    wq_f, bq_f, wk_f, bk_f, wv_f, bv_f, wr_f, br_f = attn_f
    stk_w = lambda a, b: jnp.stack([a, b]).astype(jnp.bfloat16)
    stk_b = lambda a, b: jnp.stack([a, b]).astype(jnp.float32)
    return (stk_w(wq_r, wq_f), stk_b(bq_r, bq_f),
            stk_w(wk_r, wk_f), stk_b(bk_r, bk_f),
            stk_w(wv_r, wv_f), stk_b(bv_r, bv_f),
            stk_w(wr_r, wr_f), stk_b(br_r, br_f))


def _head_block_matrix(channels, n_heads):
    """(C, C) bf16 block-diagonal matrix of 1s where row/col share a head."""
    hk = channels // n_heads
    h = jnp.arange(channels, dtype=jnp.int32) // hk
    return (h[:, None] == h[None, :]).astype(jnp.bfloat16)


def _pick_batch_tile(N, L, C, max_bt=8, act_budget_bytes=24 * 1024 * 1024):
    """Largest divisor of N (<= max_bt) whose activations fit the VMEM budget."""
    if L % 8 != 0:          # keep (Bt, L, C) <-> (Bt*L, C) reshapes tile-aligned
        return 1
    per_elem = 30 * L * C * 4   # ~live f32 (L, C) planes per batch element
    bt = 1
    for cand in range(1, min(N, max_bt) + 1):
        if N % cand == 0 and cand * per_elem <= act_budget_bytes:
            bt = cand
    return bt


@functools.partial(jax.jit, static_argnames=("n_heads", "approx_recip"))
def ctfb_forward(x_rgb_nchw, x_flow_nchw, params, n_heads, approx_recip=True):
    """Full CTFB forward. Inputs/outputs are NCHW (PyTorch convention)."""
    N, C, H, W = x_rgb_nchw.shape
    L = H * W
    to_nlc = lambda x: jnp.transpose(x, (0, 2, 3, 1)).reshape(N, L, C)
    to_nchw = lambda x: jnp.transpose(x.reshape(N, H, W, C), (0, 3, 1, 2))

    wq, bq, wk, bk, wv, bv, wrp, brp = _stack_stream_weights(
        params["attn_r"], params["attn_f"])
    w1, b1, w2, b2 = params["ffn"]
    w1 = w1.astype(jnp.bfloat16)
    w2 = w2.astype(jnp.bfloat16)
    b1 = b1.astype(jnp.float32)
    b2 = b2.astype(jnp.float32)
    head_block = _head_block_matrix(C, n_heads)
    # TODO(synk): on v7x, fp8(e4m3) weights with per-output-channel scales folded
    # into the bias adds would halve weight VMEM/DMA and double MXU throughput.

    Bt = _pick_batch_tile(N, L, C)
    grid = (N // Bt,)

    xsp = pl.BlockSpec((Bt, L, C), lambda i: (i, 0, 0))
    # Resident constants: constant index_map + single buffer (no double-buffering).
    resident = lambda shp: pl.BlockSpec(shp, lambda i, _s=shp: (0,) * len(_s),
                                        pipeline_mode=pl.Buffered(1))

    # VMEM limit derived from the working set (hard-coded 32 MiB only as floor).
    weight_bytes = (8 * C * C * 2 + 2 * C * C * 2 + C * C * 2 + 10 * C * 4)
    act_bytes = 30 * Bt * L * C * 4
    vmem_limit = int(min(96 * 1024 * 1024,
                         max(32 * 1024 * 1024, 2 * (weight_bytes + act_bytes))))

    out_nlc = pl.pallas_call(
        functools.partial(_ctfb_fused_kernel, approx_recip=approx_recip),
        out_shape=jax.ShapeDtypeStruct((N, L, C), x_rgb_nchw.dtype),
        grid_spec=pltpu.PrefetchScalarGridSpec(
            num_scalar_prefetch=0,
            grid=grid,
            in_specs=[
                xsp, xsp,                                     # x_rgb, x_flow
                resident((C, C)),                             # head_block
                resident((2, C, C)), resident((2, 1, C)),     # wq, bq
                resident((2, C, C)), resident((2, 1, C)),     # wk, bk
                resident((2, C, C)), resident((2, 1, C)),     # wv, bv
                resident((2, C, C)), resident((2, 1, C)),     # wrp, brp
                resident((C, C)), resident((1, C)),           # w1, b1
                resident((C, C)), resident((1, C)),           # w2, b2
            ],
            out_specs=xsp,
        ),
        compiler_params=pltpu.CompilerParams(
            dimension_semantics=("parallel",),
            vmem_limit_bytes=vmem_limit,
        ),
    )(to_nlc(x_rgb_nchw), to_nlc(x_flow_nchw),
      head_block, wq, bq, wk, bk, wv, bv, wrp, brp, w1, b1, w2, b2)
    # TODO(synk): for deployment shapes (L up to ~3136, C up to 512) add an L
    # grid axis (grid=(N//Bt, L//TL), N "parallel" for megacore, L last and
    # "arbitrary") with resident ctx / key-softmax accumulators so the per-step
    # working set stays inside v7x's 64 MiB VMEM.
    return to_nchw(out_nlc)


# ---------------------------------------------------------------------------
# Deterministic parameter initialization (synthetic, no checkpoint load).
# 1x1 Conv2d(Cin->Cout) weight stored pre-transposed as (Cin, Cout); bias (1, Cout).
# ---------------------------------------------------------------------------
def _conv1x1_params(key, c_in, c_out):
    kw, kb = jax.random.split(key)
    w = jax.random.normal(kw, (c_in, c_out), jnp.float32) * (1.0 / jnp.sqrt(c_in))
    b = jax.random.normal(kb, (1, c_out), jnp.float32) * 0.02
    return w, b


def init_ctfb_params(key, channels):
    keys = jax.random.split(key, 10)

    def attn_params(ks):
        wq, bq = _conv1x1_params(ks[0], channels, channels)
        wk, bk = _conv1x1_params(ks[1], channels, channels)
        wv, bv = _conv1x1_params(ks[2], channels, channels)
        wr, br = _conv1x1_params(ks[3], channels, channels)
        return (wq, bq, wk, bk, wv, bv, wr, br)

    w1, b1 = _conv1x1_params(keys[8], channels, channels)
    w2, b2 = _conv1x1_params(keys[9], channels, channels)
    return {
        "attn_r": attn_params(keys[0:4]),
        "attn_f": attn_params(keys[4:8]),
        "ffn": (w1, b1, w2, b2),
    }


if __name__ == "__main__":
    # Small shapes consistent with the module: NCHW, channels divisible by n_heads.
    N, C, H, W = 2, 32, 8, 8
    n_heads = 4

    root = jax.random.PRNGKey(0)
    k_rgb, k_flow, k_par = jax.random.split(root, 3)
    x_rgb = jax.random.normal(k_rgb, (N, C, H, W), jnp.float32)
    x_flow = jax.random.normal(k_flow, (N, C, H, W), jnp.float32)

    params = init_ctfb_params(k_par, C)

    out = ctfb_forward(x_rgb, x_flow, params, n_heads)
    jax.block_until_ready(out)
    assert out.shape == (N, C, H, W) and out.dtype == jnp.float32
    assert bool(jnp.all(jnp.isfinite(out)))
    print("KERNEL_OK")
</pallas_src>

<mosaic_0001>
module attributes {stable_mosaic.version = 11 : i64} {
  func.func @_ctfb_fused_kernel(%arg0: i32, %arg1: memref<2x64x32xf32, #tpu.memory_space<vmem>>, %arg2: memref<2x64x32xf32, #tpu.memory_space<vmem>>, %arg3: memref<32x32xbf16, #tpu.memory_space<vmem>>, %arg4: memref<2x32x32xbf16, #tpu.memory_space<vmem>>, %arg5: memref<2x1x32xf32, #tpu.memory_space<vmem>>, %arg6: memref<2x32x32xbf16, #tpu.memory_space<vmem>>, %arg7: memref<2x1x32xf32, #tpu.memory_space<vmem>>, %arg8: memref<2x32x32xbf16, #tpu.memory_space<vmem>>, %arg9: memref<2x1x32xf32, #tpu.memory_space<vmem>>, %arg10: memref<2x32x32xbf16, #tpu.memory_space<vmem>>, %arg11: memref<2x1x32xf32, #tpu.memory_space<vmem>>, %arg12: memref<32x32xbf16, #tpu.memory_space<vmem>>, %arg13: memref<1x32xf32, #tpu.memory_space<vmem>>, %arg14: memref<32x32xbf16, #tpu.memory_space<vmem>>, %arg15: memref<1x32xf32, #tpu.memory_space<vmem>>, %arg16: memref<2x64x32xf32, #tpu.memory_space<vmem>>) attributes {dimension_semantics = [#tpu.dimension_semantics<parallel>], iteration_bounds = array<i64: 1>, scalar_prefetch = 0 : i64, scratch_operands = 0 : i64, tpu.core_type = #tpu.core_type<tc>, window_params = [{transform_indices = @transform_0, window_bounds = array<i64: 2, 64, 32>}, {transform_indices = @transform_1, window_bounds = array<i64: 2, 64, 32>}, {pipeline_mode = #tpu.pipeline_mode<synchronous>, transform_indices = @transform_2, window_bounds = array<i64: 32, 32>}, {pipeline_mode = #tpu.pipeline_mode<synchronous>, transform_indices = @transform_3, window_bounds = array<i64: 2, 32, 32>}, {pipeline_mode = #tpu.pipeline_mode<synchronous>, transform_indices = @transform_4, window_bounds = array<i64: 2, 1, 32>}, {pipeline_mode = #tpu.pipeline_mode<synchronous>, transform_indices = @transform_5, window_bounds = array<i64: 2, 32, 32>}, {pipeline_mode = #tpu.pipeline_mode<synchronous>, transform_indices = @transform_6, window_bounds = array<i64: 2, 1, 32>}, {pipeline_mode = #tpu.pipeline_mode<synchronous>, transform_indices = @transform_7, window_bounds = array<i64: 2, 32, 32>}, {pipeline_mode = #tpu.pipeline_mode<synchronous>, transform_indices = @transform_8, window_bounds = array<i64: 2, 1, 32>}, {pipeline_mode = #tpu.pipeline_mode<synchronous>, transform_indices = @transform_9, window_bounds = array<i64: 2, 32, 32>}, {pipeline_mode = #tpu.pipeline_mode<synchronous>, transform_indices = @transform_10, window_bounds = array<i64: 2, 1, 32>}, {pipeline_mode = #tpu.pipeline_mode<synchronous>, transform_indices = @transform_11, window_bounds = array<i64: 32, 32>}, {pipeline_mode = #tpu.pipeline_mode<synchronous>, transform_indices = @transform_12, window_bounds = array<i64: 1, 32>}, {pipeline_mode = #tpu.pipeline_mode<synchronous>, transform_indices = @transform_13, window_bounds = array<i64: 32, 32>}, {pipeline_mode = #tpu.pipeline_mode<synchronous>, transform_indices = @transform_14, window_bounds = array<i64: 1, 32>}, {transform_indices = @transform_15, window_bounds = array<i64: 2, 64, 32>}]} {
    %c0 = arith.constant 0 : index
    %c0_0 = arith.constant 0 : index
    %0 = vector.load %arg3[%c0, %c0_0] : memref<32x32xbf16, #tpu.memory_space<vmem>>, vector<32x32xbf16>
    %1 = arith.extf %0 : vector<32x32xbf16> to vector<32x32xf32>
    %c0_1 = arith.constant 0 : index
    %c0_2 = arith.constant 0 : index
    %c0_3 = arith.constant 0 : index
    %2 = vector.load %arg1[%c0_1, %c0_2, %c0_3] : memref<2x64x32xf32, #tpu.memory_space<vmem>>, vector<2x64x32xf32>
    %3 = vector.shape_cast %2 : vector<2x64x32xf32> to vector<128x32xf32>
    %c0_4 = arith.constant 0 : index
    %c0_5 = arith.constant 0 : index
    %c0_6 = arith.constant 0 : index
    %4 = vector.load %arg2[%c0_4, %c0_5, %c0_6] : memref<2x64x32xf32, #tpu.memory_space<vmem>>, vector<2x64x32xf32>
    %5 = vector.shape_cast %4 : vector<2x64x32xf32> to vector<128x32xf32>
    %6 = arith.truncf %3 : vector<128x32xf32> to vector<128x32xbf16>
    %c0_7 = arith.constant 0 : index
    %c0_8 = arith.constant 0 : index
    %c0_9 = arith.constant 0 : index
    %7 = vector.load %arg4[%c0_7, %c0_8, %c0_9] : memref<2x32x32xbf16, #tpu.memory_space<vmem>>, vector<1x32x32xbf16>
    %8 = vector.shape_cast %7 : vector<1x32x32xbf16> to vector<32x32xbf16>
    %cst = arith.constant dense<0.000000e+00> : vector<128x32xf32>
    %9 = tpu.matmul %6, %8, %cst {dimension_numbers = #tpu.dot_dimension_numbers<[1], [0], [0], [1], [0, 0, 1, 1], [], []>} : vector<128x32xbf16>, vector<32x32xbf16>, vector<128x32xf32> -> vector<128x32xf32>
    %c0_10 = arith.constant 0 : index
    %c0_11 = arith.constant 0 : index
    %c0_12 = arith.constant 0 : index
    %10 = vector.load %arg5[%c0_10, %c0_11, %c0_12] : memref<2x1x32xf32, #tpu.memory_space<vmem>>, vector<1x1x32xf32>
    %11 = vector.shape_cast %10 : vector<1x1x32xf32> to vector<1x32xf32>
    %12 = vector.broadcast %11 : vector<1x32xf32> to vector<128x32xf32>
    %13 = arith.addf %9, %12 : vector<128x32xf32>
    %c0_13 = arith.constant 0 : index
    %c0_14 = arith.constant 0 : index
    %c0_15 = arith.constant 0 : index
    %14 = vector.load %arg6[%c0_13, %c0_14, %c0_15] : memref<2x32x32xbf16, #tpu.memory_space<vmem>>, vector<1x32x32xbf16>
    %15 = vector.shape_cast %14 : vector<1x32x32xbf16> to vector<32x32xbf16>
    %cst_16 = arith.constant dense<0.000000e+00> : vector<128x32xf32>
    %16 = tpu.matmul %6, %15, %cst_16 {dimension_numbers = #tpu.dot_dimension_numbers<[1], [0], [0], [1], [0, 0, 1, 1], [], []>} : vector<128x32xbf16>, vector<32x32xbf16>, vector<128x32xf32> -> vector<128x32xf32>
    %c0_17 = arith.constant 0 : index
    %c0_18 = arith.constant 0 : index
    %c0_19 = arith.constant 0 : index
    %17 = vector.load %arg7[%c0_17, %c0_18, %c0_19] : memref<2x1x32xf32, #tpu.memory_space<vmem>>, vector<1x1x32xf32>
    %18 = vector.shape_cast %17 : vector<1x1x32xf32> to vector<1x32xf32>
    %19 = vector.broadcast %18 : vector<1x32xf32> to vector<128x32xf32>
    %20 = arith.addf %16, %19 : vector<128x32xf32>
    %c0_20 = arith.constant 0 : index
    %c0_21 = arith.constant 0 : index
    %c0_22 = arith.constant 0 : index
    %21 = vector.load %arg8[%c0_20, %c0_21, %c0_22] : memref<2x32x32xbf16, #tpu.memory_space<vmem>>, vector<1x32x32xbf16>
    %22 = vector.shape_cast %21 : vector<1x32x32xbf16> to vector<32x32xbf16>
    %cst_23 = arith.constant dense<0.000000e+00> : vector<128x32xf32>
    %23 = tpu.matmul %6, %22, %cst_23 {dimension_numbers = #tpu.dot_dimension_numbers<[1], [0], [0], [1], [0, 0, 1, 1], [], []>} : vector<128x32xbf16>, vector<32x32xbf16>, vector<128x32xf32> -> vector<128x32xf32>
    %c0_24 = arith.constant 0 : index
    %c0_25 = arith.constant 0 : index
    %c0_26 = arith.constant 0 : index
    %24 = vector.load %arg9[%c0_24, %c0_25, %c0_26] : memref<2x1x32xf32, #tpu.memory_space<vmem>>, vector<1x1x32xf32>
    %25 = vector.shape_cast %24 : vector<1x1x32xf32> to vector<1x32xf32>
    %26 = vector.broadcast %25 : vector<1x32xf32> to vector<128x32xf32>
    %27 = arith.addf %23, %26 : vector<128x32xf32>
    %cst_27 = arith.constant dense<0xFF800000> : vector<128xf32>
    %28 = vector.multi_reduction <maximumf>, %13, %cst_27 [1] : vector<128x32xf32> to vector<128xf32>
    %29 = vector.shape_cast %28 : vector<128xf32> to vector<128x1xf32>
    %30 = vector.broadcast %29 : vector<128x1xf32> to vector<128x32xf32>
    %31 = arith.subf %13, %30 : vector<128x32xf32>
    %32 = math.exp %31 : vector<128x32xf32>
    %33 = arith.truncf %32 : vector<128x32xf32> to vector<128x32xbf16>
    %cst_28 = arith.constant dense<0.000000e+00> : vector<128x32xf32>
    %34 = tpu.matmul %33, %0, %cst_28 {dimension_numbers = #tpu.dot_dimension_numbers<[1], [0], [0], [1], [0, 0, 1, 1], [], []>} : vector<128x32xbf16>, vector<32x32xbf16>, vector<128x32xf32> -> vector<128x32xf32>
    %cst_29 = arith.constant 1.000000e-30 : f32
    %35 = vector.broadcast %cst_29 : f32 to vector<128x32xf32>
    %36 = arith.maximumf %34, %35 : vector<128x32xf32>
    %37 = tpu.reciprocal %36 {approx = true} : vector<128x32xf32> -> vector<128x32xf32>
    %38 = arith.mulf %32, %37 : vector<128x32xf32>
    %39 = vector.extract_strided_slice %20 {offsets = [0, 0], sizes = [64, 32], strides = [1, 1]} : vector<128x32xf32> to vector<64x32xf32>
    %40 = vector.extract_strided_slice %27 {offsets = [0, 0], sizes = [64, 32], strides = [1, 1]} : vector<128x32xf32> to vector<64x32xf32>
    %41 = vector.extract_strided_slice %38 {offsets = [0, 0], sizes = [64, 32], strides = [1, 1]} : vector<128x32xf32> to vector<64x32xf32>
    %cst_30 = arith.constant dense<0xFF800000> : vector<32xf32>
    %42 = vector.multi_reduction <maximumf>, %39, %cst_30 [0] : vector<64x32xf32> to vector<32xf32>
    %43 = vector.shape_cast %42 : vector<32xf32> to vector<1x32xf32>
    %44 = vector.broadcast %43 : vector<1x32xf32> to vector<64x32xf32>
    %45 = arith.subf %39, %44 : vector<64x32xf32>
    %46 = math.exp %45 : vector<64x32xf32>
    %cst_31 = arith.constant dense<0.000000e+00> : vector<32xf32>
    %47 = vector.multi_reduction <add>, %46, %cst_31 [0] : vector<64x32xf32> to vector<32xf32>
    %48 = vector.shape_cast %47 : vector<32xf32> to vector<1x32xf32>
    %49 = tpu.reciprocal %48 {approx = true} : vector<1x32xf32> -> vector<1x32xf32>
    %50 = vector.broadcast %49 : vector<1x32xf32> to vector<64x32xf32>
    %51 = arith.mulf %46, %50 : vector<64x32xf32>
    %52 = arith.truncf %51 : vector<64x32xf32> to vector<64x32xbf16>
    %53 = arith.truncf %40 : vector<64x32xf32> to vector<64x32xbf16>
    %cst_32 = arith.constant dense<0.000000e+00> : vector<32x32xf32>
    %54 = tpu.matmul %52, %53, %cst_32 {dimension_numbers = #tpu.dot_dimension_numbers<[0], [0], [1], [1], [0, 1, 1, 1], [], []>} : vector<64x32xbf16>, vector<64x32xbf16>, vector<32x32xf32> -> vector<32x32xf32>
    %55 = arith.mulf %54, %1 : vector<32x32xf32>
    %56 = arith.truncf %41 : vector<64x32xf32> to vector<64x32xbf16>
    %57 = arith.truncf %55 : vector<32x32xf32> to vector<32x32xbf16>
    %cst_33 = arith.constant dense<0.000000e+00> : vector<64x32xf32>
    %58 = tpu.matmul %56, %57, %cst_33 {dimension_numbers = #tpu.dot_dimension_numbers<[1], [0], [0], [1], [0, 0, 1, 1], [], []>} : vector<64x32xbf16>, vector<32x32xbf16>, vector<64x32xf32> -> vector<64x32xf32>
    %59 = vector.extract_strided_slice %20 {offsets = [64, 0], sizes = [64, 32], strides = [1, 1]} : vector<128x32xf32> to vector<64x32xf32>
    %60 = vector.extract_strided_slice %27 {offsets = [64, 0], sizes = [64, 32], strides = [1, 1]} : vector<128x32xf32> to vector<64x32xf32>
    %61 = vector.extract_strided_slice %38 {offsets = [64, 0], sizes = [64, 32], strides = [1, 1]} : vector<128x32xf32> to vector<64x32xf32>
    %cst_34 = arith.constant dense<0xFF800000> : vector<32xf32>
    %62 = vector.multi_reduction <maximumf>, %59, %cst_34 [0] : vector<64x32xf32> to vector<32xf32>
    %63 = vector.shape_cast %62 : vector<32xf32> to vector<1x32xf32>
    %64 = vector.broadcast %63 : vector<1x32xf32> to vector<64x32xf32>
    %65 = arith.subf %59, %64 : vector<64x32xf32>
    %66 = math.exp %65 : vector<64x32xf32>
    %cst_35 = arith.constant dense<0.000000e+00> : vector<32xf32>
    %67 = vector.multi_reduction <add>, %66, %cst_35 [0] : vector<64x32xf32> to vector<32xf32>
    %68 = vector.shape_cast %67 : vector<32xf32> to vector<1x32xf32>
    %69 = tpu.reciprocal %68 {approx = true} : vector<1x32xf32> -> vector<1x32xf32>
    %70 = vector.broadcast %69 : vector<1x32xf32> to vector<64x32xf32>
    %71 = arith.mulf %66, %70 : vector<64x32xf32>
    %72 = arith.truncf %71 : vector<64x32xf32> to vector<64x32xbf16>
    %73 = arith.truncf %60 : vector<64x32xf32> to vector<64x32xbf16>
    %cst_36 = arith.constant dense<0.000000e+00> : vector<32x32xf32>
    %74 = tpu.matmul %72, %73, %cst_36 {dimension_numbers = #tpu.dot_dimension_numbers<[0], [0], [1], [1], [0, 1, 1, 1], [], []>} : vector<64x32xbf16>, vector<64x32xbf16>, vector<32x32xf32> -> vector<32x32xf32>
    %75 = arith.mulf %74, %1 : vector<32x32xf32>
    %76 = arith.truncf %61 : vector<64x32xf32> to vector<64x32xbf16>
    %77 = arith.truncf %75 : vector<32x32xf32> to vector<32x32xbf16>
    %cst_37 = arith.constant dense<0.000000e+00> : vector<64x32xf32>
    %78 = tpu.matmul %76, %77, %cst_37 {dimension_numbers = #tpu.dot_dimension_numbers<[1], [0], [0], [1], [0, 0, 1, 1], [], []>} : vector<64x32xbf16>, vector<32x32xbf16>, vector<64x32xf32> -> vector<64x32xf32>
    %79 = tpu.concatenate %58, %78 in 0 : vector<64x32xf32>, vector<64x32xf32> -> vector<128x32xf32>
    %80 = arith.truncf %79 : vector<128x32xf32> to vector<128x32xbf16>
    %c0_38 = arith.constant 0 : index
    %c0_39 = arith.constant 0 : index
    %c0_40 = arith.constant 0 : index
    %81 = vector.load %arg10[%c0_38, %c0_39, %c0_40] : memref<2x32x32xbf16, #tpu.memory_space<vmem>>, vector<1x32x32xbf16>
    %82 = vector.shape_cast %81 : vector<1x32x32xbf16> to vector<32x32xbf16>
    %cst_41 = arith.constant dense<0.000000e+00> : vector<128x32xf32>
    %83 = tpu.matmul %80, %82, %cst_41 {dimension_numbers = #tpu.dot_dimension_numbers<[1], [0], [0], [1], [0, 0, 1, 1], [], []>} : vector<128x32xbf16>, vector<32x32xbf16>, vector<128x32xf32> -> vector<128x32xf32>
    %c0_42 = arith.constant 0 : index
    %c0_43 = arith.constant 0 : index
    %c0_44 = arith.constant 0 : index
    %84 = vector.load %arg11[%c0_42, %c0_43, %c0_44] : memref<2x1x32xf32, #tpu.memory_space<vmem>>, vector<1x1x32xf32>
    %85 = vector.shape_cast %84 : vector<1x1x32xf32> to vector<1x32xf32>
    %86 = vector.broadcast %85 : vector<1x32xf32> to vector<128x32xf32>
    %87 = arith.addf %83, %86 : vector<128x32xf32>
    %88 = arith.addf %87, %3 : vector<128x32xf32>
    %89 = arith.truncf %5 : vector<128x32xf32> to vector<128x32xbf16>
    %c1 = arith.constant 1 : index
    %c0_45 = arith.constant 0 : index
    %c0_46 = arith.constant 0 : index
    %90 = vector.load %arg4[%c1, %c0_45, %c0_46] : memref<2x32x32xbf16, #tpu.memory_space<vmem>>, vector<1x32x32xbf16>
    %91 = vector.shape_cast %90 : vector<1x32x32xbf16> to vector<32x32xbf16>
    %cst_47 = arith.constant dense<0.000000e+00> : vector<128x32xf32>
    %92 = tpu.matmul %89, %91, %cst_47 {dimension_numbers = #tpu.dot_dimension_numbers<[1], [0], [0], [1], [0, 0, 1, 1], [], []>} : vector<128x32xbf16>, vector<32x32xbf16>, vector<128x32xf32> -> vector<128x32xf32>
    %c1_48 = arith.constant 1 : index
    %c0_49 = arith.constant 0 : index
    %c0_50 = arith.constant 0 : index
    %93 = vector.load %arg5[%c1_48, %c0_49, %c0_50] : memref<2x1x32xf32, #tpu.memory_space<vmem>>, vector<1x1x32xf32>
    %94 = vector.shape_cast %93 : vector<1x1x32xf32> to vector<1x32xf32>
    %95 = vector.broadcast %94 : vector<1x32xf32> to vector<128x32xf32>
    %96 = arith.addf %92, %95 : vector<128x32xf32>
    %c1_51 = arith.constant 1 : index
    %c0_52 = arith.constant 0 : index
    %c0_53 = arith.constant 0 : index
    %97 = vector.load %arg6[%c1_51, %c0_52, %c0_53] : memref<2x32x32xbf16, #tpu.memory_space<vmem>>, vector<1x32x32xbf16>
    %98 = vector.shape_cast %97 : vector<1x32x32xbf16> to vector<32x32xbf16>
    %cst_54 = arith.constant dense<0.000000e+00> : vector<128x32xf32>
    %99 = tpu.matmul %89, %98, %cst_54 {dimension_numbers = #tpu.dot_dimension_numbers<[1], [0], [0], [1], [0, 0, 1, 1], [], []>} : vector<128x32xbf16>, vector<32x32xbf16>, vector<128x32xf32> -> vector<128x32xf32>
    %c1_55 = arith.constant 1 : index
    %c0_56 = arith.constant 0 : index
    %c0_57 = arith.constant 0 : index
    %100 = vector.load %arg7[%c1_55, %c0_56, %c0_57] : memref<2x1x32xf32, #tpu.memory_space<vmem>>, vector<1x1x32xf32>
    %101 = vector.shape_cast %100 : vector<1x1x32xf32> to vector<1x32xf32>
    %102 = vector.broadcast %101 : vector<1x32xf32> to vector<128x32xf32>
    %103 = arith.addf %99, %102 : vector<128x32xf32>
    %c1_58 = arith.constant 1 : index
    %c0_59 = arith.constant 0 : index
    %c0_60 = arith.constant 0 : index
    %104 = vector.load %arg8[%c1_58, %c0_59, %c0_60] : memref<2x32x32xbf16, #tpu.memory_space<vmem>>, vector<1x32x32xbf16>
    %105 = vector.shape_cast %104 : vector<1x32x32xbf16> to vector<32x32xbf16>
    %cst_61 = arith.constant dense<0.000000e+00> : vector<128x32xf32>
    %106 = tpu.matmul %89, %105, %cst_61 {dimension_numbers = #tpu.dot_dimension_numbers<[1], [0], [0], [1], [0, 0, 1, 1], [], []>} : vector<128x32xbf16>, vector<32x32xbf16>, vector<128x32xf32> -> vector<128x32xf32>
    %c1_62 = arith.constant 1 : index
    %c0_63 = arith.constant 0 : index
    %c0_64 = arith.constant 0 : index
    %107 = vector.load %arg9[%c1_62, %c0_63, %c0_64] : memref<2x1x32xf32, #tpu.memory_space<vmem>>, vector<1x1x32xf32>
    %108 = vector.shape_cast %107 : vector<1x1x32xf32> to vector<1x32xf32>
    %109 = vector.broadcast %108 : vector<1x32xf32> to vector<128x32xf32>
    %110 = arith.addf %106, %109 : vector<128x32xf32>
    %cst_65 = arith.constant dense<0xFF800000> : vector<128xf32>
    %111 = vector.multi_reduction <maximumf>, %96, %cst_65 [1] : vector<128x32xf32> to vector<128xf32>
    %112 = vector.shape_cast %111 : vector<128xf32> to vector<128x1xf32>
    %113 = vector.broadcast %112 : vector<128x1xf32> to vector<128x32xf32>
    %114 = arith.subf %96, %113 : vector<128x32xf32>
    %115 = math.exp %114 : vector<128x32xf32>
    %116 = arith.truncf %115 : vector<128x32xf32> to vector<128x32xbf16>
    %cst_66 = arith.constant dense<0.000000e+00> : vector<128x32xf32>
    %117 = tpu.matmul %116, %0, %cst_66 {dimension_numbers = #tpu.dot_dimension_numbers<[1], [0], [0], [1], [0, 0, 1, 1], [], []>} : vector<128x32xbf16>, vector<32x32xbf16>, vector<128x32xf32> -> vector<128x32xf32>
    %cst_67 = arith.constant 1.000000e-30 : f32
    %118 = vector.broadcast %cst_67 : f32 to vector<128x32xf32>
    %119 = arith.maximumf %117, %118 : vector<128x32xf32>
    %120 = tpu.reciprocal %119 {approx = true} : vector<128x32xf32> -> vector<128x32xf32>
    %121 = arith.mulf %115, %120 : vector<128x32xf32>
    %122 = vector.extract_strided_slice %103 {offsets = [0, 0], sizes = [64, 32], strides = [1, 1]} : vector<128x32xf32> to vector<64x32xf32>
    %123 = vector.extract_strided_slice %110 {offsets = [0, 0], sizes = [64, 32], strides = [1, 1]} : vector<128x32xf32> to vector<64x32xf32>
    %124 = vector.extract_strided_slice %121 {offsets = [0, 0], sizes = [64, 32], strides = [1, 1]} : vector<128x32xf32> to vector<64x32xf32>
    %cst_68 = arith.constant dense<0xFF800000> : vector<32xf32>
    %125 = vector.multi_reduction <maximumf>, %122, %cst_68 [0] : vector<64x32xf32> to vector<32xf32>
    %126 = vector.shape_cast %125 : vector<32xf32> to vector<1x32xf32>
    %127 = vector.broadcast %126 : vector<1x32xf32> to vector<64x32xf32>
    %128 = arith.subf %122, %127 : vector<64x32xf32>
    %129 = math.exp %128 : vector<64x32xf32>
    %cst_69 = arith.constant dense<0.000000e+00> : vector<32xf32>
    %130 = vector.multi_reduction <add>, %129, %cst_69 [0] : vector<64x32xf32> to vector<32xf32>
    %131 = vector.shape_cast %130 : vector<32xf32> to vector<1x32xf32>
    %132 = tpu.reciprocal %131 {approx = true} : vector<1x32xf32> -> vector<1x32xf32>
    %133 = vector.broadcast %132 : vector<1x32xf32> to vector<64x32xf32>
    %134 = arith.mulf %129, %133 : vector<64x32xf32>
    %135 = arith.truncf %134 : vector<64x32xf32> to vector<64x32xbf16>
    %136 = arith.truncf %123 : vector<64x32xf32> to vector<64x32xbf16>
    %cst_70 = arith.constant dense<0.000000e+00> : vector<32x32xf32>
    %137 = tpu.matmul %135, %136, %cst_70 {dimension_numbers = #tpu.dot_dimension_numbers<[0], [0], [1], [1], [0, 1, 1, 1], [], []>} : vector<64x32xbf16>, vector<64x32xbf16>, vector<32x32xf32> -> vector<32x32xf32>
    %138 = arith.mulf %137, %1 : vector<32x32xf32>
    %139 = arith.truncf %124 : vector<64x32xf32> to vector<64x32xbf16>
    %140 = arith.truncf %138 : vector<32x32xf32> to vector<32x32xbf16>
    %cst_71 = arith.constant dense<0.000000e+00> : vector<64x32xf32>
    %141 = tpu.matmul %139, %140, %cst_71 {dimension_numbers = #tpu.dot_dimension_numbers<[1], [0], [0], [1], [0, 0, 1, 1], [], []>} : vector<64x32xbf16>, vector<32x32xbf16>, vector<64x32xf32> -> vector<64x32xf32>
    %142 = vector.extract_strided_slice %103 {offsets = [64, 0], sizes = [64, 32], strides = [1, 1]} : vector<128x32xf32> to vector<64x32xf32>
    %143 = vector.extract_strided_slice %110 {offsets = [64, 0], sizes = [64, 32], strides = [1, 1]} : vector<128x32xf32> to vector<64x32xf32>
    %144 = vector.extract_strided_slice %121 {offsets = [64, 0], sizes = [64, 32], strides = [1, 1]} : vector<128x32xf32> to vector<64x32xf32>
    %cst_72 = arith.constant dense<0xFF800000> : vector<32xf32>
    %145 = vector.multi_reduction <maximumf>, %142, %cst_72 [0] : vector<64x32xf32> to vector<32xf32>
    %146 = vector.shape_cast %145 : vector<32xf32> to vector<1x32xf32>
    %147 = vector.broadcast %146 : vector<1x32xf32> to vector<64x32xf32>
    %148 = arith.subf %142, %147 : vector<64x32xf32>
    %149 = math.exp %148 : vector<64x32xf32>
    %cst_73 = arith.constant dense<0.000000e+00> : vector<32xf32>
    %150 = vector.multi_reduction <add>, %149, %cst_73 [0] : vector<64x32xf32> to vector<32xf32>
    %151 = vector.shape_cast %150 : vector<32xf32> to vector<1x32xf32>
    %152 = tpu.reciprocal %151 {approx = true} : vector<1x32xf32> -> vector<1x32xf32>
    %153 = vector.broadcast %152 : vector<1x32xf32> to vector<64x32xf32>
    %154 = arith.mulf %149, %153 : vector<64x32xf32>
    %155 = arith.truncf %154 : vector<64x32xf32> to vector<64x32xbf16>
    %156 = arith.truncf %143 : vector<64x32xf32> to vector<64x32xbf16>
    %cst_74 = arith.constant dense<0.000000e+00> : vector<32x32xf32>
    %157 = tpu.matmul %155, %156, %cst_74 {dimension_numbers = #tpu.dot_dimension_numbers<[0], [0], [1], [1], [0, 1, 1, 1], [], []>} : vector<64x32xbf16>, vector<64x32xbf16>, vector<32x32xf32> -> vector<32x32xf32>
    %158 = arith.mulf %157, %1 : vector<32x32xf32>
    %159 = arith.truncf %144 : vector<64x32xf32> to vector<64x32xbf16>
    %160 = arith.truncf %158 : vector<32x32xf32> to vector<32x32xbf16>
    %cst_75 = arith.constant dense<0.000000e+00> : vector<64x32xf32>
    %161 = tpu.matmul %159, %160, %cst_75 {dimension_numbers = #tpu.dot_dimension_numbers<[1], [0], [0], [1], [0, 0, 1, 1], [], []>} : vector<64x32xbf16>, vector<32x32xbf16>, vector<64x32xf32> -> vector<64x32xf32>
    %162 = tpu.concatenate %141, %161 in 0 : vector<64x32xf32>, vector<64x32xf32> -> vector<128x32xf32>
    %163 = arith.truncf %162 : vector<128x32xf32> to vector<128x32xbf16>
    %c1_76 = arith.constant 1 : index
    %c0_77 = arith.constant 0 : index
    %c0_78 = arith.constant 0 : index
    %164 = vector.load %arg10[%c1_76, %c0_77, %c0_78] : memref<2x32x32xbf16, #tpu.memory_space<vmem>>, vector<1x32x32xbf16>
    %165 = vector.shape_cast %164 : vector<1x32x32xbf16> to vector<32x32xbf16>
    %cst_79 = arith.constant dense<0.000000e+00> : vector<128x32xf32>
    %166 = tpu.matmul %163, %165, %cst_79 {dimension_numbers = #tpu.dot_dimension_numbers<[1], [0], [0], [1], [0, 0, 1, 1], [], []>} : vector<128x32xbf16>, vector<32x32xbf16>, vector<128x32xf32> -> vector<128x32xf32>
    %c1_80 = arith.constant 1 : index
    %c0_81 = arith.constant 0 : index
    %c0_82 = arith.constant 0 : index
    %167 = vector.load %arg11[%c1_80, %c0_81, %c0_82] : memref<2x1x32xf32, #tpu.memory_space<vmem>>, vector<1x1x32xf32>
    %168 = vector.shape_cast %167 : vector<1x1x32xf32> to vector<1x32xf32>
    %169 = vector.broadcast %168 : vector<1x32xf32> to vector<128x32xf32>
    %170 = arith.addf %166, %169 : vector<128x32xf32>
    %171 = arith.addf %170, %5 : vector<128x32xf32>
    %172 = arith.addf %88, %171 : vector<128x32xf32>
    %173 = arith.truncf %172 : vector<128x32xf32> to vector<128x32xbf16>
    %c0_83 = arith.constant 0 : index
    %c0_84 = arith.constant 0 : index
    %174 = vector.load %arg12[%c0_83, %c0_84] : memref<32x32xbf16, #tpu.memory_space<vmem>>, vector<32x32xbf16>
    %cst_85 = arith.constant dense<0.000000e+00> : vector<128x32xf32>
    %175 = tpu.matmul %173, %174, %cst_85 {dimension_numbers = #tpu.dot_dimension_numbers<[1], [0], [0], [1], [0, 0, 1, 1], [], []>} : vector<128x32xbf16>, vector<32x32xbf16>, vector<128x32xf32> -> vector<128x32xf32>
    %c0_86 = arith.constant 0 : index
    %c0_87 = arith.constant 0 : index
    %176 = vector.load %arg13[%c0_86, %c0_87] : memref<1x32xf32, #tpu.memory_space<vmem>>, vector<1x32xf32>
    %177 = vector.broadcast %176 : vector<1x32xf32> to vector<128x32xf32>
    %178 = arith.addf %175, %177 : vector<128x32xf32>
    %cst_88 = arith.constant 0.000000e+00 : f32
    %179 = vector.broadcast %cst_88 : f32 to vector<128x32xf32>
    %180 = arith.maximumf %178, %179 : vector<128x32xf32>
    %181 = arith.truncf %180 : vector<128x32xf32> to vector<128x32xbf16>
    %c0_89 = arith.constant 0 : index
    %c0_90 = arith.constant 0 : index
    %182 = vector.load %arg14[%c0_89, %c0_90] : memref<32x32xbf16, #tpu.memory_space<vmem>>, vector<32x32xbf16>
    %cst_91 = arith.constant dense<0.000000e+00> : vector<128x32xf32>
    %183 = tpu.matmul %181, %182, %cst_91 {dimension_numbers = #tpu.dot_dimension_numbers<[1], [0], [0], [1], [0, 0, 1, 1], [], []>} : vector<128x32xbf16>, vector<32x32xbf16>, vector<128x32xf32> -> vector<128x32xf32>
    %c0_92 = arith.constant 0 : index
    %c0_93 = arith.constant 0 : index
    %184 = vector.load %arg15[%c0_92, %c0_93] : memref<1x32xf32, #tpu.memory_space<vmem>>, vector<1x32xf32>
    %185 = vector.broadcast %184 : vector<1x32xf32> to vector<128x32xf32>
    %186 = arith.addf %183, %185 : vector<128x32xf32>
    %187 = arith.addf %186, %172 : vector<128x32xf32>
    %188 = vector.shape_cast %187 : vector<128x32xf32> to vector<2x64x32xf32>
    %c0_94 = arith.constant 0 : index
    %c0_95 = arith.constant 0 : index
    %c0_96 = arith.constant 0 : index
    %189 = vector.load %arg16[%c0_94, %c0_95, %c0_96] : memref<2x64x32xf32, #tpu.memory_space<vmem>>, vector<2x64x32xf32>
    tpu.vector_store %arg16[%c0_94, %c0_95, %c0_96], %188 {strides = array<i32>} : memref<2x64x32xf32, #tpu.memory_space<vmem>>, vector<2x64x32xf32>,
    return
  }
  func.func @transform_0(%arg0: i32) -> (i32, i32, i32) {
    %c0_i32 = arith.constant 0 : i32
    %c0_i32_0 = arith.constant 0 : i32
    %c0_i32_1 = arith.constant 0 : i32
    return %arg0, %c0_i32, %c0_i32_0 : i32, i32, i32
  }
  func.func @transform_1(%arg0: i32) -> (i32, i32, i32) {
    %c0_i32 = arith.constant 0 : i32
    %c0_i32_0 = arith.constant 0 : i32
    %c0_i32_1 = arith.constant 0 : i32
    return %arg0, %c0_i32, %c0_i32_0 : i32, i32, i32
  }
  func.func @transform_2(%arg0: i32) -> (i32, i32) {
    %c0_i32 = arith.constant 0 : i32
    %c0_i32_0 = arith.constant 0 : i32
    %c0_i32_1 = arith.constant 0 : i32
    return %c0_i32, %c0_i32_0 : i32, i32
  }
  func.func @transform_3(%arg0: i32) -> (i32, i32, i32) {
    %c0_i32 = arith.constant 0 : i32
    %c0_i32_0 = arith.constant 0 : i32
    %c0_i32_1 = arith.constant 0 : i32
    %c0_i32_2 = arith.constant 0 : i32
    return %c0_i32, %c0_i32_0, %c0_i32_1 : i32, i32, i32
  }
  func.func @transform_4(%arg0: i32) -> (i32, i32, i32) {
    %c0_i32 = arith.constant 0 : i32
    %c0_i32_0 = arith.constant 0 : i32
    %c0_i32_1 = arith.constant 0 : i32
    %c0_i32_2 = arith.constant 0 : i32
    return %c0_i32, %c0_i32_0, %c0_i32_1 : i32, i32, i32
  }
  func.func @transform_5(%arg0: i32) -> (i32, i32, i32) {
    %c0_i32 = arith.constant 0 : i32
    %c0_i32_0 = arith.constant 0 : i32
    %c0_i32_1 = arith.constant 0 : i32
    %c0_i32_2 = arith.constant 0 : i32
    return %c0_i32, %c0_i32_0, %c0_i32_1 : i32, i32, i32
  }
  func.func @transform_6(%arg0: i32) -> (i32, i32, i32) {
    %c0_i32 = arith.constant 0 : i32
    %c0_i32_0 = arith.constant 0 : i32
    %c0_i32_1 = arith.constant 0 : i32
    %c0_i32_2 = arith.constant 0 : i32
    return %c0_i32, %c0_i32_0, %c0_i32_1 : i32, i32, i32
  }
  func.func @transform_7(%arg0: i32) -> (i32, i32, i32) {
    %c0_i32 = arith.constant 0 : i32
    %c0_i32_0 = arith.constant 0 : i32
    %c0_i32_1 = arith.constant 0 : i32
    %c0_i32_2 = arith.constant 0 : i32
    return %c0_i32, %c0_i32_0, %c0_i32_1 : i32, i32, i32
  }
  func.func @transform_8(%arg0: i32) -> (i32, i32, i32) {
    %c0_i32 = arith.constant 0 : i32
    %c0_i32_0 = arith.constant 0 : i32
    %c0_i32_1 = arith.constant 0 : i32
    %c0_i32_2 = arith.constant 0 : i32
    return %c0_i32, %c0_i32_0, %c0_i32_1 : i32, i32, i32
  }
  func.func @transform_9(%arg0: i32) -> (i32, i32, i32) {
    %c0_i32 = arith.constant 0 : i32
    %c0_i32_0 = arith.constant 0 : i32
    %c0_i32_1 = arith.constant 0 : i32
    %c0_i32_2 = arith.constant 0 : i32
    return %c0_i32, %c0_i32_0, %c0_i32_1 : i32, i32, i32
  }
  func.func @transform_10(%arg0: i32) -> (i32, i32, i32) {
    %c0_i32 = arith.constant 0 : i32
    %c0_i32_0 = arith.constant 0 : i32
    %c0_i32_1 = arith.constant 0 : i32
    %c0_i32_2 = arith.constant 0 : i32
    return %c0_i32, %c0_i32_0, %c0_i32_1 : i32, i32, i32
  }
  func.func @transform_11(%arg0: i32) -> (i32, i32) {
    %c0_i32 = arith.constant 0 : i32
    %c0_i32_0 = arith.constant 0 : i32
    %c0_i32_1 = arith.constant 0 : i32
    return %c0_i32, %c0_i32_0 : i32, i32
  }
  func.func @transform_12(%arg0: i32) -> (i32, i32) {
    %c0_i32 = arith.constant 0 : i32
    %c0_i32_0 = arith.constant 0 : i32
    %c0_i32_1 = arith.constant 0 : i32
    return %c0_i32, %c0_i32_0 : i32, i32
  }
  func.func @transform_13(%arg0: i32) -> (i32, i32) {
    %c0_i32 = arith.constant 0 : i32
    %c0_i32_0 = arith.constant 0 : i32
    %c0_i32_1 = arith.constant 0 : i32
    return %c0_i32, %c0_i32_0 : i32, i32
  }
  func.func @transform_14(%arg0: i32) -> (i32, i32) {
    %c0_i32 = arith.constant 0 : i32
    %c0_i32_0 = arith.constant 0 : i32
    %c0_i32_1 = arith.constant 0 : i32
    return %c0_i32, %c0_i32_0 : i32, i32
  }
  func.func @transform_15(%arg0: i32) -> (i32, i32, i32) {
    %c0_i32 = arith.constant 0 : i32
    %c0_i32_0 = arith.constant 0 : i32
    %c0_i32_1 = arith.constant 0 : i32
    return %arg0, %c0_i32, %c0_i32_0 : i32, i32, i32
  }
}

</mosaic_0001>

<bundles_post_ra>
// kernel: ctfb_forward.1
= control target key start
LH: loop header
LB: loop body
LE: loop exit
PB: predicated region body
PF: predicated region fallthrough
CT: control target
= control target key end

     0   :  { %vm123_vm0 = vcmask 261120   ;;  %s5594_s0 = inlined_call_operand.vmem [shape: f32[2,64,32], index: 0, kind: input, shape index: {}]   ;;  %s5595_s1 = inlined_call_operand.vmem [shape: f32[2,64,32], index: 1, kind: input, shape index: {}]   ;;  %s5596_s2 = inlined_call_operand.vmem [shape: bf16[32,32], index: 2, kind: input, shape index: {}]   ;;  %s5597_s3 = inlined_call_operand.vmem [shape: bf16[2,32,32], index: 3, kind: input, shape index: {}]   ;;  %s5598_s4 = inlined_call_operand.vmem [shape: f32[2,1,32], index: 4, kind: input, shape index: {}]   ;;  %s5599_s5 = inlined_call_operand.vmem [shape: bf16[2,32,32], index: 5, kind: input, shape index: {}]   ;;  %s5600_s6 = inlined_call_operand.vmem [shape: f32[2,1,32], index: 6, kind: input, shape index: {}]   ;;  %s5601_s7 = inlined_call_operand.vmem [shape: bf16[2,32,32], index: 7, kind: input, shape index: {}]   ;;  %s5602_s8 = inlined_call_operand.vmem [shape: f32[2,1,32], index: 8, kind: input, shape index: {}]   ;;  %s5603_s9 = inlined_call_operand.vmem [shape: bf16[2,32,32], index: 9, kind: input, shape index: {}]   ;;  %s5604_s10 = inlined_call_operand.vmem [shape: f32[2,1,32], index: 10, kind: input, shape index: {}]   ;;  %s5605_s11 = inlined_call_operand.vmem [shape: bf16[32,32], index: 11, kind: input, shape index: {}]   ;;  %s5606_s12 = inlined_call_operand.vmem [shape: f32[1,32], index: 12, kind: input, shape index: {}]   ;;  %s5607_s13 = inlined_call_operand.vmem [shape: bf16[32,32], index: 13, kind: input, shape index: {}]   ;;  %s5608_s14 = inlined_call_operand.vmem [shape: f32[1,32], index: 14, kind: input, shape index: {}]   ;;  %s5609_s15 = inlined_call_operand.hbm [shape: f32[2,64,32], index: 15, kind: output, shape index: {}]  }
   0x1   :  { %v3888_v0 = vld [vmem:[%s5597_s3] sm:$0xff]   ;;  %v3890_v2 = vld [vmem:[%s5597_s3 + $0x8] sm:$0xff]   ;;  %v62_v7 = vld [vmem:[%s5594_s0 + $0x10] sm:$0xff] }
   0x2   :  { %v3889_v1 = vld [vmem:[%s5599_s5] sm:$0xff]   ;;  %3468 = vmatprep.subr.bf16.mxu0 %v3888_v0  ;;  %v3891_v3 = vld [vmem:[%s5599_s5 + $0x8] sm:$0xff]   ;;  %v63_v8 = vld [vmem:[%s5594_s0 + $0x18] sm:$0xff] }
   0x3   :  { %3488 = vmatprep.subr.bf16.mxu1 %v3889_v1  ;;  %3469 = vmatpush3.bf16.msra.mxu0 %v3888_v0  ;;  %v60_v4 = vld [vmem:[%s5594_s0] sm:$0xff]  ;;  %v61_v5 = vld [vmem:[%s5594_s0 + $0x8] sm:$0xff]  ;;  %v93_v10 = vpack.c.bf16 %v63_v8, %v62_v7  ;;  %v66_v13 = vld [vmem:[%s5594_s0 + $0x30] sm:$0xff] }
   0x4   :  { %3489 = vmatpush3.bf16.msra.mxu1 %v3889_v1  ;;  %3470 = vmatprep.subr.bf16.mxu0 %v3890_v2  ;;  %v92_v6 = vpack.c.bf16 %v61_v5, %v60_v4  ;;  %v64_v9 = vld [vmem:[%s5594_s0 + $0x20] sm:$0xff]  ;;  %v65_v11 = vld [vmem:[%s5594_s0 + $0x28] sm:$0xff]  ;;  %v67_v14 = vld [vmem:[%s5594_s0 + $0x38] sm:$0xff] }
   0x5   :  { %3490 = vmatprep.subr.bf16.mxu1 %v3891_v3  ;;  %v94_v12 = vpack.c.bf16 %v65_v11, %v64_v9  ;;  %v68_v15 = vld [vmem:[%s5594_s0 + $0x40] sm:$0xff]  ;;  %v69_v16 = vld [vmem:[%s5594_s0 + $0x48] sm:$0xff]  ;;  %v95_v19 = vpack.c.bf16 %v67_v14, %v66_v13  ;;  %v70_v21 = vld [vmem:[%s5594_s0 + $0x50] sm:$0xff] }
   0x6   :  { %3472 = vmatprep.mubr.msk.bf16.mxu0 %vm123_vm0, %v92_v6  ;;  %3492 = vmatprep.mubr.msk.bf16.mxu1 %vm123_vm0, %v92_v6  ;;  %v3892_v17 = vld [vmem:[%s5601_s7] sm:$0xff]   ;;  %v3893_v18 = vld [vmem:[%s5601_s7 + $0x8] sm:$0xff]   ;;  %v96_v20 = vpack.c.bf16 %v69_v16, %v68_v15  ;;  %v71_v22 = vld [vmem:[%s5594_s0 + $0x58] sm:$0xff] }
   0x7   :  { %3471 = vmatpush3.bf16.msra.mxu0 %v3890_v2  ;;  %v72_v23 = vld [vmem:[%s5594_s0 + $0x60] sm:$0xff]  ;;  %v73_v24 = vld [vmem:[%s5594_s0 + $0x68] sm:$0xff] }
   0x8   :  { %3491 = vmatpush3.bf16.msra.mxu1 %v3891_v3  ;;  %3508 = vmatprep.subr.bf16.mxu0 %v3892_v17 }
   0xa   :  { %3473 = vmatmul.mubr.msk.bf16.vlgmr.msra.gmra.mrb[0].mxu0 %vm123_vm0, %v93_v10 }
   0xb   :  { %3493 = vmatmul.mubr.msk.bf16.vlgmr.msra.gmra.mrb[0].mxu1 %vm123_vm0, %v93_v10  ;;  %3476 = vmatprep.mubr.msk.bf16.mxu0 %vm123_vm0, %v94_v12 }
   0xc   :  { %3496 = vmatprep.mubr.msk.bf16.mxu1 %vm123_vm0, %v94_v12  ;;  %3509 = vmatpush3.bf16.msra.mxu0 %v3892_v17 }
   0xd   :  { %3510 = vmatprep.subr.bf16.mxu0 %v3893_v18 }
  0x10   :  { %3511 = vmatpush3.bf16.msra.mxu0 %v3893_v18 }
  0x12   :  { %3477 = vmatmul.mubr.msk.bf16.gmra.mrb[4].mxu0 %vm123_vm0, %v95_v19 }
  0x13   :  { %3497 = vmatmul.mubr.msk.bf16.gmra.mrb[4].mxu1 %vm123_vm0, %v95_v19  ;;  %3480 = vmatprep.mubr.msk.bf16.mxu0 %vm123_vm0, %v96_v20 }
  0x14   :  { %3500 = vmatprep.mubr.msk.bf16.mxu1 %vm123_vm0, %v96_v20 }
  0x15   :  { %20 = vsyncpa [#allocation3], 0  ;;  %v97_v25 = vpack.c.bf16 %v71_v22, %v70_v21  ;;  %v98_v26 = vpack.c.bf16 %v73_v24, %v72_v23  ;;  %v74_v27 = vld [vmem:[%s5594_s0 + $0x70] sm:$0xff]  ;;  %v75_v28 = vld [vmem:[%s5594_s0 + $0x78] sm:$0xff]  ;;  %vm869_vm1 = vcmask 523264  }
  0x16   :  { %v99_v29 = vpack.c.bf16 %v75_v28, %v74_v27  ;;  %v4344_v30 = vld [vmem:[%s5598_s4] ss:$0 sm:$0xff] }
  0x17   :  { %v4358_v39 = vld [vmem:[%s5600_s6] ss:$0 sm:$0xff] }
  0x1a   :  { %3481 = vmatmul.mubr.msk.bf16.gmra.mrb[8].mxu0 %vm123_vm0, %v97_v25 }
  0x1b   :  { %3501 = vmatmul.mubr.msk.bf16.gmra.mrb[8].mxu1 %vm123_vm0, %v97_v25  ;;  %3484 = vmatprep.mubr.msk.bf16.mxu0 %vm123_vm0, %v98_v26 }
  0x1c   :  { %3504 = vmatprep.mubr.msk.bf16.mxu1 %vm123_vm0, %v98_v26 }
  0x22   :  { %3485 = vmatmul.mubr.msk.bf16.gmra.mrb[12].mxu0 %vm123_vm0, %v99_v29 }
  0x23   :  { %3505 = vmatmul.mubr.msk.bf16.gmra.mrb[12].mxu1 %vm123_vm0, %v99_v29  ;;  %3512 = vmatprep.mubr.msk.bf16.mxu0 %vm123_vm0, %v92_v6 }
  0x2a   :  { %3513 = vmatmul.mubr.msk.bf16.vlgmr.msra.gmra.mrb[16].mxu0 %vm123_vm0, %v93_v10 }
  0x2b   :  { %3516 = vmatprep.mubr.msk.bf16.mxu0 %vm123_vm0, %v94_v12 }
  0x32   :  { %3517 = vmatmul.mubr.msk.bf16.gmra.mrb[20].mxu0 %vm123_vm0, %v95_v19 }
  0x33   :  { %3520 = vmatprep.mubr.msk.bf16.mxu0 %vm123_vm0, %v96_v20 }
  0x3a   :  { %3521 = vmatmul.mubr.msk.bf16.gmra.mrb[24].mxu0 %vm123_vm0, %v97_v25 }
  0x3b   :  { %3524 = vmatprep.mubr.msk.bf16.mxu0 %vm123_vm0, %v98_v26 }
  0x42   :  { %3525 = vmatmul.mubr.msk.bf16.gmra.mrb[28].mxu0 %vm123_vm0, %v99_v29 }
  0xdd   :  { %v3474_v31 = vpop.f32.mrb[0].mxu0 }
  0xde   :  { %v4347_v32 = vadd.f32 %v3474_v31, %v4344_v30  ;;  %v182_v33 = vpop.f32.mrb[1].mxu0  ;;  %v3494_v34 = vpop.f32.mrb[0].mxu1 }
  0xdf   :  { %v4350_v35 = vadd.f32 %v4344_v30, %v182_v33  ;;  %v3475_v36 = vpop.f32.mrb[2].mxu0  ;;  %v302_v37 = vpop.f32.mrb[1].mxu1  ;;  %v4368_v46 = vadd.f32 %v3494_v34, %v4358_v39 }
  0xe0   :  { %v4353_v38 = vadd.f32 %v3475_v36, %v4344_v30  ;;  %v185_v40 = vpop.f32.mrb[3].mxu0  ;;  %v3495_v41 = vpop.f32.mrb[2].mxu1  ;;  %v491_v42 = vsel %vm123_vm0, %v4347_v32, -inf  ;;  %v4371_v47 = vadd.f32 %v4358_v39, %v302_v37 }
  0xe1   :  { %v4363_v43 = vadd.f32 %v4344_v30, %v185_v40  ;;  %492 = vmax.xlane.f32.xlu1 %v491_v42  ;;  %v305_v44 = vpop.f32.mrb[3].mxu1  ;;  %v485_v45 = vsel %vm123_vm0, %v4350_v35, -inf  ;;  %v4378_v51 = vadd.f32 %v3495_v41, %v4358_v39  ;;  %v772_v54 = vsel %vm123_vm0, %v4368_v46, -inf }
  0xe2   :  { %486 = vmax.xlane.f32.xlu0 %v485_v45  ;;  %v494_v48 = vsel %vm123_vm0, %v4353_v38, -inf  ;;  %v770_v59 = vsel %vm123_vm0, %v4371_v47, -inf  ;;  %v4391_v60 = vadd.f32 %v4358_v39, %v305_v44 }
  0xe3   :  { %v488_v50 = vsel %vm123_vm0, %v4363_v43, -inf  ;;  %v773_v6 = vsel %vm123_vm0, %v4378_v51, -inf }
  0xe4   :  { %v771_v14 = vsel %vm123_vm0, %v4391_v60, -inf }
  0xe5   :  { %495 = vmax.xlane.f32.xlu1 %v494_v48  ;;  %v3478_v49 = vpop.f32.mrb[4].mxu0 }
  0xe6   :  { %v3498_v52 = vpop.f32.mrb[4].mxu1  ;;  %v198_v53 = vpop.f32.mrb[5].mxu0  ;;  %489 = vmax.xlane.f32.xlu0 %v488_v50  ;;  %v4394_v61 = vadd.f32 %v3478_v49, %v4344_v30  ;;  %v4459_v49 = vld [vmem:[%s5596_s2] sm:$0xff]  }
  0xe7   :  { %v4383_v55 = vadd.f32 %v3498_v52, %v4358_v39  ;;  %v4386_v56 = vadd.f32 %v4344_v30, %v198_v53  ;;  %v318_v57 = vpop.f32.mrb[5].mxu1  ;;  %v3479_v58 = vpop.f32.mrb[6].mxu0  ;;  %3528 = vmatprep.subr.bf16.mxu1 %v4459_v49 }
  0xe8   :  { %v4397_v62 = vadd.f32 %v4358_v39, %v318_v57  ;;  %v3499_v63 = vpop.f32.mrb[6].mxu1  ;;  %v201_v0 = vpop.f32.mrb[7].mxu0  ;;  %v4417_v11 = vadd.f32 %v3479_v58, %v4344_v30  ;;  %v503_v19 = vsel %vm123_vm0, %v4394_v61, -inf  ;;  %3529 = vmatpush3.bf16.msra.mxu1 %v4459_v49 }
  0xe9   :  { %v778_v1 = vsel %vm123_vm0, %v4383_v55, -inf  ;;  %v4402_v2 = vadd.f32 %v3499_v63, %v4358_v39  ;;  %v4405_v3 = vadd.f32 %v4344_v30, %v201_v0  ;;  %v321_v4 = vpop.f32.mrb[7].mxu1  ;;  %v497_v5 = vsel %vm123_vm0, %v4386_v56, -inf }
  0xea   :  { %v779_v7 = vmax.f32 %v772_v54, %v778_v1  ;;  %v774_v8 = vsel %vm123_vm0, %v4397_v62, -inf  ;;  %v4414_v9 = vadd.f32 %v4358_v39, %v321_v4  ;;  %498 = vmax.xlane.f32.xlu0 %v497_v5  ;;  %v506_v27 = vsel %vm123_vm0, %v4417_v11, -inf }
  0xeb   :  { %v775_v10 = vmax.f32 %v770_v59, %v774_v8  ;;  %v780_v12 = vsel %vm123_vm0, %v4402_v2, -inf  ;;  %v500_v13 = vsel %vm123_vm0, %v4405_v3, -inf }
  0xec   :  { %v781_v15 = vmax.f32 %v773_v6, %v780_v12  ;;  %v776_v16 = vsel %vm123_vm0, %v4414_v9, -inf  ;;  %501 = vmax.xlane.f32.xlu1 %v500_v13 }
  0xed   :  { %v777_v17 = vmax.f32 %v771_v14, %v776_v16  ;;  %v3482_v18 = vpop.f32.mrb[8].mxu0 }
  0xee   :  { %v783_v20 = vmax.f32 %v779_v7, %v781_v15  ;;  %v214_v21 = vpop.f32.mrb[9].mxu0  ;;  %504 = vmax.xlane.f32.xlu0 %v503_v19  ;;  %v3502_v22 = vpop.f32.mrb[8].mxu1  ;;  %v4438_v36 = vadd.f32 %v3482_v18, %v4344_v30 }
  0xef   :  { %v782_v23 = vmax.f32 %v775_v10, %v777_v17  ;;  %v4430_v24 = vadd.f32 %v4344_v30, %v214_v21  ;;  %v3483_v25 = vpop.f32.mrb[10].mxu0  ;;  %v334_v26 = vpop.f32.mrb[9].mxu1  ;;  %v4441_v37 = vadd.f32 %v3502_v22, %v4358_v39 }
  0xf0   :  { %v217_v28 = vpop.f32.mrb[11].mxu0  ;;  %507 = vmax.xlane.f32.xlu1 %v506_v27  ;;  %v3503_v29 = vpop.f32.mrb[10].mxu1  ;;  %v4444_v40 = vadd.f32 %v4358_v39, %v334_v26  ;;  %v4449_v44 = vadd.f32 %v3483_v25, %v4344_v30  ;;  %v515_v63 = vsel %vm123_vm0, %v4438_v36, -inf }
  0xf1   :  { %v784_v31 = vmax.f32 %v782_v23, %v783_v20  ;;  %v4435_v33 = vadd.f32 %v4344_v30, %v217_v28  ;;  %v337_v34 = vpop.f32.mrb[11].mxu1  ;;  %v509_v41 = vsel %vm123_vm0, %v4430_v24, -inf  ;;  %v4454_v48 = vadd.f32 %v3503_v29, %v4358_v39 }
  0xf2   :  { %510 = vmax.xlane.f32.xlu0 %v509_v41  ;;  %v1014_v53 = vsel %vm123_vm0, %v4441_v37, -inf  ;;  %v1012_v54 = vsel %vm123_vm0, %v4444_v40, -inf  ;;  %v4466_v57 = vadd.f32 %v4358_v39, %v337_v34  ;;  %v518_v7 = vsel %vm123_vm0, %v4449_v44, -inf }
  0xf3   :  { %v785_v42 = vrot.slane %v784_v31, 4  ;;  %v512_v45 = vsel %vm123_vm0, %v4435_v33, -inf  ;;  %v1015_v8 = vsel %vm123_vm0, %v4454_v48, -inf }
  0xf4   :  { %513 = vmax.xlane.f32.xlu1 %v512_v45  ;;  %v1013_v29 = vsel %vm123_vm0, %v4466_v57, -inf }
  0xf5   :  { %v786_v50 = vmax.f32 %v784_v31, %v785_v42  ;;  %v3486_v52 = vpop.f32.mrb[12].mxu0 }
  0xf6   :  { %v3506_v58 = vpop.f32.mrb[12].mxu1  ;;  %v230_v59 = vpop.f32.mrb[13].mxu0  ;;  %516 = vmax.xlane.f32.xlu0 %v515_v63  ;;  %v4482_v10 = vadd.f32 %v3486_v52, %v4344_v30 }
  0xf7   :  { %v787_v0 = vrot.slane %v786_v50, 2  ;;  %v4471_v1 = vadd.f32 %v3506_v58, %v4358_v39  ;;  %v4474_v4 = vadd.f32 %v4344_v30, %v230_v59  ;;  %v350_v5 = vpop.f32.mrb[13].mxu1  ;;  %v3487_v6 = vpop.f32.mrb[14].mxu0 }
  0xf8   :  { %v4485_v12 = vadd.f32 %v4358_v39, %v350_v5  ;;  %v4488_v13 = vadd.f32 %v3487_v6, %v4344_v30  ;;  %v3507_v14 = vpop.f32.mrb[14].mxu1  ;;  %v233_v15 = vpop.f32.mrb[15].mxu0  ;;  %519 = vmax.xlane.f32.xlu1 %v518_v7  ;;  %v527_v45 = vsel %vm123_vm0, %v4482_v10, -inf }
  0xf9   :  { %v788_v16 = vmax.f32 %v786_v50, %v787_v0  ;;  %v1020_v17 = vsel %vm123_vm0, %v4471_v1, -inf  ;;  %v4494_v18 = vadd.f32 %v3507_v14, %v4358_v39  ;;  %v4497_v19 = vadd.f32 %v4344_v30, %v233_v15  ;;  %v353_v20 = vpop.f32.mrb[15].mxu1 }
  0xfa   :  { %v1021_v21 = vmax.f32 %v1014_v53, %v1020_v17  ;;  %v1016_v22 = vsel %vm123_vm0, %v4485_v12, -inf  ;;  %v4502_v23 = vadd.f32 %v4358_v39, %v353_v20  ;;  %v521_v25 = vsel %vm123_vm0, %v4474_v4, -inf }
  0xfb   :  { %v789_v26 = vrot.slane %v788_v16, 1  ;;  %v1017_v27 = vmax.f32 %v1012_v54, %v1016_v22  ;;  %v1022_v28 = vsel %vm123_vm0, %v4494_v18, -inf  ;;  %522 = vmax.xlane.f32.xlu0 %v521_v25  ;;  %v524_v30 = vsel %vm123_vm0, %v4497_v19, -inf }
  0xfc   :  { %v1023_v31 = vmax.f32 %v1015_v8, %v1022_v28  ;;  %v1018_v39 = vsel %vm123_vm0, %v4502_v23, -inf  ;;  %525 = vmax.xlane.f32.xlu1 %v524_v30  ;;  %v530_v50 = vsel %vm123_vm0, %v4488_v13, -inf }
  0xfd   :  { %v790_v34 = vmax.f32 %v788_v16, %v789_v26  ;;  %v1019_v41 = vmax.f32 %v1013_v29, %v1018_v39 }
  0xfe   :  { %v1025_v42 = vmax.f32 %v1021_v21, %v1023_v31 }
  0xff   :  { %v796_v52 = vsub.f32 %v4414_v9, %v790_v34  ;;  %v797_v53 = vsub.f32 %v4383_v55, %v790_v34  ;;  %v798_v54 = vsub.f32 %v4402_v2, %v790_v34  ;;  %v1024_v58 = vmax.f32 %v1017_v27, %v1019_v41  ;;  %528 = vmax.xlane.f32.xlu0 %v527_v45  ;;  %v3514_v55 = vpop.f32.mrb[16].mxu0  ;;  %v4529_v2 = vld [vmem:[%s5602_s8] ss:$0 sm:$0xff] }
 0x100   :  { %531 = vmax.xlane.f32.xlu1 %v530_v50  ;;  %v791_v59 = vsub.f32 %v4371_v47, %v790_v34  ;;  %v792_v63 = vsub.f32 %v4391_v60, %v790_v34  ;;  %v793_v0 = vsub.f32 %v4368_v46, %v790_v34  ;;  %v794_v5 = vsub.f32 %v4378_v51, %v790_v34  ;;  %v4535_v46 = vld [vmem:[%s5596_s2 + $0x8] sm:$0xff]   ;;  %v422_v51 = vpop.f32.mrb[17].mxu0 }
 0x101   :  { %v1026_v6 = vmax.f32 %v1024_v58, %v1025_v42  ;;  %v795_v7 = vsub.f32 %v4397_v62, %v790_v34  ;;  %v431_v47 = vadd.f32 %v3514_v55, %v4529_v2  ;;  %v423_v17 = vadd.f32 %v4529_v2, %v422_v51  ;;  %v3515_v20 = vpop.f32.mrb[18].mxu0  ;;  %3530 = vmatprep.subr.bf16.mxu1 %v4535_v46 }
 0x102   :  { %v799_v8 = vmul.f32 1.442695, %v791_v59  ;;  %v801_v14 = vmul.f32 1.442695, %v792_v63  ;;  %v803_v15 = vmul.f32 1.442695, %v793_v0  ;;  %v434_v22 = vadd.f32 %v3515_v20, %v4529_v2  ;;  %3531 = vmatpush3.bf16.msra.mxu1 %v4535_v46 }
 0x103   :  { %v1027_v9 = vrot.slane %v1026_v6, 4  ;;  %v805_v16 = vmul.f32 1.442695, %v794_v5  ;;  %v807_v62 = vmul.f32 1.442695, %v795_v7  ;;  %v425_v25 = vpop.f32.mrb[19].mxu0 }
 0x104   :  { %3912 = vpow2.f32 %v799_v8  ;;  %v426_v26 = vadd.f32 %v4529_v2, %v425_v25  ;;  %v809_v27 = vmul.f32 1.442695, %v796_v52  ;;  %v4542_v30 = vpack.c.bf16 %v434_v22, %v431_v47 }
 0x105   :  { %v1028_v60 = vmax.f32 %v1026_v6, %v1027_v9  ;;  %3914 = vpow2.f32 %v801_v14  ;;  %v3518_v31 = vpop.f32.mrb[20].mxu0  ;;  %v811_v39 = vmul.f32 1.442695, %v797_v53  ;;  %v813_v42 = vmul.f32 1.442695, %v798_v54 }
 0x106   :  { %3916 = vpow2.f32 %v803_v15  ;;  %v4544_v29 = vpack.c.bf16 %v426_v26, %v423_v17  ;;  %v447_v41 = vadd.f32 %v3518_v31, %v4529_v2  ;;  %v438_v50 = vpop.f32.mrb[21].mxu0 }
 0x107   :  { %v1029_v21 = vrot.slane %v1028_v60, 2  ;;  %3918 = vpow2.f32 %v805_v16  ;;  %v439_v52 = vadd.f32 %v4529_v2, %v438_v50  ;;  %v3519_v58 = vpop.f32.mrb[22].mxu0 }
 0x108   :  { %3920 = vpow2.f32 %v807_v62  ;;  %3548 = vmatprep.subr.bf16.mxu1 %v4544_v29  ;;  %v441_v0 = vpop.f32.mrb[23].mxu0  ;;  %v450_v25 = vadd.f32 %v3519_v58, %v4529_v2 }
 0x109   :  { %v1030_v28 = vmax.f32 %v1028_v60, %v1029_v21  ;;  %3922 = vpow2.f32 %v809_v27  ;;  %v442_v26 = vadd.f32 %v4529_v2, %v441_v0 }
 0x10a   :  { %3924 = vpow2.f32 %v811_v39 }
 0x10b   :  { %v1031_v34 = vrot.slane %v1030_v28, 1  ;;  %3926 = vpow2.f32 %v813_v42  ;;  %v4594_v42 = vpack.c.bf16 %v450_v25, %v447_v41 }
 0x10d   :  { %v4548_v45 = vmax.f32 %v1030_v28, %v1031_v34  ;;  %v3522_v14 = vpop.f32.mrb[24].mxu0 }
 0x10e   :  { %v4557_v5 = vpop.eup %3912  ;;  %v454_v47 = vpop.f32.mrb[25].mxu0  ;;  %v463_v27 = vadd.f32 %v3522_v14, %v4529_v2 }
 0x10f   :  { %v1038_v59 = vsub.f32 %v4502_v23, %v4548_v45  ;;  %v1039_v53 = vsub.f32 %v4471_v1, %v4548_v45  ;;  %v1040_v63 = vsub.f32 %v4494_v18, %v4548_v45  ;;  %v1033_v54 = vsub.f32 %v4444_v40, %v4548_v45  ;;  %v4565_v8 = vpop.eup %3914  ;;  %v3523_v62 = vpop.f32.mrb[26].mxu0 }
 0x110   :  { %v1034_v6 = vsub.f32 %v4466_v57, %v4548_v45  ;;  %v1035_v7 = vsub.f32 %v4441_v37, %v4548_v45  ;;  %v1036_v1 = vsub.f32 %v4454_v48, %v4548_v45  ;;  %v4569_v23 = vpop.eup %3916  ;;  %v815_v18 = vsel %vm123_vm0, %v4557_v5, 0.0  ;;  %v457_v22 = vpop.f32.mrb[27].mxu0 }
 0x111   :  { %v816_v40 = vsel %vm123_vm0, %v4565_v8, 0.0  ;;  %v1037_v57 = vsub.f32 %v4485_v12, %v4548_v45  ;;  %v1041_v9 = vmul.f32 1.442695, %v1033_v54  ;;  %v4577_v37 = vpop.eup %3918  ;;  %v818_v48 = vsel %vm123_vm0, %v4569_v23, 0.0 }
 0x112   :  { %v817_v55 = vadd.f32 %v816_v40, %v815_v18  ;;  %v1043_v15 = vmul.f32 1.442695, %v1034_v6  ;;  %v4579_v60 = vpop.eup %3920  ;;  %v820_v16 = vsel %vm123_vm0, %v4577_v37, 0.0  ;;  %v1045_v51 = vmul.f32 1.442695, %v1035_v7 }
 0x113   :  { %v822_v12 = vsel %vm123_vm0, %v4579_v60, 0.0  ;;  %v1047_v20 = vmul.f32 1.442695, %v1036_v1  ;;  %v1049_v21 = vmul.f32 1.442695, %v1037_v57  ;;  %3928 = vpow2.f32 %v1041_v9  ;;  %v4590_v28 = vpop.eup %3922 }
 0x114   :  { %v819_v17 = vadd.f32 %v818_v48, %v817_v55  ;;  %3930 = vpow2.f32 %v1043_v15  ;;  %v455_v39 = vadd.f32 %v4529_v2, %v454_v47  ;;  %v466_v34 = vadd.f32 %v3523_v62, %v4529_v2  ;;  %v4599_v58 = vpop.eup %3924 }
 0x115   :  { %3932 = vpow2.f32 %v1045_v51  ;;  %v4596_v45 = vpack.c.bf16 %v442_v26, %v439_v52  ;;  %v458_v50 = vadd.f32 %v4529_v2, %v457_v22  ;;  %v1051_v0 = vmul.f32 1.442695, %v1038_v59  ;;  %v4603_v18 = vpop.eup %3926  ;;  %v3526_v41 = vpop.f32.mrb[28].mxu0 }
 0x116   :  { %v821_v31 = vadd.f32 %v820_v16, %v819_v17  ;;  %3934 = vpow2.f32 %v1047_v20  ;;  %v1092_v6 = vpack.c.bf16 %v466_v34, %v463_v27  ;;  %v824_v7 = vsel %vm123_vm0, %v4590_v28, 0.0 }
 0x117   :  { %v1091_v1 = vpack.c.bf16 %v458_v50, %v455_v39  ;;  %v1053_v40 = vmul.f32 1.442695, %v1039_v53  ;;  %3936 = vpow2.f32 %v1049_v21  ;;  %v826_v52 = vsel %vm123_vm0, %v4599_v58, 0.0  ;;  %v470_v53 = vpop.f32.mrb[29].mxu0 }
 0x118   :  { %v823_v54 = vadd.f32 %v822_v12, %v821_v31  ;;  %3938 = vpow2.f32 %v1051_v0  ;;  %v1055_v9 = vmul.f32 1.442695, %v1040_v63  ;;  %v828_v14 = vsel %vm123_vm0, %v4603_v18, 0.0  ;;  %v3527_v16 = vpop.f32.mrb[30].mxu0 }
 0x119   :  { %3572 = vmatprep.subr.bf16.mxu0 %v1091_v1  ;;  %3940 = vpow2.f32 %v1053_v40  ;;  %v479_v15 = vadd.f32 %v3526_v41, %v4529_v2  ;;  %v471_v48 = vadd.f32 %v4529_v2, %v470_v53  ;;  %v482_v17 = vadd.f32 %v3527_v16, %v4529_v2  ;;  %v473_v12 = vpop.f32.mrb[31].mxu0 }
 0x11a   :  { %v825_v57 = vadd.f32 %v824_v7, %v823_v54  ;;  %3573 = vmatpush3.bf16.msra.mxu0 %v1091_v1  ;;  %3942 = vpow2.f32 %v1055_v9  ;;  %v474_v22 = vadd.f32 %v4529_v2, %v473_v12 }
 0x11b   :  { %3574 = vmatprep.subr.bf16.mxu0 %v1092_v6  ;;  %v1094_v31 = vpack.c.bf16 %v482_v17, %v479_v15 }
 0x11c   :  { %v827_v59 = vadd.f32 %v826_v52, %v825_v57  ;;  %v1093_v34 = vpack.c.bf16 %v474_v22, %v471_v48 }
 0x11d   :  { %v4610_v47 = vpop.eup %3928 }
 0x11e   :  { %v829_v55 = vadd.f32 %v828_v14, %v827_v59  ;;  %v4613_v51 = vpop.eup %3930  ;;  %v1057_v62 = vsel %vm123_vm0, %v4610_v47, 0.0  ;;  %3575 = vmatpush3.bf16.msra.mxu0 %v1092_v6 }
 0x11f   :  { %v3933_v20 = vpop.eup %3932  ;;  %v1058_v21 = vsel %vm123_vm0, %v4613_v51, 0.0  ;;  %3576 = vmatprep.subr.bf16.mxu0 %v1093_v34 }
 0x120   :  { %v830_v63 = vrot.slane %v829_v55, 4  ;;  %v3935_v25 = vpop.eup %3934  ;;  %v1059_v27 = vadd.f32 %v1058_v21, %v1057_v62  ;;  %v1060_v39 = vsel %vm123_vm0, %v3933_v20, 0.0 }
 0x121   :  { %v3937_v50 = vpop.eup %3936  ;;  %v1062_v6 = vsel %vm123_vm0, %v3935_v25, 0.0 }
 0x122   :  { %v831_v26 = vadd.f32 %v830_v63, %v829_v55  ;;  %v1061_v54 = vadd.f32 %v1060_v39, %v1059_v27  ;;  %v3939_v7 = vpop.eup %3938  ;;  %3577 = vmatpush3.bf16.msra.mxu0 %v1093_v34  ;;  %v1064_v57 = vsel %vm123_vm0, %v3937_v50, 0.0 }
 0x123   :  { %3578 = vmatprep.subr.bf16.mxu0 %v1094_v31  ;;  %v3941_v2 = vpop.eup %3940  ;;  %v1066_v9 = vsel %vm123_vm0, %v3939_v7, 0.0 }
 0x124   :  { %v832_v0 = vrot.slane %v831_v26, 2  ;;  %v1063_v40 = vadd.f32 %v1062_v6, %v1061_v54  ;;  %v3943_v59 = vpop.eup %3942  ;;  %v1068_v15 = vsel %vm123_vm0, %v3941_v2, 0.0 }
 0x125   :  { %v1070_v48 = vsel %vm123_vm0, %v3943_v59, 0.0 }
 0x126   :  { %v833_v1 = vadd.f32 %v832_v0, %v831_v26  ;;  %v1065_v52 = vadd.f32 %v1064_v57, %v1063_v40  ;;  %3579 = vmatpush3.bf16.msra.mxu0 %v1094_v31 }
 0x128   :  { %v834_v41 = vrot.slane %v833_v1, 1  ;;  %v1067_v55 = vadd.f32 %v1066_v9, %v1065_v52 }
 0x12a   :  { %v835_v14 = vadd.f32 %v834_v41, %v833_v1  ;;  %v1069_v53 = vadd.f32 %v1068_v15, %v1067_v55 }
 0x12c   :  { %3944 = vrcp.f32 %v835_v14  ;;  %v1071_v16 = vadd.f32 %v1070_v48, %v1069_v53 }
 0x12e   :  { %v1072_v63 = vrot.slane %v1071_v16, 4 }
 0x130   :  { %v1073_v62 = vadd.f32 %v1072_v63, %v1071_v16 }
 0x132   :  { %v1074_v17 = vrot.slane %v1073_v62, 2 }
 0x134   :  { %v1075_v21 = vadd.f32 %v1074_v17, %v1073_v62 }
 0x136   :  { %v3945_v12 = vpop.eup %3944  ;;  %v1076_v40 = vrot.slane %v1075_v21, 1 }
 0x137   :  { %v837_v22 = vmul.f32 %v3945_v12, %v4557_v5  ;;  %v838_v26 = vmul.f32 %v3945_v12, %v4565_v8  ;;  %v839_v27 = vmul.f32 %v3945_v12, %v4569_v23  ;;  %v840_v31 = vmul.f32 %v3945_v12, %v4577_v37 }
 0x138   :  { %v841_v39 = vmul.f32 %v3945_v12, %v4579_v60  ;;  %v842_v34 = vmul.f32 %v3945_v12, %v4590_v28  ;;  %v843_v0 = vmul.f32 %v3945_v12, %v4599_v58  ;;  %v844_v54 = vmul.f32 %v3945_v12, %v4603_v18 }
 0x139   :  { %v845_v6 = vpack.c.bf16 %v838_v26, %v837_v22  ;;  %v846_v1 = vpack.c.bf16 %v840_v31, %v839_v27  ;;  %v1077_v5 = vadd.f32 %v1076_v40, %v1075_v21 }
 0x13a   :  { %v847_v57 = vpack.c.bf16 %v842_v34, %v841_v39  ;;  %v848_v41 = vpack.c.bf16 %v844_v54, %v843_v0 }
 0x13b   :  { %853 = vxpose.xlu0.c.b16.start [1/4] (short) (narrow) %v845_v6, 32  ;;  %3946 = vrcp.f32 %v1077_v5 }
 0x13f   :  { %854 = vxpose.xlu0.c.b16.cont [2/4] (short) (narrow) %v846_v1, 32 }
 0x143   :  { %855 = vxpose.xlu0.c.b16.cont [3/4] (short) (narrow) %v847_v57, 32 }
 0x145   :  { %v3947_v8 = vpop.eup %3946 }
 0x146   :  { %v1079_v23 = vmul.f32 %v3947_v8, %v4610_v47  ;;  %v1080_v37 = vmul.f32 %v3947_v8, %v4613_v51  ;;  %v1081_v60 = vmul.f32 %v3947_v8, %v3933_v20  ;;  %v1082_v28 = vmul.f32 %v3947_v8, %v3935_v25 }
 0x147   :  { %856 = vxpose.xlu0.c.b16.end [4/4] (short) (narrow) %v848_v41, 32  ;;  %v1083_v58 = vmul.f32 %v3947_v8, %v3937_v50  ;;  %v1084_v18 = vmul.f32 %v3947_v8, %v3939_v7  ;;  %v1085_v52 = vmul.f32 %v3947_v8, %v3941_v2  ;;  %v1086_v9 = vmul.f32 %v3947_v8, %v3943_v59 }
 0x148   :  { %v1087_v14 = vpack.c.bf16 %v1080_v37, %v1079_v23  ;;  %v1088_v55 = vpack.c.bf16 %v1082_v28, %v1081_v60 }
 0x149   :  { %v1089_v15 = vpack.c.bf16 %v1084_v18, %v1083_v58  ;;  %v1090_v53 = vpack.c.bf16 %v1086_v9, %v1085_v52 }
 0x14a   :  { %1095 = vxpose.xlu1.c.b16.start [1/4] (short) (narrow) %v1087_v14, 32 }
 0x14e   :  { %1096 = vxpose.xlu1.c.b16.cont [2/4] (short) (narrow) %v1088_v55, 32 }
 0x152   :  { %1097 = vxpose.xlu1.c.b16.cont [3/4] (short) (narrow) %v1089_v15, 32 }
 0x156   :  { %1098 = vxpose.xlu1.c.b16.end [4/4] (short) (narrow) %v1090_v53, 32 }
 0x16e   :  { %v493_v48 = vpop.xlane.xlu1 %492 }
 0x16f   :  { %v487_v16 = vpop.xlane.xlu0 %486  ;;  %v535_v51 = vsub.f32 %v4347_v32, %v493_v48 }
 0x170   :  { %v533_v47 = vsub.f32 %v4350_v35, %v487_v16 }
 0x171   :  { %v553_v59 = vmul.f32 1.442695, %v535_v51 }
 0x172   :  { %v549_v20 = vmul.f32 1.442695, %v533_v47  ;;  %v496_v25 = vpop.xlane.xlu1 %495 }
 0x173   :  { %v536_v50 = vsub.f32 %v4353_v38, %v496_v25  ;;  %v490_v7 = vpop.xlane.xlu0 %489 }
 0x174   :  { %v534_v2 = vsub.f32 %v4363_v43, %v490_v7  ;;  %3948 = vpow2.f32 %v549_v20 }
 0x175   :  { %v555_v63 = vmul.f32 1.442695, %v536_v50 }
 0x176   :  { %v551_v62 = vmul.f32 1.442695, %v534_v2 }
 0x177   :  { %3950 = vpow2.f32 %v555_v63  ;;  %v499_v17 = vpop.xlane.xlu0 %498 }
 0x178   :  { %3952 = vpow2.f32 %v551_v62  ;;  %v537_v12 = vsub.f32 %v4386_v56, %v499_v17 }
 0x179   :  { %3954 = vpow2.f32 %v553_v59  ;;  %v502_v35 = vpop.xlane.xlu1 %501 }
 0x17a   :  { %v557_v21 = vmul.f32 1.442695, %v537_v12  ;;  %v538_v32 = vsub.f32 %v4405_v3, %v502_v35  ;;  %v3898_v35 = vld [vmem:[%s5603_s9] sm:$0xff]  }
 0x17b   :  { %v505_v22 = vpop.xlane.xlu0 %504  ;;  %3596 = vmatprep.subr.bf16.mxu0 %v3898_v35 }
 0x17c   :  { %v559_v26 = vmul.f32 1.442695, %v538_v32  ;;  %v539_v38 = vsub.f32 %v4394_v61, %v505_v22  ;;  %3956 = vpow2.f32 %v557_v21 }
 0x17d   :  { %v508_v43 = vpop.xlane.xlu1 %507 }
 0x17e   :  { %3958 = vpow2.f32 %v559_v26  ;;  %v561_v27 = vmul.f32 1.442695, %v539_v38  ;;  %v540_v31 = vsub.f32 %v4417_v11, %v508_v43  ;;  %v4645_v39 = vpop.eup %3948 }
 0x17f   :  { %v511_v0 = vpop.xlane.xlu0 %510 }
 0x180   :  { %v563_v34 = vmul.f32 1.442695, %v540_v31  ;;  %3960 = vpow2.f32 %v561_v27  ;;  %v541_v54 = vsub.f32 %v4430_v24, %v511_v0 }
 0x181   :  { %v4647_v56 = vpop.eup %3950  ;;  %v514_v3 = vpop.xlane.xlu1 %513 }
 0x182   :  { %v4650_v6 = vpop.eup %3952  ;;  %3962 = vpow2.f32 %v563_v34  ;;  %v542_v61 = vsub.f32 %v4435_v33, %v514_v3  ;;  %v565_v40 = vmul.f32 1.442695, %v541_v54 }
 0x183   :  { %v4653_v1 = vpop.eup %3954  ;;  %v581_v11 = vpack.c.bf16 %v4650_v6, %v4645_v39  ;;  %v517_v5 = vpop.xlane.xlu0 %516 }
 0x184   :  { %v582_v57 = vpack.c.bf16 %v4647_v56, %v4653_v1  ;;  %v567_v41 = vmul.f32 1.442695, %v542_v61  ;;  %3964 = vpow2.f32 %v565_v40  ;;  %v543_v24 = vsub.f32 %v4438_v36, %v517_v5 }
 0x185   :  { %v520_v8 = vpop.xlane.xlu1 %519  ;;  %3532 = vmatprep.mubr.msk.bf16.mxu1 %vm123_vm0, %v581_v11 }
 0x186   :  { %3966 = vpow2.f32 %v567_v41  ;;  %v544_v33 = vsub.f32 %v4449_v44, %v520_v8  ;;  %3533 = vmatmul.mubr.msk.bf16.vlgmr.msra.gmra.mrb[16].mxu1 %vm123_vm0, %v582_v57  ;;  %v4663_v23 = vpop.eup %3956  ;;  %v569_v37 = vmul.f32 1.442695, %v543_v24 }
 0x187   :  { %3549 = vmatpush3.bf16.msra.mxu1 %v4544_v29 }
 0x188   :  { %v4666_v60 = vpop.eup %3958  ;;  %v571_v28 = vmul.f32 1.442695, %v544_v33  ;;  %v523_v58 = vpop.xlane.xlu0 %522  ;;  %3550 = vmatprep.subr.bf16.mxu1 %v4542_v30  ;;  %3968 = vpow2.f32 %v569_v37 }
 0x189   :  { %v545_v36 = vsub.f32 %v4474_v4, %v523_v58  ;;  %v526_v18 = vpop.xlane.xlu1 %525  ;;  %v583_v44 = vpack.c.bf16 %v4666_v60, %v4663_v23 }
 0x18a   :  { %3970 = vpow2.f32 %v571_v28  ;;  %v546_v52 = vsub.f32 %v4497_v19, %v526_v18  ;;  %v4673_v9 = vpop.eup %3960 }
 0x18b   :  { %v573_v14 = vmul.f32 1.442695, %v545_v36  ;;  %3536 = vmatprep.mubr.msk.bf16.mxu1 %vm123_vm0, %v583_v44  ;;  %3551 = vmatpush3.bf16.msra.mxu1 %v4542_v30 }
 0x18c   :  { %v4677_v29 = vpop.eup %3962  ;;  %v575_v55 = vmul.f32 1.442695, %v546_v52  ;;  %v529_v15 = vpop.xlane.xlu0 %528  ;;  %3552 = vmatprep.subr.bf16.mxu1 %v4596_v45 }
 0x18d   :  { %3972 = vpow2.f32 %v573_v14  ;;  %v547_v4 = vsub.f32 %v4482_v10, %v529_v15  ;;  %v532_v53 = vpop.xlane.xlu1 %531  ;;  %v584_v19 = vpack.c.bf16 %v4677_v29, %v4673_v9 }
 0x18e   :  { %3974 = vpow2.f32 %v575_v55  ;;  %v548_v48 = vsub.f32 %v4488_v13, %v532_v53  ;;  %v4684_v16 = vpop.eup %3964 }
 0x18f   :  { %v577_v47 = vmul.f32 1.442695, %v547_v4  ;;  %3537 = vmatmul.mubr.msk.bf16.gmra.mrb[20].mxu1 %vm123_vm0, %v584_v19 }
 0x190   :  { %v4687_v30 = vpop.eup %3966  ;;  %v579_v51 = vmul.f32 1.442695, %v548_v48  ;;  %3553 = vmatpush3.bf16.msra.mxu1 %v4596_v45 }
 0x191   :  { %3976 = vpow2.f32 %v577_v47  ;;  %v585_v10 = vpack.c.bf16 %v4687_v30, %v4684_v16  ;;  %3554 = vmatprep.subr.bf16.mxu1 %v4594_v42 }
 0x192   :  { %3978 = vpow2.f32 %v579_v51  ;;  %v4693_v20 = vpop.eup %3968 }
 0x193   :  { %3540 = vmatprep.mubr.msk.bf16.mxu1 %vm123_vm0, %v585_v10 }
 0x194   :  { %v4696_v13 = vpop.eup %3970  ;;  %3555 = vmatpush3.bf16.msra.mxu1 %v4594_v42 }
 0x195   :  { %v586_v25 = vpack.c.bf16 %v4696_v13, %v4693_v20 }
 0x197   :  { %v4701_v50 = vpop.eup %3972  ;;  %3541 = vmatmul.mubr.msk.bf16.gmra.mrb[24].mxu1 %vm123_vm0, %v586_v25 }
 0x198   :  { %v4704_v45 = vpop.eup %3974 }
 0x199   :  { %v587_v7 = vpack.c.bf16 %v4704_v45, %v4701_v50 }
 0x19b   :  { %v4708_v2 = vpop.eup %3976  ;;  %3544 = vmatprep.mubr.msk.bf16.mxu1 %vm123_vm0, %v587_v7 }
 0x19c   :  { %v4711_v59 = vpop.eup %3978 }
 0x19d   :  { %v588_v42 = vpack.c.bf16 %v4711_v59, %v4708_v2 }
 0x19f   :  { %3545 = vmatmul.mubr.msk.bf16.gmra.mrb[28].mxu1 %vm123_vm0, %v588_v42 }
 0x1a1   :  { %v861_v63 = vpop.trf.xlu0 }
 0x1a2   :  { %3556 = vmatprep.mubr.msk.bf16.mxu1 %vm869_vm1, %v861_v63 }
 0x1a5   :  { %v862_v62 = vpop.trf.xlu0 }
 0x1a7   :  { %3557 = vmatmul.mubr.msk.bf16.vlgmr.msra.gmra.mrb[32].mxu1 %vm869_vm1, %v862_v62 }
 0x1b0   :  { %v1103_v17 = vpop.trf.xlu1 }
 0x1b1   :  { %3580 = vmatprep.mubr.msk.bf16.mxu0 %vm869_vm1, %v1103_v17 }
 0x1b4   :  { %v1104_v12 = vpop.trf.xlu1 }
 0x1b5   :  { %3581 = vmatmul.mubr.msk.bf16.vlgmr.msra.gmra.mrb[32].mxu0 %vm869_vm1, %v1104_v12 }
 0x1b6   :  { %3597 = vmatpush3.bf16.msra.mxu0 %v3898_v35 }
 0x259   :  { %v3534_v21 = vpop.f32.mrb[16].mxu1 }
 0x25a   :  { %v724_v32 = vmax.f32 %v3534_v21, 1e-30  ;;  %v659_v22 = vpop.f32.mrb[17].mxu1 }
 0x25b   :  { %v722_v26 = vmax.f32 %v659_v22, 1e-30  ;;  %v3535_v38 = vpop.f32.mrb[18].mxu1 }
 0x25c   :  { %3980 = vrcp.f32 %v724_v32  ;;  %v725_v43 = vmax.f32 %v3535_v38, 1e-30  ;;  %v662_v27 = vpop.f32.mrb[19].mxu1 }
 0x25d   :  { %3982 = vrcp.f32 %v722_v26  ;;  %v723_v31 = vmax.f32 %v662_v27, 1e-30 }
 0x25e   :  { %3984 = vrcp.f32 %v725_v43 }
 0x25f   :  { %3986 = vrcp.f32 %v723_v31  ;;  %v4753_v31 = vunpack.c.l.bf16 %v4459_v49 }
 0x262   :  { %v3538_v34 = vpop.f32.mrb[20].mxu1 }
 0x263   :  { %v728_v0 = vmax.f32 %v3538_v34, 1e-30  ;;  %v675_v54 = vpop.f32.mrb[21].mxu1  ;;  %v4756_v34 = vunpack.c.h.bf16 %v4459_v49 }
 0x264   :  { %v726_v3 = vmax.f32 %v675_v54, 1e-30  ;;  %v3539_v61 = vpop.f32.mrb[22].mxu1 }
 0x265   :  { %3988 = vrcp.f32 %v728_v0  ;;  %v729_v40 = vmax.f32 %v3539_v61, 1e-30  ;;  %v678_v11 = vpop.f32.mrb[23].mxu1 }
 0x266   :  { %v3981_v57 = vpop.eup %3980  ;;  %3990 = vrcp.f32 %v726_v3  ;;  %v727_v41 = vmax.f32 %v678_v11, 1e-30 }
 0x267   :  { %v3983_v5 = vpop.eup %3982  ;;  %3992 = vrcp.f32 %v729_v40  ;;  %v4724_v33 = vmul.f32 %v3981_v57, %v4653_v1 }
 0x268   :  { %v3985_v24 = vpop.eup %3984  ;;  %3994 = vrcp.f32 %v727_v41  ;;  %v754_v58 = vmul.f32 %v3983_v5, %v4645_v39 }
 0x269   :  { %v3987_v8 = vpop.eup %3986  ;;  %v4727_v37 = vmul.f32 %v3985_v24, %v4647_v56 }
 0x26a   :  { %v3542_v28 = vpop.f32.mrb[24].mxu1  ;;  %v755_v36 = vmul.f32 %v3987_v8, %v4650_v6 }
 0x26b   :  { %v732_v18 = vmax.f32 %v3542_v28, 1e-30  ;;  %v691_v44 = vpop.f32.mrb[25].mxu1  ;;  %v930_v52 = vpack.c.bf16 %v4727_v37, %v4724_v33  ;;  %v3896_v33 = vld [vmem:[%s5597_s3 + $0x10] sm:$0xff]   ;;  %v3897_v37 = vld [vmem:[%s5597_s3 + $0x18] sm:$0xff]  }
 0x26c   :  { %v730_v14 = vmax.f32 %v691_v44, 1e-30  ;;  %v3543_v55 = vpop.f32.mrb[26].mxu1  ;;  %v929_v15 = vpack.c.bf16 %v755_v36, %v754_v58 }
 0x26d   :  { %3996 = vrcp.f32 %v732_v18  ;;  %v733_v4 = vmax.f32 %v3543_v55, 1e-30  ;;  %v694_v1 = vpop.f32.mrb[27].mxu1 }
 0x26e   :  { %3998 = vrcp.f32 %v730_v14  ;;  %v731_v53 = vmax.f32 %v694_v1, 1e-30  ;;  %3564 = vmatprep.mubr.msk.bf16.mxu1 %vm123_vm0, %v929_v15 }
 0x26f   :  { %v3989_v56 = vpop.eup %3988  ;;  %4000 = vrcp.f32 %v733_v4 }
 0x270   :  { %v3991_v39 = vpop.eup %3990  ;;  %4002 = vrcp.f32 %v731_v53  ;;  %v4735_v47 = vmul.f32 %v3989_v56, %v4673_v9 }
 0x271   :  { %v3993_v6 = vpop.eup %3992  ;;  %v758_v7 = vmul.f32 %v3991_v39, %v4663_v23  ;;  %v4745_v23 = vunpack.c.l.bf16 %v4535_v46 }
 0x272   :  { %v3995_v19 = vpop.eup %3994  ;;  %v3546_v48 = vpop.f32.mrb[28].mxu1  ;;  %v4738_v51 = vmul.f32 %v3993_v6, %v4677_v29 }
 0x273   :  { %v736_v10 = vmax.f32 %v3546_v48, 1e-30  ;;  %v707_v25 = vpop.f32.mrb[29].mxu1  ;;  %v759_v42 = vmul.f32 %v3995_v19, %v4666_v60  ;;  %v4748_v60 = vunpack.c.h.bf16 %v4535_v46  ;;  %v76_v19 = vld [vmem:[%s5595_s1] sm:$0xff] }
 0x274   :  { %v734_v63 = vmax.f32 %v707_v25, 1e-30  ;;  %v3547_v62 = vpop.f32.mrb[30].mxu1  ;;  %v932_v17 = vpack.c.bf16 %v4738_v51, %v4735_v47  ;;  %v78_v47 = vld [vmem:[%s5595_s1 + $0x10] sm:$0xff]  ;;  %v79_v51 = vld [vmem:[%s5595_s1 + $0x18] sm:$0xff]  ;;  %v81_v25 = vld [vmem:[%s5595_s1 + $0x28] sm:$0xff] }
 0x275   :  { %4004 = vrcp.f32 %v736_v10  ;;  %v737_v12 = vmax.f32 %v3547_v62, 1e-30  ;;  %v710_v35 = vpop.f32.mrb[31].mxu1  ;;  %v931_v21 = vpack.c.bf16 %v759_v42, %v758_v7  ;;  %v80_v10 = vld [vmem:[%s5595_s1 + $0x20] sm:$0xff]  ;;  %v4810_v7 = vpack.c.bf16 %v79_v51, %v78_v47  ;;  %v83_v62 = vld [vmem:[%s5595_s1 + $0x38] sm:$0xff] }
 0x276   :  { %4006 = vrcp.f32 %v734_v63  ;;  %v735_v9 = vmax.f32 %v710_v35, 1e-30  ;;  %v4812_v42 = vpack.c.bf16 %v81_v25, %v80_v10  ;;  %v82_v63 = vld [vmem:[%s5595_s1 + $0x30] sm:$0xff] }
 0x277   :  { %v3997_v32 = vpop.eup %3996  ;;  %4008 = vrcp.f32 %v737_v12  ;;  %v85_v12 = vld [vmem:[%s5595_s1 + $0x48] sm:$0xff]  ;;  %v4830_v35 = vpack.c.bf16 %v83_v62, %v82_v63 }
 0x278   :  { %v3999_v29 = vpop.eup %3998  ;;  %4010 = vrcp.f32 %v735_v9  ;;  %v764_v38 = vmul.f32 %v3997_v32, %v4693_v20  ;;  %v86_v9 = vld [vmem:[%s5595_s1 + $0x50] sm:$0xff]  ;;  %v87_v32 = vld [vmem:[%s5595_s1 + $0x58] sm:$0xff] }
 0x279   :  { %v4001_v22 = vpop.eup %4000  ;;  %v762_v54 = vmul.f32 %v3999_v29, %v4684_v16  ;;  %v88_v29 = vld [vmem:[%s5595_s1 + $0x60] sm:$0xff] }
 0x27a   :  { %v4003_v26 = vpop.eup %4002  ;;  %v765_v43 = vmul.f32 %v4001_v22, %v4696_v13  ;;  %v3558_v27 = vpop.f32.mrb[32].mxu1  ;;  %v89_v22 = vld [vmem:[%s5595_s1 + $0x68] sm:$0xff] }
 0x27b   :  { %v910_v0 = vpop.f32.mrb[33].mxu1  ;;  %v763_v3 = vmul.f32 %v4003_v26, %v4687_v30  ;;  %v927_v11 = vmul.f32 %v3558_v27, %v4745_v23  ;;  %v4850_v26 = vpack.c.bf16 %v87_v32, %v86_v9  ;;  %v91_v27 = vld [vmem:[%s5595_s1 + $0x78] sm:$0xff] }
 0x27c   :  { %v1171_v61 = vpack.c.bf16 %v765_v43, %v764_v38  ;;  %v3559_v40 = vpop.f32.mrb[34].mxu1  ;;  %v925_v41 = vmul.f32 %v910_v0, %v4753_v31  ;;  %v4852_v38 = vpack.c.bf16 %v89_v22, %v88_v29  ;;  %v90_v43 = vld [vmem:[%s5595_s1 + $0x70] sm:$0xff] }
 0x27d   :  { %v928_v20 = vmul.f32 %v3559_v40, %v4748_v60  ;;  %v913_v57 = vpop.f32.mrb[35].mxu1  ;;  %v1170_v13 = vpack.c.bf16 %v763_v3, %v762_v54  ;;  %v4864_v0 = vpack.c.bf16 %v91_v27, %v90_v43  ;;  %v3899_v54 = vld [vmem:[%s5603_s9 + $0x8] sm:$0xff]   ;;  %v3900_v3 = vld [vmem:[%s5599_s5 + $0x10] sm:$0xff]  }
 0x27e   :  { %v926_v5 = vmul.f32 %v913_v57, %v4756_v34  ;;  %3598 = vmatprep.subr.bf16.mxu0 %v3899_v54 }
 0x27f   :  { %v4005_v24 = vpop.eup %4004  ;;  %v934_v8 = vpack.c.bf16 %v928_v20, %v927_v11  ;;  %3599 = vmatpush3.bf16.msra.mxu0 %v3899_v54 }
 0x280   :  { %v4007_v28 = vpop.eup %4006  ;;  %v933_v58 = vpack.c.bf16 %v926_v5, %v925_v41  ;;  %v768_v30 = vmul.f32 %v4005_v24, %v4708_v2  ;;  %3636 = vmatprep.subr.bf16.mxu0 %v3900_v3  ;;  %v3901_v41 = vld [vmem:[%s5599_s5 + $0x18] sm:$0xff]  }
 0x281   :  { %v4009_v36 = vpop.eup %4008  ;;  %v766_v44 = vmul.f32 %v4007_v28, %v4701_v50 }
 0x282   :  { %v4011_v16 = vpop.eup %4010  ;;  %3560 = vmatprep.subr.bf16.mxu1 %v933_v58  ;;  %v769_v18 = vmul.f32 %v4009_v36, %v4711_v59 }
 0x283   :  { %3561 = vmatpush3.bf16.msra.mxu1 %v933_v58  ;;  %v767_v14 = vmul.f32 %v4011_v16, %v4704_v45 }
 0x284   :  { %3562 = vmatprep.subr.bf16.mxu1 %v934_v8  ;;  %v1173_v55 = vpack.c.bf16 %v769_v18, %v768_v30 }
 0x285   :  { %v1172_v15 = vpack.c.bf16 %v767_v14, %v766_v44 }
 0x287   :  { %3563 = vmatpush3.bf16.msra.mxu1 %v934_v8 }
 0x288   :  { %v3582_v4 = vpop.f32.mrb[32].mxu0 }
 0x289   :  { %v1168_v2 = vmul.f32 %v3582_v4, %v4745_v23  ;;  %v1151_v59 = vpop.f32.mrb[33].mxu0 }
 0x28a   :  { %3565 = vmatmul.mubr.msk.bf16.vlgmr.msra.gmra.mrb[36].mxu1 %vm123_vm0, %v930_v52  ;;  %v1166_v1 = vmul.f32 %v1151_v59, %v4753_v31  ;;  %v3583_v50 = vpop.f32.mrb[34].mxu0  ;;  %v77_v52 = vld [vmem:[%s5595_s1 + $0x8] sm:$0xff] }
 0x28b   :  { %3568 = vmatprep.mubr.msk.bf16.mxu1 %vm123_vm0, %v931_v21  ;;  %v1169_v45 = vmul.f32 %v3583_v50, %v4748_v60  ;;  %v1154_v53 = vpop.f32.mrb[35].mxu0  ;;  %v4793_v48 = vpack.c.bf16 %v77_v52, %v76_v19 }
 0x28c   :  { %v1167_v56 = vmul.f32 %v1154_v53, %v4756_v34 }
 0x28d   :  { %v1175_v39 = vpack.c.bf16 %v1169_v45, %v1168_v2  ;;  %v4890_v45 = vld [vmem:[%s5598_s4 + $0x1] ss:$0 sm:$0xff] }
 0x28e   :  { %v1174_v6 = vpack.c.bf16 %v1167_v56, %v1166_v1 }
 0x290   :  { %3584 = vmatprep.subr.bf16.mxu1 %v1174_v6 }
 0x291   :  { %3585 = vmatpush3.bf16.msra.mxu1 %v1174_v6 }
 0x292   :  { %3569 = vmatmul.mubr.msk.bf16.gmra.mrb[40].mxu1 %vm123_vm0, %v932_v17  ;;  %3586 = vmatprep.subr.bf16.mxu1 %v1175_v39  ;;  %v84_v17 = vld [vmem:[%s5595_s1 + $0x40] sm:$0xff] }
 0x293   :  { %3588 = vmatprep.mubr.msk.bf16.mxu1 %vm123_vm0, %v1170_v13  ;;  %v4832_v21 = vpack.c.bf16 %v85_v12, %v84_v17 }
 0x295   :  { %3587 = vmatpush3.bf16.msra.mxu1 %v1175_v39 }
 0x296   :  { %3616 = vmatprep.subr.bf16.mxu1 %v3896_v33 }
 0x29a   :  { %3589 = vmatmul.mubr.msk.bf16.vlgmr.msra.gmra.mrb[44].mxu1 %vm123_vm0, %v1171_v61 }
 0x29b   :  { %3592 = vmatprep.mubr.msk.bf16.mxu1 %vm123_vm0, %v1172_v15  ;;  %3617 = vmatpush3.bf16.msra.mxu1 %v3896_v33 }
 0x29c   :  { %3618 = vmatprep.subr.bf16.mxu1 %v3897_v37 }
 0x29f   :  { %3619 = vmatpush3.bf16.msra.mxu1 %v3897_v37 }
 0x2a2   :  { %3593 = vmatmul.mubr.msk.bf16.gmra.mrb[48].mxu1 %vm123_vm0, %v1173_v55 }
 0x2a3   :  { %3620 = vmatprep.mubr.msk.bf16.mxu1 %vm123_vm0, %v4793_v48 }
 0x2aa   :  { %3621 = vmatmul.mubr.msk.bf16.vlgmr.msra.gmra.mrb[52].mxu1 %vm123_vm0, %v4810_v7 }
 0x2ab   :  { %3624 = vmatprep.mubr.msk.bf16.mxu1 %vm123_vm0, %v4812_v42 }
 0x2b2   :  { %3625 = vmatmul.mubr.msk.bf16.gmra.mrb[56].mxu1 %vm123_vm0, %v4830_v35 }
 0x2b3   :  { %3628 = vmatprep.mubr.msk.bf16.mxu1 %vm123_vm0, %v4832_v21 }
 0x2ba   :  { %3629 = vmatmul.mubr.msk.bf16.gmra.mrb[60].mxu1 %vm123_vm0, %v4850_v26 }
 0x2bb   :  { %3632 = vmatprep.mubr.msk.bf16.mxu1 %vm123_vm0, %v4852_v38 }
 0x2c2   :  { %3633 = vmatmul.mubr.msk.bf16.gmra.mrb[64].mxu1 %vm123_vm0, %v4864_v0 }
 0x2c3   :  { %3660 = vmatprep.mubr.msk.bf16.mxu1 %vm123_vm0, %v4793_v48 }
 0x35d   :  { %v3566_v61 = vpop.f32.mrb[36].mxu1 }
 0x35e   :  { %v981_v40 = vpop.f32.mrb[37].mxu1 }
 0x35f   :  { %v3567_v11 = vpop.f32.mrb[38].mxu1 }
 0x360   :  { %v1254_v20 = vpack.c.bf16 %v3567_v11, %v3566_v61  ;;  %v984_v57 = vpop.f32.mrb[39].mxu1 }
 0x361   :  { %v1253_v13 = vpack.c.bf16 %v984_v57, %v981_v40 }
 0x363   :  { %3600 = vmatprep.mubr.msk.bf16.mxu0 %vm123_vm0, %v1253_v13 }
 0x364   :  { %3601 = vmatmul.mubr.msk.bf16.vlgmr.msra.gmra.mrb[36].mxu0 %vm123_vm0, %v1254_v20 }
 0x365   :  { %v3570_v5 = vpop.f32.mrb[40].mxu1  ;;  %3637 = vmatpush3.bf16.msra.mxu0 %v3900_v3 }
 0x366   :  { %v997_v24 = vpop.f32.mrb[41].mxu1  ;;  %3638 = vmatprep.subr.bf16.mxu0 %v3901_v41 }
 0x367   :  { %v3571_v8 = vpop.f32.mrb[42].mxu1 }
 0x368   :  { %v1256_v28 = vpack.c.bf16 %v3571_v8, %v3570_v5  ;;  %v1000_v58 = vpop.f32.mrb[43].mxu1 }
 0x369   :  { %v1255_v36 = vpack.c.bf16 %v1000_v58, %v997_v24  ;;  %3639 = vmatpush3.bf16.msra.mxu0 %v3901_v41 }
 0x36a   :  { %3676 = vmatprep.subr.bf16.mxu0 %v4459_v49 }
 0x36b   :  { %3604 = vmatprep.mubr.msk.bf16.mxu0 %vm123_vm0, %v1255_v36 }
 0x36c   :  { %3605 = vmatmul.mubr.msk.bf16.gmra.mrb[40].mxu0 %vm123_vm0, %v1256_v28 }
 0x36d   :  { %v3590_v16 = vpop.f32.mrb[44].mxu1 }
 0x36e   :  { %v1222_v30 = vpop.f32.mrb[45].mxu1 }
 0x36f   :  { %v3591_v18 = vpop.f32.mrb[46].mxu1 }
 0x370   :  { %v1258_v44 = vpack.c.bf16 %v3591_v18, %v3590_v16  ;;  %v1225_v14 = vpop.f32.mrb[47].mxu1 }
 0x371   :  { %v1257_v55 = vpack.c.bf16 %v1225_v14, %v1222_v30 }
 0x373   :  { %3608 = vmatprep.mubr.msk.bf16.mxu0 %vm123_vm0, %v1257_v55 }
 0x374   :  { %3609 = vmatmul.mubr.msk.bf16.gmra.mrb[44].mxu0 %vm123_vm0, %v1258_v44 }
 0x375   :  { %v3594_v15 = vpop.f32.mrb[48].mxu1 }
 0x376   :  { %v1238_v4 = vpop.f32.mrb[49].mxu1 }
 0x377   :  { %v3595_v2 = vpop.f32.mrb[50].mxu1 }
 0x378   :  { %v1260_v59 = vpack.c.bf16 %v3595_v2, %v3594_v15  ;;  %v1241_v1 = vpop.f32.mrb[51].mxu1  ;;  %v3902_v2 = vld [vmem:[%s5601_s7 + $0x10] sm:$0xff]  }
 0x379   :  { %v1259_v50 = vpack.c.bf16 %v1241_v1, %v1238_v4  ;;  %3656 = vmatprep.subr.bf16.mxu1 %v3902_v2 }
 0x37a   :  { %3657 = vmatpush3.bf16.msra.mxu1 %v3902_v2 }
 0x37b   :  { %3612 = vmatprep.mubr.msk.bf16.mxu0 %vm123_vm0, %v1259_v50 }
 0x37c   :  { %3613 = vmatmul.mubr.msk.bf16.gmra.mrb[48].mxu0 %vm123_vm0, %v1260_v59  ;;  %v3903_v59 = vld [vmem:[%s5601_s7 + $0x18] sm:$0xff]  }
 0x37d   :  { %v3622_v53 = vpop.f32.mrb[52].mxu1  ;;  %3640 = vmatprep.mubr.msk.bf16.mxu0 %vm123_vm0, %v4793_v48  ;;  %3658 = vmatprep.subr.bf16.mxu1 %v3903_v59 }
 0x37e   :  { %v4896_v56 = vadd.f32 %v3622_v53, %v4890_v45  ;;  %v1512_v39 = vpop.f32.mrb[53].mxu1  ;;  %3659 = vmatpush3.bf16.msra.mxu1 %v3903_v59 }
 0x37f   :  { %v4899_v6 = vadd.f32 %v4890_v45, %v1512_v39  ;;  %v3623_v33 = vpop.f32.mrb[54].mxu1 }
 0x380   :  { %v1515_v37 = vpop.f32.mrb[55].mxu1  ;;  %v1825_v52 = vsel %vm123_vm0, %v4896_v56, -inf  ;;  %v4904_v19 = vadd.f32 %v3623_v33, %v4890_v45 }
 0x381   :  { %v4907_v47 = vadd.f32 %v4890_v45, %v1515_v37  ;;  %1826 = vmax.xlane.f32.xlu0 %v1825_v52  ;;  %v1819_v48 = vsel %vm123_vm0, %v4899_v6, -inf  ;;  %3661 = vmatmul.mubr.msk.bf16.vlgmr.msra.gmra.mrb[68].mxu1 %vm123_vm0, %v4810_v7 }
 0x382   :  { %v1828_v25 = vsel %vm123_vm0, %v4904_v19, -inf  ;;  %3664 = vmatprep.mubr.msk.bf16.mxu1 %vm123_vm0, %v4812_v42 }
 0x383   :  { %v1822_v51 = vsel %vm123_vm0, %v4907_v47, -inf }
 0x384   :  { %1823 = vmax.xlane.f32.xlu1 %v1822_v51  ;;  %3641 = vmatmul.mubr.msk.bf16.vlgmr.msra.gmra.mrb[52].mxu0 %vm123_vm0, %v4810_v7 }
 0x385   :  { %v3626_v10 = vpop.f32.mrb[56].mxu1  ;;  %1820 = vmax.xlane.f32.xlu0 %v1819_v48  ;;  %3644 = vmatprep.mubr.msk.bf16.mxu0 %vm123_vm0, %v4812_v42 }
 0x386   :  { %v4920_v63 = vadd.f32 %v3626_v10, %v4890_v45  ;;  %v1528_v62 = vpop.f32.mrb[57].mxu1  ;;  %3677 = vmatpush3.bf16.msra.mxu0 %v4459_v49 }
 0x387   :  { %v4924_v17 = vadd.f32 %v4890_v45, %v1528_v62  ;;  %v3627_v12 = vpop.f32.mrb[58].mxu1  ;;  %3678 = vmatprep.subr.bf16.mxu0 %v4535_v46 }
 0x388   :  { %v1531_v9 = vpop.f32.mrb[59].mxu1  ;;  %1829 = vmax.xlane.f32.xlu1 %v1828_v25  ;;  %v1837_v32 = vsel %vm123_vm0, %v4920_v63, -inf  ;;  %v4930_v29 = vadd.f32 %v3627_v12, %v4890_v45 }
 0x389   :  { %v4933_v22 = vadd.f32 %v4890_v45, %v1531_v9  ;;  %1838 = vmax.xlane.f32.xlu0 %v1837_v32  ;;  %v1831_v49 = vsel %vm123_vm0, %v4924_v17, -inf  ;;  %3665 = vmatmul.mubr.msk.bf16.gmra.mrb[72].mxu1 %vm123_vm0, %v4830_v35 }
 0x38a   :  { %3679 = vmatpush3.bf16.msra.mxu0 %v4535_v46  ;;  %v1840_v54 = vsel %vm123_vm0, %v4930_v29, -inf  ;;  %3668 = vmatprep.mubr.msk.bf16.mxu1 %vm123_vm0, %v4832_v21 }
 0x38b   :  { %v1834_v43 = vsel %vm123_vm0, %v4933_v22, -inf }
 0x38c   :  { %1835 = vmax.xlane.f32.xlu1 %v1834_v43  ;;  %3645 = vmatmul.mubr.msk.bf16.gmra.mrb[56].mxu0 %vm123_vm0, %v4830_v35 }
 0x38d   :  { %v3630_v27 = vpop.f32.mrb[60].mxu1  ;;  %1832 = vmax.xlane.f32.xlu0 %v1831_v49  ;;  %3648 = vmatprep.mubr.msk.bf16.mxu0 %vm123_vm0, %v4832_v21 }
 0x38e   :  { %v4947_v3 = vadd.f32 %v3630_v27, %v4890_v45  ;;  %v1544_v61 = vpop.f32.mrb[61].mxu1 }
 0x38f   :  { %v4950_v46 = vadd.f32 %v4890_v45, %v1544_v61  ;;  %v3631_v40 = vpop.f32.mrb[62].mxu1 }
 0x390   :  { %v1547_v11 = vpop.f32.mrb[63].mxu1  ;;  %1841 = vmax.xlane.f32.xlu1 %v1840_v54  ;;  %v1849_v20 = vsel %vm123_vm0, %v4947_v3, -inf  ;;  %v4955_v57 = vadd.f32 %v3631_v40, %v4890_v45 }
 0x391   :  { %v4958_v13 = vadd.f32 %v4890_v45, %v1547_v11  ;;  %1850 = vmax.xlane.f32.xlu0 %v1849_v20  ;;  %v1843_v41 = vsel %vm123_vm0, %v4950_v46, -inf  ;;  %3669 = vmatmul.mubr.msk.bf16.gmra.mrb[76].mxu1 %vm123_vm0, %v4850_v26 }
 0x392   :  { %v1852_v8 = vsel %vm123_vm0, %v4955_v57, -inf  ;;  %3672 = vmatprep.mubr.msk.bf16.mxu1 %vm123_vm0, %v4852_v38 }
 0x393   :  { %v1846_v5 = vsel %vm123_vm0, %v4958_v13, -inf }
 0x394   :  { %1847 = vmax.xlane.f32.xlu1 %v1846_v5  ;;  %3649 = vmatmul.mubr.msk.bf16.gmra.mrb[60].mxu0 %vm123_vm0, %v4850_v26 }
 0x395   :  { %v3634_v24 = vpop.f32.mrb[64].mxu1  ;;  %1844 = vmax.xlane.f32.xlu0 %v1843_v41  ;;  %3652 = vmatprep.mubr.msk.bf16.mxu0 %vm123_vm0, %v4852_v38 }
 0x396   :  { %v4971_v28 = vadd.f32 %v3634_v24, %v4890_v45  ;;  %v1560_v58 = vpop.f32.mrb[65].mxu1 }
 0x397   :  { %v4974_v36 = vadd.f32 %v4890_v45, %v1560_v58  ;;  %v3635_v16 = vpop.f32.mrb[66].mxu1 }
 0x398   :  { %v1563_v30 = vpop.f32.mrb[67].mxu1  ;;  %1853 = vmax.xlane.f32.xlu1 %v1852_v8  ;;  %v1861_v18 = vsel %vm123_vm0, %v4971_v28, -inf  ;;  %v4979_v44 = vadd.f32 %v3635_v16, %v4890_v45 }
 0x399   :  { %v4982_v14 = vadd.f32 %v4890_v45, %v1563_v30  ;;  %1862 = vmax.xlane.f32.xlu0 %v1861_v18  ;;  %v1855_v55 = vsel %vm123_vm0, %v4974_v36, -inf  ;;  %3673 = vmatmul.mubr.msk.bf16.gmra.mrb[80].mxu1 %vm123_vm0, %v4864_v0 }
 0x39a   :  { %v1864_v4 = vsel %vm123_vm0, %v4979_v44, -inf }
 0x39b   :  { %v1858_v15 = vsel %vm123_vm0, %v4982_v14, -inf }
 0x39c   :  { %1859 = vmax.xlane.f32.xlu1 %v1858_v15  ;;  %3653 = vmatmul.mubr.msk.bf16.gmra.mrb[64].mxu0 %vm123_vm0, %v4864_v0 }
 0x39d   :  { %1856 = vmax.xlane.f32.xlu0 %v1855_v55 }
 0x3a0   :  { %1865 = vmax.xlane.f32.xlu1 %v1864_v4 }
 0x40e   :  { %v1827_v1 = vpop.xlane.xlu0 %1826 }
 0x40f   :  { %v1869_v7 = vsub.f32 %v4896_v56, %v1827_v1 }
 0x411   :  { %v1824_v50 = vpop.xlane.xlu1 %1823  ;;  %v1887_v53 = vmul.f32 1.442695, %v1869_v7 }
 0x412   :  { %v1868_v42 = vsub.f32 %v4907_v47, %v1824_v50  ;;  %v1821_v45 = vpop.xlane.xlu0 %1820 }
 0x413   :  { %v1867_v35 = vsub.f32 %v4899_v6, %v1821_v45 }
 0x414   :  { %v1885_v21 = vmul.f32 1.442695, %v1868_v42 }
 0x415   :  { %v1883_v39 = vmul.f32 1.442695, %v1867_v35  ;;  %v1830_v33 = vpop.xlane.xlu1 %1829 }
 0x416   :  { %4012 = vpow2.f32 %v1885_v21  ;;  %v1870_v26 = vsub.f32 %v4904_v19, %v1830_v33  ;;  %v1839_v38 = vpop.xlane.xlu0 %1838 }
 0x417   :  { %4014 = vpow2.f32 %v1883_v39  ;;  %v1873_v37 = vsub.f32 %v4920_v63, %v1839_v38 }
 0x418   :  { %4016 = vpow2.f32 %v1887_v53  ;;  %v1889_v0 = vmul.f32 1.442695, %v1870_v26 }
 0x419   :  { %v1836_v56 = vpop.xlane.xlu1 %1835  ;;  %v1895_v48 = vmul.f32 1.442695, %v1873_v37 }
 0x41a   :  { %4018 = vpow2.f32 %v1889_v0  ;;  %v1872_v52 = vsub.f32 %v4933_v22, %v1836_v56  ;;  %v1833_v47 = vpop.xlane.xlu0 %1832 }
 0x41b   :  { %v1871_v6 = vsub.f32 %v4924_v17, %v1833_v47  ;;  %v3215_v47 = vld [vmem:[%s5600_s6 + $0x1] ss:$0 sm:$0xff] }
 0x41c   :  { %v1893_v51 = vmul.f32 1.442695, %v1872_v52 }
 0x41d   :  { %v1891_v10 = vmul.f32 1.442695, %v1871_v6  ;;  %v1842_v25 = vpop.xlane.xlu1 %1841 }
 0x41e   :  { %4020 = vpow2.f32 %v1893_v51  ;;  %v1874_v19 = vsub.f32 %v4930_v29, %v1842_v25  ;;  %v1851_v62 = vpop.xlane.xlu0 %1850 }
 0x41f   :  { %4022 = vpow2.f32 %v1891_v10  ;;  %v1877_v9 = vsub.f32 %v4947_v3, %v1851_v62 }
 0x420   :  { %v5020_v12 = vpop.eup %4012  ;;  %4024 = vpow2.f32 %v1895_v48  ;;  %v1897_v63 = vmul.f32 1.442695, %v1874_v19 }
 0x421   :  { %v5023_v32 = vpop.eup %4014  ;;  %v1848_v22 = vpop.xlane.xlu1 %1847  ;;  %v1903_v61 = vmul.f32 1.442695, %v1877_v9 }
 0x422   :  { %v5025_v49 = vpop.eup %4016  ;;  %4026 = vpow2.f32 %v1897_v63  ;;  %v1876_v17 = vsub.f32 %v4958_v13, %v1848_v22  ;;  %v1845_v43 = vpop.xlane.xlu0 %1844  ;;  %v1915_v29 = vpack.c.bf16 %v5020_v12, %v5023_v32 }
 0x423   :  { %v1875_v27 = vsub.f32 %v4950_v46, %v1845_v43 }
 0x424   :  { %v5031_v54 = vpop.eup %4018  ;;  %v1901_v40 = vmul.f32 1.442695, %v1876_v17  ;;  %3680 = vmatprep.mubr.msk.bf16.mxu0 %vm123_vm0, %v1915_v29 }
 0x425   :  { %v1916_v3 = vpack.c.bf16 %v5031_v54, %v5025_v49  ;;  %v1899_v11 = vmul.f32 1.442695, %v1875_v27  ;;  %v1854_v20 = vpop.xlane.xlu1 %1853 }
 0x426   :  { %4028 = vpow2.f32 %v1901_v40  ;;  %v1878_v13 = vsub.f32 %v4955_v57, %v1854_v20  ;;  %v1863_v41 = vpop.xlane.xlu0 %1862 }
 0x427   :  { %4030 = vpow2.f32 %v1899_v11  ;;  %3681 = vmatmul.mubr.msk.bf16.vlgmr.msra.gmra.mrb[68].mxu0 %vm123_vm0, %v1916_v3  ;;  %v1881_v24 = vsub.f32 %v4971_v28, %v1863_v41 }
 0x428   :  { %v5038_v5 = vpop.eup %4020  ;;  %4032 = vpow2.f32 %v1903_v61  ;;  %v1905_v46 = vmul.f32 1.442695, %v1878_v13 }
 0x429   :  { %v5041_v8 = vpop.eup %4022  ;;  %v1860_v58 = vpop.xlane.xlu1 %1859  ;;  %v1911_v4 = vmul.f32 1.442695, %v1881_v24 }
 0x42a   :  { %v5043_v16 = vpop.eup %4024  ;;  %4034 = vpow2.f32 %v1905_v46  ;;  %v1880_v30 = vsub.f32 %v4982_v14, %v1860_v58  ;;  %v1857_v18 = vpop.xlane.xlu0 %1856  ;;  %v1917_v57 = vpack.c.bf16 %v5038_v5, %v5041_v8 }
 0x42b   :  { %v1879_v55 = vsub.f32 %v4974_v36, %v1857_v18 }
 0x42c   :  { %v5049_v15 = vpop.eup %4026  ;;  %v1909_v2 = vmul.f32 1.442695, %v1880_v30  ;;  %3684 = vmatprep.mubr.msk.bf16.mxu0 %vm123_vm0, %v1917_v57 }
 0x42d   :  { %v1907_v28 = vmul.f32 1.442695, %v1879_v55  ;;  %v1866_v59 = vpop.xlane.xlu1 %1865  ;;  %v1918_v1 = vpack.c.bf16 %v5049_v15, %v5043_v16 }
 0x42e   :  { %4036 = vpow2.f32 %v1909_v2  ;;  %v1882_v14 = vsub.f32 %v4979_v44, %v1866_v59 }
 0x42f   :  { %4038 = vpow2.f32 %v1907_v28  ;;  %3685 = vmatmul.mubr.msk.bf16.gmra.mrb[72].mxu0 %vm123_vm0, %v1918_v1 }
 0x430   :  { %v5056_v7 = vpop.eup %4028  ;;  %4040 = vpow2.f32 %v1911_v4  ;;  %v1913_v36 = vmul.f32 1.442695, %v1882_v14 }
 0x431   :  { %v5058_v50 = vpop.eup %4030 }
 0x432   :  { %v5060_v42 = vpop.eup %4032  ;;  %4042 = vpow2.f32 %v1913_v36  ;;  %v1919_v45 = vpack.c.bf16 %v5056_v7, %v5058_v50 }
 0x434   :  { %v5064_v35 = vpop.eup %4034  ;;  %3688 = vmatprep.mubr.msk.bf16.mxu0 %vm123_vm0, %v1919_v45 }
 0x435   :  { %v1920_v44 = vpack.c.bf16 %v5064_v35, %v5060_v42 }
 0x437   :  { %3689 = vmatmul.mubr.msk.bf16.gmra.mrb[76].mxu0 %vm123_vm0, %v1920_v44 }
 0x438   :  { %v5070_v53 = vpop.eup %4036 }
 0x439   :  { %v5072_v21 = vpop.eup %4038 }
 0x43a   :  { %v5074_v39 = vpop.eup %4040  ;;  %v1921_v33 = vpack.c.bf16 %v5070_v53, %v5072_v21 }
 0x43c   :  { %v5078_v26 = vpop.eup %4042  ;;  %3692 = vmatprep.mubr.msk.bf16.mxu0 %vm123_vm0, %v1921_v33 }
 0x43d   :  { %v1922_v38 = vpack.c.bf16 %v5078_v26, %v5074_v39 }
 0x43f   :  { %3693 = vmatmul.mubr.msk.bf16.gmra.mrb[80].mxu0 %vm123_vm0, %v1922_v38 }
 0x457   :  { %v3642_v0 = vpop.f32.mrb[52].mxu0 }
 0x458   :  { %v1634_v37 = vpop.f32.mrb[53].mxu0  ;;  %v5087_v6 = vadd.f32 %v3642_v0, %v3215_v47 }
 0x459   :  { %v3643_v56 = vpop.f32.mrb[54].mxu0  ;;  %v5089_v48 = vadd.f32 %v3215_v47, %v1634_v37 }
 0x45a   :  { %v1637_v52 = vpop.f32.mrb[55].mxu0  ;;  %v5091_v10 = vadd.f32 %v3643_v56, %v3215_v47  ;;  %v2094_v22 = vsel %vm123_vm0, %v5087_v6, -inf }
 0x45b   :  { %v5095_v62 = vadd.f32 %v3215_v47, %v1637_v52  ;;  %v2092_v27 = vsel %vm123_vm0, %v5089_v48, -inf }
 0x45c   :  { %v2095_v11 = vsel %vm123_vm0, %v5091_v10, -inf }
 0x45d   :  { %v2093_v41 = vsel %vm123_vm0, %v5095_v62, -inf }
 0x45f   :  { %v3646_v51 = vpop.f32.mrb[56].mxu0 }
 0x460   :  { %v5093_v25 = vadd.f32 %v3646_v51, %v3215_v47  ;;  %v1650_v19 = vpop.f32.mrb[57].mxu0 }
 0x461   :  { %v5097_v63 = vadd.f32 %v3215_v47, %v1650_v19  ;;  %v3647_v9 = vpop.f32.mrb[58].mxu0 }
 0x462   :  { %v2100_v17 = vsel %vm123_vm0, %v5093_v25, -inf  ;;  %v5103_v43 = vadd.f32 %v3647_v9, %v3215_v47  ;;  %v1653_v29 = vpop.f32.mrb[59].mxu0 }
 0x463   :  { %v2101_v61 = vmax.f32 %v2094_v22, %v2100_v17  ;;  %v2096_v40 = vsel %vm123_vm0, %v5097_v63, -inf  ;;  %v5109_v3 = vadd.f32 %v3215_v47, %v1653_v29 }
 0x464   :  { %v2097_v20 = vmax.f32 %v2092_v27, %v2096_v40  ;;  %v2102_v13 = vsel %vm123_vm0, %v5103_v43, -inf }
 0x465   :  { %v2103_v46 = vmax.f32 %v2095_v11, %v2102_v13  ;;  %v2098_v24 = vsel %vm123_vm0, %v5109_v3, -inf }
 0x466   :  { %v2099_v58 = vmax.f32 %v2093_v41, %v2098_v24 }
 0x467   :  { %v2105_v30 = vmax.f32 %v2101_v61, %v2103_v46  ;;  %v3650_v18 = vpop.f32.mrb[60].mxu0 }
 0x468   :  { %v2104_v57 = vmax.f32 %v2097_v20, %v2099_v58  ;;  %v1666_v55 = vpop.f32.mrb[61].mxu0  ;;  %v5119_v14 = vadd.f32 %v3650_v18, %v3215_v47 }
 0x469   :  { %v3651_v4 = vpop.f32.mrb[62].mxu0  ;;  %v5121_v36 = vadd.f32 %v3215_v47, %v1666_v55 }
 0x46a   :  { %v2106_v2 = vmax.f32 %v2104_v57, %v2105_v30  ;;  %v1669_v28 = vpop.f32.mrb[63].mxu0  ;;  %v5123_v33 = vadd.f32 %v3651_v4, %v3215_v47  ;;  %v2335_v19 = vsel %vm123_vm0, %v5119_v14, -inf }
 0x46b   :  { %v5127_v37 = vadd.f32 %v3215_v47, %v1669_v28  ;;  %v2333_v29 = vsel %vm123_vm0, %v5121_v36, -inf }
 0x46c   :  { %v2107_v59 = vrot.slane %v2106_v2, 4  ;;  %v2336_v20 = vsel %vm123_vm0, %v5123_v33, -inf }
 0x46d   :  { %v2334_v46 = vsel %vm123_vm0, %v5127_v37, -inf }
 0x46e   :  { %v2108_v1 = vmax.f32 %v2106_v2, %v2107_v59 }
 0x46f   :  { %v3654_v45 = vpop.f32.mrb[64].mxu0 }
 0x470   :  { %v2109_v44 = vrot.slane %v2108_v1, 2  ;;  %v5125_v38 = vadd.f32 %v3654_v45, %v3215_v47  ;;  %v1682_v0 = vpop.f32.mrb[65].mxu0 }
 0x471   :  { %v5129_v56 = vadd.f32 %v3215_v47, %v1682_v0  ;;  %v3655_v52 = vpop.f32.mrb[66].mxu0 }
 0x472   :  { %v2110_v51 = vmax.f32 %v2108_v1, %v2109_v44  ;;  %v2341_v9 = vsel %vm123_vm0, %v5125_v38, -inf  ;;  %v5135_v22 = vadd.f32 %v3655_v52, %v3215_v47  ;;  %v1685_v17 = vpop.f32.mrb[67].mxu0 }
 0x473   :  { %v2342_v27 = vmax.f32 %v2335_v19, %v2341_v9  ;;  %v2337_v61 = vsel %vm123_vm0, %v5129_v56, -inf  ;;  %v5141_v40 = vadd.f32 %v3215_v47, %v1685_v17  ;;  %v3662_v17 = vpop.f32.mrb[68].mxu1 }
 0x474   :  { %v2111_v11 = vrot.slane %v2110_v51, 1  ;;  %v2338_v13 = vmax.f32 %v2333_v29, %v2337_v61  ;;  %v2343_v41 = vsel %vm123_vm0, %v5135_v22, -inf }
 0x475   :  { %v2344_v24 = vmax.f32 %v2336_v20, %v2343_v41  ;;  %v2339_v58 = vsel %vm123_vm0, %v5141_v40, -inf }
 0x476   :  { %v2112_v30 = vmax.f32 %v2110_v51, %v2111_v11  ;;  %v2340_v18 = vmax.f32 %v2334_v46, %v2339_v58 }
 0x477   :  { %v2346_v57 = vmax.f32 %v2342_v27, %v2344_v24  ;;  %v1756_v27 = vpop.f32.mrb[69].mxu1 }
 0x478   :  { %v2113_v47 = vsub.f32 %v5089_v48, %v2112_v30  ;;  %v2114_v55 = vsub.f32 %v5095_v62, %v2112_v30  ;;  %v2115_v4 = vsub.f32 %v5087_v6, %v2112_v30  ;;  %v2116_v2 = vsub.f32 %v5091_v10, %v2112_v30  ;;  %v3663_v20 = vpop.f32.mrb[70].mxu1 }
 0x479   :  { %v2117_v28 = vsub.f32 %v5097_v63, %v2112_v30  ;;  %v2118_v59 = vsub.f32 %v5109_v3, %v2112_v30  ;;  %v2119_v1 = vsub.f32 %v5093_v25, %v2112_v30  ;;  %v2120_v45 = vsub.f32 %v5103_v43, %v2112_v30  ;;  %v5162_v25 = vld [vmem:[%s5602_s8 + $0x1] ss:$0 sm:$0xff]  ;;  %v1759_v41 = vpop.f32.mrb[71].mxu1 }
 0x47a   :  { %v2121_v44 = vmul.f32 1.442695, %v2113_v47  ;;  %v2123_v0 = vmul.f32 1.442695, %v2114_v55  ;;  %v2125_v52 = vmul.f32 1.442695, %v2115_v4  ;;  %v2345_v51 = vmax.f32 %v2338_v13, %v2340_v18 }
 0x47b   :  { %v2127_v19 = vmul.f32 1.442695, %v2116_v2  ;;  %v2129_v62 = vmul.f32 1.442695, %v2117_v28  ;;  %v2131_v10 = vmul.f32 1.442695, %v2118_v59  ;;  %v1765_v29 = vadd.f32 %v3662_v17, %v5162_v25 }
 0x47c   :  { %4044 = vpow2.f32 %v2121_v44  ;;  %v2347_v48 = vmax.f32 %v2345_v51, %v2346_v57  ;;  %v2133_v3 = vmul.f32 1.442695, %v2119_v1  ;;  %v2135_v43 = vmul.f32 1.442695, %v2120_v45 }
 0x47d   :  { %4046 = vpow2.f32 %v2123_v0  ;;  %v1757_v11 = vadd.f32 %v5162_v25, %v1756_v27  ;;  %v1768_v13 = vadd.f32 %v3663_v20, %v5162_v25  ;;  %v1760_v58 = vadd.f32 %v5162_v25, %v1759_v41 }
 0x47e   :  { %4048 = vpow2.f32 %v2125_v52  ;;  %v2348_v6 = vrot.slane %v2347_v48, 4  ;;  %v3666_v52 = vpop.f32.mrb[72].mxu1 }
 0x47f   :  { %4050 = vpow2.f32 %v2127_v19  ;;  %v2172_v57 = vpack.c.bf16 %v1768_v13, %v1765_v29  ;;  %v2171_v2 = vpack.c.bf16 %v1760_v58, %v1757_v11 }
 0x480   :  { %v2349_v63 = vmax.f32 %v2347_v48, %v2348_v6  ;;  %4052 = vpow2.f32 %v2129_v62  ;;  %v1772_v6 = vpop.f32.mrb[73].mxu1 }
 0x481   :  { %4054 = vpow2.f32 %v2131_v10  ;;  %3696 = vmatprep.subr.bf16.mxu1 %v2171_v2  ;;  %v1773_v13 = vadd.f32 %v5162_v25, %v1772_v6 }
 0x482   :  { %v2350_v9 = vrot.slane %v2349_v63, 2  ;;  %4056 = vpow2.f32 %v2133_v3  ;;  %3697 = vmatpush3.bf16.msra.mxu1 %v2171_v2 }
 0x483   :  { %4058 = vpow2.f32 %v2135_v43  ;;  %3698 = vmatprep.subr.bf16.mxu1 %v2172_v57 }
 0x484   :  { %v2351_v61 = vmax.f32 %v2349_v63, %v2350_v9  ;;  %v3667_v63 = vpop.f32.mrb[74].mxu1 }
 0x485   :  { %v1775_v9 = vpop.f32.mrb[75].mxu1 }
 0x486   :  { %v5167_v46 = vpop.eup %4044  ;;  %v2352_v24 = vrot.slane %v2351_v61, 1  ;;  %3699 = vmatpush3.bf16.msra.mxu1 %v2172_v57  ;;  %v1776_v58 = vadd.f32 %v5162_v25, %v1775_v9 }
 0x487   :  { %v5170_v30 = vpop.eup %4046  ;;  %v2137_v18 = vsel %vm123_vm0, %v5167_v46, 0.0 }
 0x488   :  { %v5174_v47 = vpop.eup %4048  ;;  %v2138_v55 = vsel %vm123_vm0, %v5170_v30, 0.0  ;;  %v5178_v4 = vmax.f32 %v2351_v61, %v2352_v24  ;;  %v1784_v24 = vadd.f32 %v3667_v63, %v5162_v25 }
 0x489   :  { %v5180_v28 = vpop.eup %4050  ;;  %v2139_v59 = vadd.f32 %v2138_v55, %v2137_v18  ;;  %v2140_v1 = vsel %vm123_vm0, %v5174_v47, 0.0  ;;  %v3670_v55 = vpop.f32.mrb[76].mxu1 }
 0x48a   :  { %v2354_v45 = vsub.f32 %v5121_v36, %v5178_v4  ;;  %v2355_v44 = vsub.f32 %v5127_v37, %v5178_v4  ;;  %v2356_v0 = vsub.f32 %v5119_v14, %v5178_v4  ;;  %v5190_v51 = vpop.eup %4052  ;;  %v2357_v48 = vsub.f32 %v5123_v33, %v5178_v4 }
 0x48b   :  { %v2141_v19 = vadd.f32 %v2140_v1, %v2139_v59  ;;  %v2358_v62 = vsub.f32 %v5129_v56, %v5178_v4  ;;  %v2142_v36 = vsel %vm123_vm0, %v5180_v28, 0.0  ;;  %v2359_v37 = vsub.f32 %v5141_v40, %v5178_v4  ;;  %v5204_v33 = vpop.eup %4054 }
 0x48c   :  { %v2360_v14 = vsub.f32 %v5125_v38, %v5178_v4  ;;  %v2361_v10 = vsub.f32 %v5135_v22, %v5178_v4  ;;  %v2362_v56 = vmul.f32 1.442695, %v2354_v45  ;;  %v2364_v43 = vmul.f32 1.442695, %v2355_v44  ;;  %v5208_v40 = vpop.eup %4056  ;;  %v1788_v45 = vpop.f32.mrb[77].mxu1 }
 0x48d   :  { %v2143_v3 = vadd.f32 %v2142_v36, %v2141_v19  ;;  %v2144_v17 = vsel %vm123_vm0, %v5190_v51, 0.0  ;;  %v2366_v29 = vmul.f32 1.442695, %v2356_v0  ;;  %v2368_v27 = vmul.f32 1.442695, %v2357_v48  ;;  %v5211_v22 = vpop.eup %4058  ;;  %v3671_v19 = vpop.f32.mrb[78].mxu1 }
 0x48e   :  { %4060 = vpow2.f32 %v2362_v56  ;;  %v1781_v38 = vadd.f32 %v3666_v52, %v5162_v25  ;;  %v2146_v11 = vsel %vm123_vm0, %v5204_v33, 0.0  ;;  %v2370_v20 = vmul.f32 1.442695, %v2358_v62  ;;  %v1791_v6 = vpop.f32.mrb[79].mxu1 }
 0x48f   :  { %v2145_v61 = vadd.f32 %v2144_v17, %v2143_v3  ;;  %4062 = vpow2.f32 %v2364_v43  ;;  %v2148_v18 = vsel %vm123_vm0, %v5208_v40, 0.0  ;;  %v2372_v57 = vmul.f32 1.442695, %v2359_v37 }
 0x490   :  { %4064 = vpow2.f32 %v2366_v29  ;;  %v2150_v2 = vsel %vm123_vm0, %v5211_v22, 0.0  ;;  %v2174_v59 = vpack.c.bf16 %v1784_v24, %v1781_v38  ;;  %v2173_v1 = vpack.c.bf16 %v1776_v58, %v1773_v13 }
 0x491   :  { %v2147_v41 = vadd.f32 %v2146_v11, %v2145_v61  ;;  %4066 = vpow2.f32 %v2368_v27  ;;  %v2374_v44 = vmul.f32 1.442695, %v2360_v14  ;;  %v1797_v0 = vadd.f32 %v3670_v55, %v5162_v25  ;;  %v3674_v11 = vpop.f32.mrb[80].mxu1 }
 0x492   :  { %4068 = vpow2.f32 %v2370_v20  ;;  %v1789_v52 = vadd.f32 %v5162_v25, %v1788_v45  ;;  %3700 = vmatprep.subr.bf16.mxu1 %v2173_v1  ;;  %v1800_v62 = vadd.f32 %v3671_v19, %v5162_v25  ;;  %v2376_v36 = vmul.f32 1.442695, %v2361_v10  ;;  %v1804_v24 = vpop.f32.mrb[81].mxu1 }
 0x493   :  { %v2149_v4 = vadd.f32 %v2148_v18, %v2147_v41  ;;  %4070 = vpow2.f32 %v2372_v57  ;;  %3701 = vmatpush3.bf16.msra.mxu1 %v2173_v1  ;;  %v1792_v37 = vadd.f32 %v5162_v25, %v1791_v6  ;;  %v1813_v41 = vadd.f32 %v3674_v11, %v5162_v25  ;;  %v3675_v55 = vpop.f32.mrb[82].mxu1 }
 0x494   :  { %v2413_v3 = vpack.c.bf16 %v1800_v62, %v1797_v0  ;;  %3702 = vmatprep.subr.bf16.mxu1 %v2174_v59  ;;  %4072 = vpow2.f32 %v2374_v44  ;;  %v1805_v57 = vadd.f32 %v5162_v25, %v1804_v24  ;;  %v1807_v1 = vpop.f32.mrb[83].mxu1 }
 0x495   :  { %v2151_v48 = vadd.f32 %v2150_v2, %v2149_v4  ;;  %v2412_v14 = vpack.c.bf16 %v1792_v37, %v1789_v52  ;;  %4074 = vpow2.f32 %v2376_v36  ;;  %v1808_v0 = vadd.f32 %v5162_v25, %v1807_v1 }
 0x497   :  { %v2152_v63 = vrot.slane %v2151_v48, 4  ;;  %3703 = vmatpush3.bf16.msra.mxu1 %v2174_v59  ;;  %3720 = vmatprep.subr.bf16.mxu0 %v2412_v14  ;;  %v1816_v59 = vadd.f32 %v3675_v55, %v5162_v25  ;;  %v2414_v36 = vpack.c.bf16 %v1808_v0, %v1805_v57 }
 0x498   :  { %v5226_v56 = vpop.eup %4060  ;;  %3721 = vmatpush3.bf16.msra.mxu0 %v2412_v14 }
 0x499   :  { %v2153_v43 = vadd.f32 %v2152_v63, %v2151_v48  ;;  %v5228_v9 = vpop.eup %4062  ;;  %v2378_v17 = vsel %vm123_vm0, %v5226_v56, 0.0  ;;  %3722 = vmatprep.subr.bf16.mxu0 %v2413_v3  ;;  %v2415_v48 = vpack.c.bf16 %v1816_v59, %v1813_v41 }
 0x49a   :  { %v5232_v10 = vpop.eup %4064  ;;  %v2379_v27 = vsel %vm123_vm0, %v5228_v9, 0.0 }
 0x49b   :  { %v2154_v29 = vrot.slane %v2153_v43, 2  ;;  %v5236_v61 = vpop.eup %4066  ;;  %v2380_v38 = vadd.f32 %v2379_v27, %v2378_v17  ;;  %v2381_v13 = vsel %vm123_vm0, %v5232_v10, 0.0 }
 0x49c   :  { %v4069_v58 = vpop.eup %4068  ;;  %v2383_v2 = vsel %vm123_vm0, %v5236_v61, 0.0  ;;  %3723 = vmatpush3.bf16.msra.mxu0 %v2413_v3 }
 0x49d   :  { %v2155_v20 = vadd.f32 %v2154_v29, %v2153_v43  ;;  %v2382_v18 = vadd.f32 %v2381_v13, %v2380_v38  ;;  %v4071_v45 = vpop.eup %4070  ;;  %v2385_v19 = vsel %vm123_vm0, %v4069_v58, 0.0  ;;  %3724 = vmatprep.subr.bf16.mxu0 %v2414_v36 }
 0x49e   :  { %v4073_v62 = vpop.eup %4072  ;;  %v2387_v37 = vsel %vm123_vm0, %v4071_v45, 0.0 }
 0x49f   :  { %v2156_v4 = vrot.slane %v2155_v20, 1  ;;  %v2384_v44 = vadd.f32 %v2383_v2, %v2382_v18  ;;  %v4075_v63 = vpop.eup %4074  ;;  %v2389_v3 = vsel %vm123_vm0, %v4073_v62, 0.0 }
 0x4a0   :  { %3725 = vmatpush3.bf16.msra.mxu0 %v2414_v36  ;;  %v2391_v25 = vsel %vm123_vm0, %v4075_v63, 0.0 }
 0x4a1   :  { %v2157_v52 = vadd.f32 %v2156_v4, %v2155_v20  ;;  %v2386_v6 = vadd.f32 %v2385_v19, %v2384_v44  ;;  %3726 = vmatprep.subr.bf16.mxu0 %v2415_v48 }
 0x4a3   :  { %4076 = vrcp.f32 %v2157_v52  ;;  %v2388_v14 = vadd.f32 %v2387_v37, %v2386_v6 }
 0x4a4   :  { %3727 = vmatpush3.bf16.msra.mxu0 %v2415_v48 }
 0x4a5   :  { %v2390_v43 = vadd.f32 %v2389_v3, %v2388_v14 }
 0x4a7   :  { %v2392_v17 = vadd.f32 %v2391_v25, %v2390_v43 }
 0x4a9   :  { %v2393_v29 = vrot.slane %v2392_v17, 4 }
 0x4ab   :  { %v2394_v27 = vadd.f32 %v2393_v29, %v2392_v17 }
 0x4ad   :  { %v4077_v38 = vpop.eup %4076  ;;  %v2395_v11 = vrot.slane %v2394_v27, 2 }
 0x4ae   :  { %v2159_v20 = vmul.f32 %v4077_v38, %v5167_v46  ;;  %v2160_v13 = vmul.f32 %v4077_v38, %v5170_v30  ;;  %v2161_v41 = vmul.f32 %v4077_v38, %v5174_v47  ;;  %v2162_v24 = vmul.f32 %v4077_v38, %v5180_v28 }
 0x4af   :  { %v2163_v18 = vmul.f32 %v4077_v38, %v5190_v51  ;;  %v2164_v57 = vmul.f32 %v4077_v38, %v5204_v33  ;;  %v2165_v55 = vmul.f32 %v4077_v38, %v5208_v40  ;;  %v2396_v4 = vadd.f32 %v2395_v11, %v2394_v27 }
 0x4b0   :  { %v2167_v2 = vpack.c.bf16 %v2160_v13, %v2159_v20  ;;  %v2166_v59 = vmul.f32 %v4077_v38, %v5211_v22  ;;  %v2168_v1 = vpack.c.bf16 %v2162_v24, %v2161_v41 }
 0x4b1   :  { %v2169_v44 = vpack.c.bf16 %v2164_v57, %v2163_v18  ;;  %v2397_v0 = vrot.slane %v2396_v4, 1 }
 0x4b2   :  { %2175 = vxpose.xlu0.c.b16.start [1/4] (short) (narrow) %v2167_v2, 32  ;;  %v2170_v46 = vpack.c.bf16 %v2166_v59, %v2165_v55 }
 0x4b3   :  { %v2398_v30 = vadd.f32 %v2397_v0, %v2396_v4 }
 0x4b5   :  { %4078 = vrcp.f32 %v2398_v30 }
 0x4b6   :  { %2176 = vxpose.xlu0.c.b16.cont [2/4] (short) (narrow) %v2168_v1, 32 }
 0x4ba   :  { %2177 = vxpose.xlu0.c.b16.cont [3/4] (short) (narrow) %v2169_v44, 32 }
 0x4be   :  { %2178 = vxpose.xlu0.c.b16.end [4/4] (short) (narrow) %v2170_v46, 32 }
 0x4bf   :  { %v4079_v47 = vpop.eup %4078 }
 0x4c0   :  { %v2400_v28 = vmul.f32 %v4079_v47, %v5226_v56  ;;  %v2401_v51 = vmul.f32 %v4079_v47, %v5228_v9  ;;  %v2402_v33 = vmul.f32 %v4079_v47, %v5232_v10  ;;  %v2403_v40 = vmul.f32 %v4079_v47, %v5236_v61 }
 0x4c1   :  { %v2404_v22 = vmul.f32 %v4079_v47, %v4069_v58  ;;  %v2405_v52 = vmul.f32 %v4079_v47, %v4071_v45  ;;  %v2406_v19 = vmul.f32 %v4079_v47, %v4073_v62  ;;  %v2407_v48 = vmul.f32 %v4079_v47, %v4075_v63 }
 0x4c2   :  { %v2408_v6 = vpack.c.bf16 %v2401_v51, %v2400_v28  ;;  %v2409_v36 = vpack.c.bf16 %v2403_v40, %v2402_v33 }
 0x4c3   :  { %v2410_v37 = vpack.c.bf16 %v2405_v52, %v2404_v22  ;;  %v2411_v14 = vpack.c.bf16 %v2407_v48, %v2406_v19 }
 0x4c4   :  { %2416 = vxpose.xlu1.c.b16.start [1/4] (short) (narrow) %v2408_v6, 32 }
 0x4c8   :  { %2417 = vxpose.xlu1.c.b16.cont [2/4] (short) (narrow) %v2409_v36, 32 }
 0x4cc   :  { %2418 = vxpose.xlu1.c.b16.cont [3/4] (short) (narrow) %v2410_v37, 32 }
 0x4d0   :  { %2419 = vxpose.xlu1.c.b16.end [4/4] (short) (narrow) %v2411_v14, 32 }
 0x4fa   :  { %v3682_v3 = vpop.f32.mrb[68].mxu0 }
 0x4fb   :  { %v2046_v56 = vmax.f32 %v3682_v3, 1e-30  ;;  %v1981_v43 = vpop.f32.mrb[69].mxu0 }
 0x4fc   :  { %v2044_v9 = vmax.f32 %v1981_v43, 1e-30  ;;  %v3683_v25 = vpop.f32.mrb[70].mxu0 }
 0x4fd   :  { %4080 = vrcp.f32 %v2046_v56  ;;  %v2047_v10 = vmax.f32 %v3683_v25, 1e-30  ;;  %v1984_v61 = vpop.f32.mrb[71].mxu0 }
 0x4fe   :  { %4082 = vrcp.f32 %v2044_v9  ;;  %v2045_v58 = vmax.f32 %v1984_v61, 1e-30 }
 0x4ff   :  { %4084 = vrcp.f32 %v2047_v10 }
 0x500   :  { %4086 = vrcp.f32 %v2045_v58 }
 0x502   :  { %v3686_v45 = vpop.f32.mrb[72].mxu0 }
 0x503   :  { %v2050_v62 = vmax.f32 %v3686_v45, 1e-30  ;;  %v1997_v63 = vpop.f32.mrb[73].mxu0 }
 0x504   :  { %v2048_v17 = vmax.f32 %v1997_v63, 1e-30  ;;  %v3687_v29 = vpop.f32.mrb[74].mxu0 }
 0x505   :  { %4088 = vrcp.f32 %v2050_v62  ;;  %v2051_v27 = vmax.f32 %v3687_v29, 1e-30  ;;  %v2000_v38 = vpop.f32.mrb[75].mxu0 }
 0x506   :  { %4090 = vrcp.f32 %v2048_v17  ;;  %v2049_v11 = vmax.f32 %v2000_v38, 1e-30 }
 0x507   :  { %v4081_v20 = vpop.eup %4080  ;;  %4092 = vrcp.f32 %v2051_v27 }
 0x508   :  { %v4083_v13 = vpop.eup %4082  ;;  %4094 = vrcp.f32 %v2049_v11  ;;  %v5263_v18 = vmul.f32 %v4081_v20, %v5025_v49 }
 0x509   :  { %v4085_v41 = vpop.eup %4084  ;;  %v2076_v59 = vmul.f32 %v4083_v13, %v5023_v32 }
 0x50a   :  { %v4087_v24 = vpop.eup %4086  ;;  %v5266_v57 = vmul.f32 %v4085_v41, %v5031_v54  ;;  %v3690_v55 = vpop.f32.mrb[76].mxu0 }
 0x50b   :  { %v2054_v4 = vmax.f32 %v3690_v55, 1e-30  ;;  %v2013_v2 = vpop.f32.mrb[77].mxu0  ;;  %v2077_v1 = vmul.f32 %v4087_v24, %v5020_v12  ;;  %v3904_v55 = vld [vmem:[%s5603_s9 + $0x10] sm:$0xff]  }
 0x50c   :  { %v2052_v44 = vmax.f32 %v2013_v2, 1e-30  ;;  %v3691_v0 = vpop.f32.mrb[78].mxu0  ;;  %v2251_v46 = vpack.c.bf16 %v5266_v57, %v5263_v18  ;;  %3744 = vmatprep.subr.bf16.mxu0 %v3904_v55 }
 0x50d   :  { %4096 = vrcp.f32 %v2054_v4  ;;  %v2055_v30 = vmax.f32 %v3691_v0, 1e-30  ;;  %v2016_v47 = vpop.f32.mrb[79].mxu0  ;;  %v2250_v49 = vpack.c.bf16 %v2077_v1, %v2076_v59 }
 0x50e   :  { %4098 = vrcp.f32 %v2052_v44  ;;  %v2053_v28 = vmax.f32 %v2016_v47, 1e-30 }
 0x50f   :  { %v4089_v54 = vpop.eup %4088  ;;  %4100 = vrcp.f32 %v2055_v30 }
 0x510   :  { %v4091_v51 = vpop.eup %4090  ;;  %4102 = vrcp.f32 %v2053_v28  ;;  %v5273_v12 = vmul.f32 %v4089_v54, %v5043_v16 }
 0x511   :  { %v4093_v33 = vpop.eup %4092  ;;  %v2080_v48 = vmul.f32 %v4091_v51, %v5041_v8 }
 0x512   :  { %v4095_v40 = vpop.eup %4094  ;;  %v3694_v32 = vpop.f32.mrb[80].mxu0  ;;  %v5276_v22 = vmul.f32 %v4093_v33, %v5049_v15 }
 0x513   :  { %v2058_v52 = vmax.f32 %v3694_v32, 1e-30  ;;  %v2029_v19 = vpop.f32.mrb[81].mxu0  ;;  %v2081_v6 = vmul.f32 %v4095_v40, %v5038_v5 }
 0x514   :  { %v2056_v36 = vmax.f32 %v2029_v19, 1e-30  ;;  %v3695_v37 = vpop.f32.mrb[82].mxu0  ;;  %v2253_v14 = vpack.c.bf16 %v5276_v22, %v5273_v12 }
 0x515   :  { %4104 = vrcp.f32 %v2058_v52  ;;  %v2059_v3 = vmax.f32 %v3695_v37, 1e-30  ;;  %v2032_v56 = vpop.f32.mrb[83].mxu0  ;;  %v2252_v43 = vpack.c.bf16 %v2081_v6, %v2080_v48 }
 0x516   :  { %4106 = vrcp.f32 %v2056_v36  ;;  %v2057_v16 = vmax.f32 %v2032_v56, 1e-30 }
 0x517   :  { %v4097_v9 = vpop.eup %4096  ;;  %4108 = vrcp.f32 %v2059_v3 }
 0x518   :  { %v4099_v15 = vpop.eup %4098  ;;  %4110 = vrcp.f32 %v2057_v16  ;;  %v2183_v25 = vpop.trf.xlu0  ;;  %v2086_v8 = vmul.f32 %v4097_v9, %v5060_v42 }
 0x519   :  { %v4101_v10 = vpop.eup %4100  ;;  %3704 = vmatprep.mubr.msk.bf16.mxu1 %vm869_vm1, %v2183_v25  ;;  %v2084_v58 = vmul.f32 %v4099_v15, %v5058_v50 }
 0x51a   :  { %v4103_v5 = vpop.eup %4102  ;;  %v2087_v61 = vmul.f32 %v4101_v10, %v5064_v35 }
 0x51b   :  { %v2085_v45 = vmul.f32 %v4103_v5, %v5056_v7 }
 0x51c   :  { %v2492_v62 = vpack.c.bf16 %v2087_v61, %v2086_v8  ;;  %v2184_v63 = vpop.trf.xlu0  ;;  %v3906_v61 = vld [vmem:[%s5605_s11] sm:$0xff]  }
 0x51d   :  { %3705 = vmatmul.mubr.msk.bf16.vlgmr.msra.gmra.mrb[84].mxu1 %vm869_vm1, %v2184_v63  ;;  %v2491_v17 = vpack.c.bf16 %v2085_v45, %v2084_v58  ;;  %v3907_v58 = vld [vmem:[%s5605_s11 + $0x8] sm:$0xff]   ;;  %v3908_v45 = vld [vmem:[%s5607_s13] sm:$0xff]   ;;  %v4113_v63 = vld [vmem:[%s5595_s1 + $0x18] sm:$0xff] }
 0x51e   :  { %3712 = vmatprep.mubr.msk.bf16.mxu1 %vm123_vm0, %v2250_v49 }
 0x51f   :  { %v4105_v29 = vpop.eup %4104 }
 0x520   :  { %v4107_v27 = vpop.eup %4106  ;;  %v2090_v20 = vmul.f32 %v4105_v29, %v5074_v39  ;;  %v4114_v29 = vld [vmem:[%s5594_s0 + $0x8] sm:$0xff] }
 0x521   :  { %v4109_v38 = vpop.eup %4108  ;;  %v2088_v35 = vmul.f32 %v4107_v27, %v5072_v21  ;;  %v4115_v27 = vld [vmem:[%s5595_s1 + $0x8] sm:$0xff] }
 0x522   :  { %v4111_v11 = vpop.eup %4110  ;;  %v2091_v42 = vmul.f32 %v4109_v38, %v5078_v26  ;;  %v3816_v38 = vadd.f32 %v4115_v27, %v4114_v29  ;;  %v4134_v27 = vld [vmem:[%s5594_s0 + $0x50] sm:$0xff] }
 0x523   :  { %v2089_v50 = vmul.f32 %v4111_v11, %v5070_v53  ;;  %v5354_v11 = vld [vmem:[%s5604_s10] ss:$0 sm:$0xff] }
 0x524   :  { %v2494_v7 = vpack.c.bf16 %v2091_v42, %v2090_v20  ;;  %v4116_v20 = vld [vmem:[%s5594_s0 + $0x10] sm:$0xff] }
 0x525   :  { %v2493_v13 = vpack.c.bf16 %v2089_v50, %v2088_v35  ;;  %v4117_v42 = vld [vmem:[%s5595_s1 + $0x10] sm:$0xff]  ;;  %v4118_v50 = vld [vmem:[%s5594_s0] sm:$0xff] }
 0x526   :  { %v3804_v35 = vadd.f32 %v4117_v42, %v4116_v20 }
 0x52a   :  { %v2424_v41 = vpop.trf.xlu1 }
 0x52b   :  { %3728 = vmatprep.mubr.msk.bf16.mxu0 %vm869_vm1, %v2424_v41 }
 0x52e   :  { %v2425_v24 = vpop.trf.xlu1 }
 0x52f   :  { %3729 = vmatmul.mubr.msk.bf16.vlgmr.msra.gmra.mrb[84].mxu0 %vm869_vm1, %v2425_v24  ;;  %v5372_v24 = vld [vmem:[%s5604_s10 + $0x1] ss:$0 sm:$0xff] }
 0x530   :  { %3745 = vmatpush3.bf16.msra.mxu0 %v3904_v55  ;;  %v3817_v55 = vadd.f32 %v3816_v38, %v5354_v11  ;;  %v4135_v38 = vld [vmem:[%s5595_s1 + $0x50] sm:$0xff] }
 0x531   :  { %v3836_v20 = vadd.f32 %v4135_v38, %v4134_v27 }
 0x5f0   :  { %v3706_v39 = vpop.f32.mrb[84].mxu1 }
 0x5f1   :  { %v2231_v26 = vpop.f32.mrb[85].mxu1  ;;  %v2248_v21 = vmul.f32 %v3706_v39, %v4745_v23  ;;  %v3805_v39 = vadd.f32 %v3804_v35, %v5354_v11 }
 0x5f2   :  { %v3707_v4 = vpop.f32.mrb[86].mxu1  ;;  %v2246_v59 = vmul.f32 %v2231_v26, %v4753_v31 }
 0x5f3   :  { %v2249_v53 = vmul.f32 %v3707_v4, %v4748_v60  ;;  %v2234_v2 = vpop.f32.mrb[87].mxu1 }
 0x5f4   :  { %v2247_v1 = vmul.f32 %v2234_v2, %v4756_v34 }
 0x5f5   :  { %v2255_v44 = vpack.c.bf16 %v2249_v53, %v2248_v21  ;;  %v4120_v21 = vld [vmem:[%s5594_s0 + $0x38] sm:$0xff] }
 0x5f6   :  { %v2254_v0 = vpack.c.bf16 %v2247_v1, %v2246_v59  ;;  %v4121_v53 = vld [vmem:[%s5595_s1 + $0x38] sm:$0xff]  ;;  %v3818_v1 = vadd.f32 %v3817_v55, %v5372_v24  ;;  %v3837_v55 = vadd.f32 %v3836_v20, %v5354_v11 }
 0x5f7   :  { %v3828_v2 = vadd.f32 %v4121_v53, %v4120_v21 }
 0x5f8   :  { %3708 = vmatprep.subr.bf16.mxu1 %v2254_v0 }
 0x5f9   :  { %3709 = vmatpush3.bf16.msra.mxu1 %v2254_v0  ;;  %v4123_v0 = vld [vmem:[%s5595_s1 + $0x20] sm:$0xff] }
 0x5fa   :  { %3710 = vmatprep.subr.bf16.mxu1 %v2255_v44 }
 0x5fd   :  { %3711 = vmatpush3.bf16.msra.mxu1 %v2255_v44  ;;  %v4122_v44 = vld [vmem:[%s5594_s0 + $0x20] sm:$0xff] }
 0x600   :  { %3713 = vmatmul.mubr.msk.bf16.vlgmr.msra.gmra.mrb[88].mxu1 %vm123_vm0, %v2251_v46 }
 0x601   :  { %3716 = vmatprep.mubr.msk.bf16.mxu1 %vm123_vm0, %v2252_v43 }
 0x602   :  { %v3730_v30 = vpop.f32.mrb[84].mxu0 }
 0x603   :  { %v2472_v47 = vpop.f32.mrb[85].mxu0  ;;  %v2489_v28 = vmul.f32 %v3730_v30, %v4745_v23  ;;  %v3905_v23 = vld [vmem:[%s5603_s9 + $0x18] sm:$0xff]   ;;  %v3824_v30 = vadd.f32 %v4123_v0, %v4122_v44  ;;  %v4139_v44 = vld [vmem:[%s5595_s1 + $0x60] sm:$0xff] }
 0x604   :  { %v3731_v49 = vpop.f32.mrb[86].mxu0  ;;  %v2487_v33 = vmul.f32 %v2472_v47, %v4753_v31  ;;  %3746 = vmatprep.subr.bf16.mxu0 %v3905_v23  ;;  %v4124_v47 = vld [vmem:[%s5594_s0 + $0x28] sm:$0xff] }
 0x605   :  { %v2490_v54 = vmul.f32 %v3731_v49, %v4748_v60  ;;  %v2475_v51 = vpop.f32.mrb[87].mxu0  ;;  %3747 = vmatpush3.bf16.msra.mxu0 %v3905_v23  ;;  %v4125_v49 = vld [vmem:[%s5595_s1 + $0x28] sm:$0xff] }
 0x606   :  { %v2488_v40 = vmul.f32 %v2475_v51, %v4756_v34  ;;  %3784 = vmatprep.subr.bf16.mxu0 %v3908_v45 }
 0x607   :  { %v2496_v32 = vpack.c.bf16 %v2490_v54, %v2489_v28  ;;  %v3832_v28 = vadd.f32 %v4125_v49, %v4124_v47  ;;  %v4141_v47 = vld [vmem:[%s5595_s1 + $0x68] sm:$0xff] }
 0x608   :  { %3717 = vmatmul.mubr.msk.bf16.gmra.mrb[92].mxu1 %vm123_vm0, %v2253_v14  ;;  %v2495_v18 = vpack.c.bf16 %v2488_v40, %v2487_v33  ;;  %v4126_v33 = vld [vmem:[%s5594_s0 + $0x30] sm:$0xff] }
 0x609   :  { %3736 = vmatprep.mubr.msk.bf16.mxu1 %vm123_vm0, %v2491_v17  ;;  %v4127_v40 = vld [vmem:[%s5595_s1 + $0x30] sm:$0xff] }
 0x60a   :  { %3732 = vmatprep.subr.bf16.mxu1 %v2495_v18 }
 0x60b   :  { %3733 = vmatpush3.bf16.msra.mxu1 %v2495_v18 }
 0x60c   :  { %3734 = vmatprep.subr.bf16.mxu1 %v2496_v32 }
 0x60f   :  { %3735 = vmatpush3.bf16.msra.mxu1 %v2496_v32  ;;  %v3820_v32 = vadd.f32 %v4127_v40, %v4126_v33  ;;  %v4143_v33 = vld [vmem:[%s5595_s1 + $0x70] sm:$0xff] }
 0x610   :  { %3764 = vmatprep.subr.bf16.mxu1 %v3906_v61 }
 0x612   :  { %3737 = vmatmul.mubr.msk.bf16.vlgmr.msra.gmra.mrb[96].mxu1 %vm123_vm0, %v2492_v62  ;;  %v4112_v62 = vld [vmem:[%s5594_s0 + $0x18] sm:$0xff] }
 0x613   :  { %3740 = vmatprep.mubr.msk.bf16.mxu1 %vm123_vm0, %v2493_v13  ;;  %3765 = vmatpush3.bf16.msra.mxu1 %v3906_v61  ;;  %v3812_v17 = vadd.f32 %v4113_v63, %v4112_v62  ;;  %v4131_v61 = vld [vmem:[%s5595_s1 + $0x40] sm:$0xff]  ;;  %v4133_v62 = vld [vmem:[%s5595_s1 + $0x48] sm:$0xff] }
 0x614   :  { %3766 = vmatprep.subr.bf16.mxu1 %v3907_v58 }
 0x615   :  { %v3813_v41 = vadd.f32 %v3812_v17, %v5354_v11 }
 0x617   :  { %3767 = vmatpush3.bf16.msra.mxu1 %v3907_v58  ;;  %v3814_v4 = vadd.f32 %v3813_v41, %v5372_v24 }
 0x61a   :  { %3741 = vmatmul.mubr.msk.bf16.gmra.mrb[100].mxu1 %vm123_vm0, %v2494_v7  ;;  %v4119_v7 = vld [vmem:[%s5595_s1] sm:$0xff] }
 0x61b   :  { %v3808_v13 = vadd.f32 %v4119_v7, %v4118_v50 }
 0x61d   :  { %v3809_v26 = vadd.f32 %v3808_v13, %v5354_v11 }
 0x6d3   :  { %v3714_v60 = vpop.f32.mrb[88].mxu1 }
 0x6d4   :  { %v2302_v31 = vpop.f32.mrb[89].mxu1 }
 0x6d5   :  { %v3715_v34 = vpop.f32.mrb[90].mxu1 }
 0x6d6   :  { %v2575_v57 = vpack.c.bf16 %v3715_v34, %v3714_v60  ;;  %v2305_v46 = vpop.f32.mrb[91].mxu1 }
 0x6d7   :  { %v2574_v12 = vpack.c.bf16 %v2305_v46, %v2302_v31 }
 0x6d9   :  { %3748 = vmatprep.mubr.msk.bf16.mxu0 %vm123_vm0, %v2574_v12 }
 0x6da   :  { %3749 = vmatmul.mubr.msk.bf16.vlgmr.msra.gmra.mrb[36].mxu0 %vm123_vm0, %v2575_v57  ;;  %v3829_v57 = vadd.f32 %v3828_v2, %v5354_v11 }
 0x6db   :  { %v3718_v22 = vpop.f32.mrb[92].mxu1  ;;  %3785 = vmatpush3.bf16.msra.mxu0 %v3908_v45  ;;  %v4132_v45 = vld [vmem:[%s5594_s0 + $0x48] sm:$0xff] }
 0x6dc   :  { %v2318_v52 = vpop.f32.mrb[93].mxu1  ;;  %v3848_v63 = vadd.f32 %v4133_v62, %v4132_v45  ;;  %v3278_v62 = vld [vmem:[%s5606_s12] ss:$0 sm:$0xff] }
 0x6dd   :  { %v3719_v19 = vpop.f32.mrb[94].mxu1 }
 0x6de   :  { %v2577_v48 = vpack.c.bf16 %v3719_v19, %v3718_v22  ;;  %v2321_v6 = vpop.f32.mrb[95].mxu1  ;;  %v3825_v22 = vadd.f32 %v3824_v30, %v5354_v11  ;;  %v3821_v19 = vadd.f32 %v3820_v32, %v5354_v11  ;;  %v3849_v41 = vadd.f32 %v3848_v63, %v5354_v11  ;;  %v4140_v30 = vld [vmem:[%s5594_s0 + $0x68] sm:$0xff] }
 0x6df   :  { %v2576_v36 = vpack.c.bf16 %v2321_v6, %v2318_v52  ;;  %v3833_v52 = vadd.f32 %v3832_v28, %v5354_v11  ;;  %v3864_v49 = vadd.f32 %v4141_v47, %v4140_v30  ;;  %v3838_v28 = vadd.f32 %v3837_v55, %v5372_v24 }
 0x6e1   :  { %3752 = vmatprep.mubr.msk.bf16.mxu0 %vm123_vm0, %v2576_v36  ;;  %v3830_v36 = vadd.f32 %v3829_v57, %v5372_v24 }
 0x6e2   :  { %3753 = vmatmul.mubr.msk.bf16.gmra.mrb[40].mxu0 %vm123_vm0, %v2577_v48 }
 0x6e5   :  { %v3738_v37 = vpop.f32.mrb[96].mxu1 }
 0x6e6   :  { %v2543_v14 = vpop.f32.mrb[97].mxu1 }
 0x6e7   :  { %v3739_v3 = vpop.f32.mrb[98].mxu1 }
 0x6e8   :  { %v2579_v56 = vpack.c.bf16 %v3739_v3, %v3738_v37  ;;  %v2546_v43 = vpop.f32.mrb[99].mxu1  ;;  %v3834_v3 = vadd.f32 %v3833_v52, %v5372_v24 }
 0x6e9   :  { %v2578_v16 = vpack.c.bf16 %v2546_v43, %v2543_v14  ;;  %v3826_v14 = vadd.f32 %v3825_v22, %v5372_v24 }
 0x6eb   :  { %3756 = vmatprep.mubr.msk.bf16.mxu0 %vm123_vm0, %v2578_v16 }
 0x6ec   :  { %3757 = vmatmul.mubr.msk.bf16.gmra.mrb[44].mxu0 %vm123_vm0, %v2579_v56  ;;  %v3822_v56 = vadd.f32 %v3821_v19, %v5372_v24  ;;  %v3865_v19 = vadd.f32 %v3864_v49, %v5354_v11 }
 0x6ed   :  { %v3742_v9 = vpop.f32.mrb[100].mxu1 }
 0x6ee   :  { %v2559_v15 = vpop.f32.mrb[101].mxu1 }
 0x6ef   :  { %v3743_v25 = vpop.f32.mrb[102].mxu1 }
 0x6f0   :  { %v2581_v10 = vpack.c.bf16 %v3743_v25, %v3742_v9  ;;  %v2562_v5 = vpop.f32.mrb[103].mxu1  ;;  %v4128_v9 = vld [vmem:[%s5594_s0 + $0x58] sm:$0xff] }
 0x6f1   :  { %v2580_v8 = vpack.c.bf16 %v2562_v5, %v2559_v15  ;;  %v4129_v15 = vld [vmem:[%s5595_s1 + $0x58] sm:$0xff] }
 0x6f2   :  { %v3844_v25 = vadd.f32 %v4129_v15, %v4128_v9 }
 0x6f3   :  { %3760 = vmatprep.mubr.msk.bf16.mxu0 %vm123_vm0, %v2580_v8  ;;  %v4130_v8 = vld [vmem:[%s5594_s0 + $0x40] sm:$0xff] }
 0x6f4   :  { %3761 = vmatmul.mubr.msk.bf16.gmra.mrb[48].mxu0 %vm123_vm0, %v2581_v10  ;;  %v3840_v58 = vadd.f32 %v4131_v61, %v4130_v8  ;;  %v3845_v50 = vadd.f32 %v3844_v25, %v5354_v11 }
 0x6f6   :  { %v3841_v13 = vadd.f32 %v3840_v58, %v5354_v11 }
 0x6f8   :  { %v3842_v2 = vadd.f32 %v3841_v13, %v5372_v24 }
 0x7ad   :  { %v3750_v59 = vpop.f32.mrb[36].mxu0 }
 0x7ae   :  { %v3806_v54 = vadd.f32 %v3805_v39, %v3750_v59  ;;  %v2665_v51 = vpop.f32.mrb[37].mxu0  ;;  %v3846_v39 = vadd.f32 %v3845_v50, %v5372_v24  ;;  %v3850_v59 = vadd.f32 %v3849_v41, %v5372_v24 }
 0x7af   :  { %v3810_v18 = vadd.f32 %v3809_v26, %v2665_v51  ;;  %v3751_v23 = vpop.f32.mrb[38].mxu0  ;;  %v4136_v26 = vld [vmem:[%s5594_s0 + $0x78] sm:$0xff]  ;;  %v4142_v51 = vld [vmem:[%s5594_s0 + $0x70] sm:$0xff] }
 0x7b0   :  { %v5404_v60 = vadd.f32 %v3806_v54, %v5372_v24  ;;  %v5406_v31 = vadd.f32 %v3814_v4, %v3751_v23  ;;  %v2668_v34 = vpop.f32.mrb[39].mxu0  ;;  %v4137_v4 = vld [vmem:[%s5595_s1 + $0x78] sm:$0xff]  ;;  %v3852_v40 = vadd.f32 %v4143_v33, %v4142_v51 }
 0x7b1   :  { %v5410_v46 = vadd.f32 %v3810_v18, %v5372_v24  ;;  %v5412_v12 = vadd.f32 %v3818_v1, %v2668_v34  ;;  %v3860_v21 = vadd.f32 %v4137_v4, %v4136_v26  ;;  %v4138_v1 = vld [vmem:[%s5594_s0 + $0x60] sm:$0xff] }
 0x7b2   :  { %v2761_v6 = vpack.c.bf16 %v5406_v31, %v5404_v60  ;;  %v3856_v0 = vadd.f32 %v4139_v44, %v4138_v1 }
 0x7b3   :  { %v2760_v48 = vpack.c.bf16 %v5412_v12, %v5410_v46  ;;  %v3861_v34 = vadd.f32 %v3860_v21, %v5354_v11 }
 0x7b4   :  { %v3857_v52 = vadd.f32 %v3856_v0, %v5354_v11 }
 0x7b5   :  { %v3754_v37 = vpop.f32.mrb[40].mxu0  ;;  %3768 = vmatprep.mubr.msk.bf16.mxu1 %vm123_vm0, %v2760_v48 }
 0x7b6   :  { %v2681_v43 = vpop.f32.mrb[41].mxu0  ;;  %3769 = vmatmul.mubr.msk.bf16.vlgmr.msra.gmra.mrb[104].mxu1 %vm123_vm0, %v2761_v6  ;;  %v5457_v42 = vadd.f32 %v3822_v56, %v3754_v37  ;;  %v3853_v6 = vadd.f32 %v3852_v40, %v5354_v11  ;;  %v3858_v56 = vadd.f32 %v3857_v52, %v5372_v24 }
 0x7b7   :  { %v3755_v16 = vpop.f32.mrb[42].mxu0  ;;  %v5447_v17 = vadd.f32 %v3826_v14, %v2681_v43  ;;  %v3862_v14 = vadd.f32 %v3861_v34, %v5372_v24  ;;  %v3866_v43 = vadd.f32 %v3865_v19, %v5372_v24 }
 0x7b8   :  { %v5433_v10 = vadd.f32 %v3830_v36, %v3755_v16  ;;  %v2684_v5 = vpop.f32.mrb[43].mxu0  ;;  %v3854_v16 = vadd.f32 %v3853_v6, %v5372_v24  ;;  %v3909_v24 = vld [vmem:[%s5607_s13 + $0x8] sm:$0xff]  }
 0x7b9   :  { %v5449_v29 = vadd.f32 %v3834_v3, %v2684_v5  ;;  %3786 = vmatprep.subr.bf16.mxu0 %v3909_v24 }
 0x7ba   :  { %v2763_v7 = vpack.c.bf16 %v5433_v10, %v5457_v42  ;;  %3787 = vmatpush3.bf16.msra.mxu0 %v3909_v24 }
 0x7bb   :  { %v2762_v35 = vpack.c.bf16 %v5449_v29, %v5447_v17 }
 0x7bd   :  { %3772 = vmatprep.mubr.msk.bf16.mxu1 %vm123_vm0, %v2762_v35 }
 0x7be   :  { %3773 = vmatmul.mubr.msk.bf16.gmra.mrb[108].mxu1 %vm123_vm0, %v2763_v7 }
 0x7bf   :  { %v3758_v53 = vpop.f32.mrb[44].mxu0 }
 0x7c0   :  { %v2697_v54 = vpop.f32.mrb[45].mxu0  ;;  %v5506_v48 = vadd.f32 %v3838_v28, %v3758_v53 }
 0x7c1   :  { %v3759_v32 = vpop.f32.mrb[46].mxu0  ;;  %v5500_v57 = vadd.f32 %v3842_v2, %v2697_v54 }
 0x7c2   :  { %v5497_v18 = vadd.f32 %v3846_v39, %v3759_v32  ;;  %v2700_v23 = vpop.f32.mrb[47].mxu0 }
 0x7c3   :  { %v5502_v22 = vadd.f32 %v3850_v59, %v2700_v23 }
 0x7c4   :  { %v2765_v37 = vpack.c.bf16 %v5497_v18, %v5506_v48 }
 0x7c5   :  { %v2764_v36 = vpack.c.bf16 %v5502_v22, %v5500_v57 }
 0x7c7   :  { %v3762_v3 = vpop.f32.mrb[48].mxu0  ;;  %3776 = vmatprep.mubr.msk.bf16.mxu1 %vm123_vm0, %v2764_v36 }
 0x7c8   :  { %v2713_v9 = vpop.f32.mrb[49].mxu0  ;;  %3777 = vmatmul.mubr.msk.bf16.gmra.mrb[112].mxu1 %vm123_vm0, %v2765_v37  ;;  %v5525_v61 = vadd.f32 %v3854_v16, %v3762_v3 }
 0x7c9   :  { %v3763_v11 = vpop.f32.mrb[50].mxu0  ;;  %v5521_v5 = vadd.f32 %v3858_v56, %v2713_v9 }
 0x7ca   :  { %v5519_v15 = vadd.f32 %v3862_v14, %v3763_v11  ;;  %v2716_v25 = vpop.f32.mrb[51].mxu0 }
 0x7cb   :  { %v5523_v8 = vadd.f32 %v3866_v43, %v2716_v25 }
 0x7cc   :  { %v2767_v45 = vpack.c.bf16 %v5519_v15, %v5525_v61 }
 0x7cd   :  { %v2766_v58 = vpack.c.bf16 %v5523_v8, %v5521_v5 }
 0x7cf   :  { %3780 = vmatprep.mubr.msk.bf16.mxu1 %vm123_vm0, %v2766_v58 }
 0x7d0   :  { %3781 = vmatmul.mubr.msk.bf16.gmra.mrb[116].mxu1 %vm123_vm0, %v2767_v45 }
 0x889   :  { %v3770_v63 = vpop.f32.mrb[104].mxu1 }
 0x88a   :  { %v2858_v27 = vadd.f32 %v3770_v63, %v3278_v62  ;;  %v2849_v38 = vpop.f32.mrb[105].mxu1 }
 0x88b   :  { %v2850_v20 = vadd.f32 %v3278_v62, %v2849_v38  ;;  %v3771_v35 = vpop.f32.mrb[106].mxu1 }
 0x88c   :  { %v2861_v50 = vadd.f32 %v3771_v35, %v3278_v62  ;;  %v2852_v7 = vpop.f32.mrb[107].mxu1  ;;  %v2914_v41 = vmax.f32 %v2858_v27, 0.0 }
 0x88d   :  { %v2853_v13 = vadd.f32 %v3278_v62, %v2852_v7  ;;  %v2912_v39 = vmax.f32 %v2850_v20, 0.0 }
 0x88e   :  { %v2915_v55 = vmax.f32 %v2861_v50, 0.0 }
 0x88f   :  { %v2913_v26 = vmax.f32 %v2853_v13, 0.0 }
 0x890   :  { %v2929_v4 = vpack.c.bf16 %v2915_v55, %v2914_v41  ;;  %v3289_v55 = vld [vmem:[%s5608_s14] ss:$0 sm:$0xff]  ;;  %s4168_s14 = smov [#allocation2]  }
 0x891   :  { %v2928_v21 = vpack.c.bf16 %v2913_v26, %v2912_v39  ;;  %v3774_v53 = vpop.f32.mrb[108].mxu1  ;;  %s3117_s29 = sshll.u32 %s4168_s14, 4  ;;  %s3118_s29 = int_to_ptr.vmem [resolvable:$true] %s3117_s29 }
 0x892   :  { %v2874_v2 = vadd.f32 %v3774_v53, %v3278_v62  ;;  %v2865_v59 = vpop.f32.mrb[109].mxu1  ;;  %s4144_s30 = scalar_lea.vmem %s3118_s29, 2048  ;;  %p4149_p1 = scmp.lt.s32.totalorder %s3118_s29, %s3118_s29 }
 0x893   :  { %v2866_v1 = vadd.f32 %v3278_v62, %v2865_v59  ;;  %v3775_v44 = vpop.f32.mrb[110].mxu1  ;;  %3788 = vmatprep.mubr.msk.bf16.mxu0 %vm123_vm0, %v2928_v21  ;;  %p4145_p0 = scmp.ne.s32.totalorder %s3118_s29, %s4144_s30  ;;  %p4150_p2 = scmp.lt.s32.totalorder %s4144_s30, %s4144_s30 }
 0x894   :  { %v2877_v0 = vadd.f32 %v3775_v44, %v3278_v62  ;;  %v2868_v30 = vpop.f32.mrb[111].mxu1  ;;  %3789 = vmatmul.mubr.msk.bf16.vlgmr.msra.gmra.mrb[88].mxu0 %vm123_vm0, %v2929_v4  ;;  %v2918_v49 = vmax.f32 %v2874_v2, 0.0 }
 0x895   :  { %v2869_v47 = vadd.f32 %v3278_v62, %v2868_v30  ;;  %v2916_v54 = vmax.f32 %v2866_v1, 0.0  ;;  %p4151_p3 = por %p4150_p2, %p4149_p1 }
 0x896   :  { %v2919_v28 = vmax.f32 %v2877_v0, 0.0 }
 0x897   :  { %v2917_v51 = vmax.f32 %v2869_v47, 0.0  ;;  %p4152_p4 = pnand %p4151_p3, %p4145_p0 }
 0x898   :  { %v2931_v33 = vpack.c.bf16 %v2919_v28, %v2918_v49 }
 0x899   :  { %v2930_v40 = vpack.c.bf16 %v2917_v51, %v2916_v54 }
 0x89b   :  { %3792 = vmatprep.mubr.msk.bf16.mxu0 %vm123_vm0, %v2930_v40  ;;  %v3778_v32 = vpop.f32.mrb[112].mxu1 }
 0x89c   :  { %3793 = vmatmul.mubr.msk.bf16.gmra.mrb[92].mxu0 %vm123_vm0, %v2931_v33  ;;  %v2890_v23 = vadd.f32 %v3778_v32, %v3278_v62  ;;  %v2881_v34 = vpop.f32.mrb[113].mxu1 }
 0x89d   :  { %v2882_v52 = vadd.f32 %v3278_v62, %v2881_v34  ;;  %v3779_v19 = vpop.f32.mrb[114].mxu1 }
 0x89e   :  { %v2893_v6 = vadd.f32 %v3779_v19, %v3278_v62  ;;  %v2884_v36 = vpop.f32.mrb[115].mxu1  ;;  %v2922_v14 = vmax.f32 %v2890_v23, 0.0 }
 0x89f   :  { %v2885_v37 = vadd.f32 %v3278_v62, %v2884_v36  ;;  %v2920_v56 = vmax.f32 %v2882_v52, 0.0 }
 0x8a0   :  { %v2923_v3 = vmax.f32 %v2893_v6, 0.0 }
 0x8a1   :  { %v2921_v43 = vmax.f32 %v2885_v37, 0.0 }
 0x8a2   :  { %v2933_v16 = vpack.c.bf16 %v2923_v3, %v2922_v14 }
 0x8a3   :  { %v2932_v9 = vpack.c.bf16 %v2921_v43, %v2920_v56  ;;  %v3782_v11 = vpop.f32.mrb[116].mxu1 }
 0x8a4   :  { %v2906_v25 = vadd.f32 %v3782_v11, %v3278_v62  ;;  %v2897_v58 = vpop.f32.mrb[117].mxu1 }
 0x8a5   :  { %v2898_v45 = vadd.f32 %v3278_v62, %v2897_v58  ;;  %v3783_v24 = vpop.f32.mrb[118].mxu1  ;;  %3796 = vmatprep.mubr.msk.bf16.mxu0 %vm123_vm0, %v2932_v9 }
 0x8a6   :  { %v2909_v63 = vadd.f32 %v3783_v24, %v3278_v62  ;;  %v2900_v27 = vpop.f32.mrb[119].mxu1  ;;  %3797 = vmatmul.mubr.msk.bf16.gmra.mrb[96].mxu0 %vm123_vm0, %v2933_v16  ;;  %v2926_v20 = vmax.f32 %v2906_v25, 0.0 }
 0x8a7   :  { %v2901_v38 = vadd.f32 %v3278_v62, %v2900_v27  ;;  %v2924_v50 = vmax.f32 %v2898_v45, 0.0 }
 0x8a8   :  { %v2927_v35 = vmax.f32 %v2909_v63, 0.0 }
 0x8a9   :  { %v2925_v7 = vmax.f32 %v2901_v38, 0.0 }
 0x8aa   :  { %v2935_v13 = vpack.c.bf16 %v2927_v35, %v2926_v20 }
 0x8ab   :  { %v2934_v41 = vpack.c.bf16 %v2925_v7, %v2924_v50 }
 0x8ad   :  { %3800 = vmatprep.mubr.msk.bf16.mxu0 %vm123_vm0, %v2934_v41 }
 0x8ae   :  { %3801 = vmatmul.mubr.msk.bf16.gmra.mrb[100].mxu0 %vm123_vm0, %v2935_v13 }
 0x967   :  { %v3790_v39 = vpop.f32.mrb[88].mxu0 }
 0x968   :  { %v3026_v26 = vadd.f32 %v3790_v39, %v3289_v55  ;;  %v3017_v4 = vpop.f32.mrb[89].mxu0 }
 0x969   :  { %v3018_v21 = vadd.f32 %v3289_v55, %v3017_v4  ;;  %v3791_v53 = vpop.f32.mrb[90].mxu0 }
 0x96a   :  { %v3082_v62 = vadd.f32 %v5404_v60, %v3026_v26  ;;  %v3029_v2 = vadd.f32 %v3791_v53, %v3289_v55  ;;  %v3020_v59 = vpop.f32.mrb[91].mxu0 }
 0x96b   :  { %v3080_v1 = vadd.f32 %v5410_v46, %v3018_v21  ;;  %v3021_v44 = vadd.f32 %v3289_v55, %v3020_v59 }
 0x96c   :  { %3098 = vst.msk [vmem:[#allocation2 + $0x10] sm:$0xff] %vm123_vm0, %v3082_v62  ;;  %v3083_v0 = vadd.f32 %v5406_v31, %v3029_v2 }
 0x96d   :  { %3096 = vst.msk [vmem:[#allocation2] sm:$0xff] %vm123_vm0, %v3080_v1  ;;  %v3081_v30 = vadd.f32 %v5412_v12, %v3021_v44 }
 0x96e   :  { %3099 = vst.msk [vmem:[#allocation2 + $0x18] sm:$0xff] %vm123_vm0, %v3083_v0 }
 0x96f   :  { %3097 = vst.msk [vmem:[#allocation2 + $0x8] sm:$0xff] %vm123_vm0, %v3081_v30  ;;  %v3794_v47 = vpop.f32.mrb[92].mxu0 }
 0x970   :  { %v3042_v49 = vadd.f32 %v3794_v47, %v3289_v55  ;;  %v3033_v60 = vpop.f32.mrb[93].mxu0 }
 0x971   :  { %v3034_v28 = vadd.f32 %v3289_v55, %v3033_v60  ;;  %v3795_v54 = vpop.f32.mrb[94].mxu0 }
 0x972   :  { %v3086_v46 = vadd.f32 %v5457_v42, %v3042_v49  ;;  %v3045_v51 = vadd.f32 %v3795_v54, %v3289_v55  ;;  %v3036_v33 = vpop.f32.mrb[95].mxu0 }
 0x973   :  { %v3084_v40 = vadd.f32 %v5447_v17, %v3034_v28  ;;  %v3037_v31 = vadd.f32 %v3289_v55, %v3036_v33 }
 0x974   :  { %3102 = vst.msk [vmem:[#allocation2 + $0x30] sm:$0xff] %vm123_vm0, %v3086_v46  ;;  %v3087_v12 = vadd.f32 %v5433_v10, %v3045_v51 }
 0x975   :  { %3100 = vst.msk [vmem:[#allocation2 + $0x20] sm:$0xff] %vm123_vm0, %v3084_v40  ;;  %v3085_v32 = vadd.f32 %v5449_v29, %v3037_v31 }
 0x976   :  { %3103 = vst.msk [vmem:[#allocation2 + $0x38] sm:$0xff] %vm123_vm0, %v3087_v12 }
 0x977   :  { %3101 = vst.msk [vmem:[#allocation2 + $0x28] sm:$0xff] %vm123_vm0, %v3085_v32 }
 0x979   :  { %v3798_v23 = vpop.f32.mrb[96].mxu0 }
 0x97a   :  { %v3058_v34 = vadd.f32 %v3798_v23, %v3289_v55  ;;  %v3049_v42 = vpop.f32.mrb[97].mxu0 }
 0x97b   :  { %v3050_v52 = vadd.f32 %v3289_v55, %v3049_v42  ;;  %v3799_v19 = vpop.f32.mrb[98].mxu0 }
 0x97c   :  { %v3090_v17 = vadd.f32 %v5506_v48, %v3058_v34  ;;  %v3061_v6 = vadd.f32 %v3799_v19, %v3289_v55  ;;  %v3052_v36 = vpop.f32.mrb[99].mxu0 }
 0x97d   :  { %v3088_v37 = vadd.f32 %v5500_v57, %v3050_v52  ;;  %v3053_v10 = vadd.f32 %v3289_v55, %v3052_v36 }
 0x97e   :  { %3106 = vst.msk [vmem:[#allocation2 + $0x50] sm:$0xff] %vm123_vm0, %v3090_v17  ;;  %v3091_v29 = vadd.f32 %v5497_v18, %v3061_v6 }
 0x97f   :  { %3104 = vst.msk [vmem:[#allocation2 + $0x40] sm:$0xff] %vm123_vm0, %v3088_v37  ;;  %v3089_v14 = vadd.f32 %v5502_v22, %v3053_v10 }
 0x980   :  { %3107 = vst.msk [vmem:[#allocation2 + $0x58] sm:$0xff] %vm123_vm0, %v3091_v29 }
 0x981   :  { %3105 = vst.msk [vmem:[#allocation2 + $0x48] sm:$0xff] %vm123_vm0, %v3089_v14  ;;  %v3802_v3 = vpop.f32.mrb[100].mxu0 }
 0x982   :  { %v3074_v56 = vadd.f32 %v3802_v3, %v3289_v55  ;;  %v3065_v48 = vpop.f32.mrb[101].mxu0 }
 0x983   :  { %v3066_v43 = vadd.f32 %v3289_v55, %v3065_v48  ;;  %v3803_v16 = vpop.f32.mrb[102].mxu0 }
 0x984   :  { %v3094_v57 = vadd.f32 %v5525_v61, %v3074_v56  ;;  %v3077_v9 = vadd.f32 %v3803_v16, %v3289_v55  ;;  %v3068_v11 = vpop.f32.mrb[103].mxu0 }
 0x985   :  { %v3092_v18 = vadd.f32 %v5521_v5, %v3066_v43  ;;  %v3069_v25 = vadd.f32 %v3289_v55, %v3068_v11 }
 0x986   :  { %3110 = vst.msk [vmem:[#allocation2 + $0x70] sm:$0xff] %vm123_vm0, %v3094_v57  ;;  %v3095_v22 = vadd.f32 %v5519_v15, %v3077_v9 }
 0x987   :  { %3108 = vst.msk [vmem:[#allocation2 + $0x60] sm:$0xff] %vm123_vm0, %v3092_v18  ;;  %v3093_v58 = vadd.f32 %v5523_v8, %v3069_v25 }
 0x988   :  { %3111 = vst.msk [vmem:[#allocation2 + $0x78] sm:$0xff] %vm123_vm0, %v3095_v22 }
 0x989   :  { %3109 = vst.msk [vmem:[#allocation2 + $0x68] sm:$0xff] %vm123_vm0, %v3093_v58 }
 0x98a   :  { %4155 = shalt.err (!%p4152_p4)
}
 0x98b   :  { %s4156_s10 = scalar_lea.hbm %s5609_s15, 2048 }
 0x98c   :  { %p4157_p5 = scmp.ne.s32.totalorder %s5609_s15, %s4156_s10  ;;  %p4160_p6 = scmp.lt.u32.totalorder %s4156_s10, %s5609_s15 }
 0x98e   :  { %p4162_p7 = pnand %p4160_p6, %p4157_p5 }
 0x990   :  { %4165 = shalt.err (!%p4162_p7)
}
 0x991   :  { %s4169_s3 = smov 128   ;;  %s4170_s11 = smov 8  }
 0x992   :  { %3123 = dma.vmem_to_hbm [thread:$0]  %s3118_s29, 2048, %s5609_s15, [#allocation3], %s4169_s3, %s4169_s3, %s4170_s11  }
 0x993   :  { %4166 = dma.done.wait [#allocation3], 2048  }
 0x994   :  { %4167 = vsyncadd [#allocation3], 4294965248 }
 0x995   :  { %3127 = vsyncpa [#allocation3], 1 }

</bundles_post_ra>
